<compile_context>
chip_gen: v7x
topology: tpu7x:2x2x1
jax: 0.10.0
libtpu: 0.0.40
codegen_flags: <defaults>
</compile_context>

<pallas_src>
import functools
import math

import jax
import jax.numpy as jnp
from jax.experimental import pallas as pl
from jax.experimental.pallas import tpu as pltpu


# ----------------------------------------------------------------------------
# Fused Pallas kernel: sum_kh (window_kh @ w_kh) + shift [+ residual] [-> ReLU]
# ----------------------------------------------------------------------------
def _conv_bn_kernel(x_ref, w_ref, sh_ref, *rest, taps, wo, trw, relu, has_res,
                    row_align):
    """One (batch, output-row-tile) grid cell of a fused Conv2d+BN(+res)(+ReLU).

    x_ref  : (R, 1, Hs*Wo, KW*Cin) f32  -- row-phase / column-shifted input views
    w_ref  : (KH, KW*Cin, Cout)    bf16 -- BatchNorm scale folded in
    sh_ref : (1, Cout)             f32  -- BatchNorm shift
    res_ref: (1, TRW, Cout)             -- optional residual tile
    o_ref  : (1, TRW, Cout)
    """
    if has_res:
        res_ref, o_ref = rest
    else:
        (o_ref,) = rest

    t = pl.program_id(1)
    cout = o_ref.shape[-1]
    base = t * trw

    acc = jnp.zeros((trw, cout), jnp.float32)
    # KH row taps fused in-kernel: each is a contiguous, aligned window of the
    # VMEM-resident source (fetched from HBM once per batch element).
    for kh, (src, ro) in enumerate(taps):
        start = base + ro * wo
        if row_align > 1:
            start = pl.multiple_of(start, row_align)
        win = x_ref[src, 0, pl.ds(start, trw), :]             # (TRW, KW*Cin) f32
        acc = acc + jnp.dot(win.astype(jnp.bfloat16), w_ref[kh],
                            preferred_element_type=jnp.float32)

    y = acc + sh_ref[...]                                     # BN shift (scale folded in w)
    if has_res:
        y = y + res_ref[0].astype(jnp.float32)                # fused shortcut add
    if relu:
        y = jnp.maximum(y, 0.0)
    o_ref[0] = y.astype(o_ref.dtype)                          # lane-dense store (Cout % 128 == 0 in demo)


def _pick_row_tile(ho, wo, max_rows=512):
    """Largest row tile (divisor of Ho) with <= max_rows flattened output rows."""
    tr = 1
    for cand in range(1, ho + 1):
        if ho % cand == 0 and cand * wo <= max_rows:
            tr = cand
    return tr


def conv2d_bn_act(x, w, scale, shift, *, stride, padding, dilation,
                  relu, residual=None, out_dtype=jnp.bfloat16):
    """Fused Conv2d(bias=False) + BatchNorm2d (inference) [+ residual] [+ ReLU].

    x: (B, H, W, Cin) channels-last.  w: (Cout, Cin, KH, KW) PyTorch layout.
    scale/shift: (Cout,) folded BN.  residual: optional (B, Ho, Wo, Cout).
    """
    B, H, W, Cin = x.shape
    Cout, _, KH, KW = w.shape
    s, p, d = stride, padding, dilation
    Ho = (H + 2 * p - d * (KH - 1) - 1) // s + 1
    Wo = (W + 2 * p - d * (KW - 1) - 1) // s + 1

    # Activation stream kept f32 so every in-kernel dynamic slice is (8,128)-tile
    # aligned; the matmuls themselves run in bf16 (cast in-kernel) and weights /
    # intermediate layer outputs are stored in bf16.
    xf = x.astype(jnp.float32)
    xp = jnp.pad(xf, ((0, 0), (p, p), (p, p), (0, 0))) if p > 0 else xf

    # Row-phase decomposition: stride is absorbed into wrapper-side views so that
    # the KH row taps + channel reduction stay fused inside the kernel and every
    # in-kernel access is a contiguous window.
    phases, taps = [], []
    for kh in range(KH):
        rp, ro = (kh * d) % s, (kh * d) // s
        if rp not in phases:
            phases.append(rp)
        taps.append((phases.index(rp), ro))
    max_ro = max(ro for _, ro in taps)
    Hs = Ho + max_ro

    srcs = []
    for rp in phases:
        rows = xp[:, rp::s, :, :][:, :Hs, :, :]
        if rows.shape[1] < Hs:
            rows = jnp.pad(rows, ((0, 0), (0, Hs - rows.shape[1]), (0, 0), (0, 0)))
        cols = [rows[:, :, kw * d: kw * d + (Wo - 1) * s + 1: s, :]
                for kw in range(KW)]
        srcs.append(jnp.concatenate(cols, axis=-1))           # (B, Hs, Wo, KW*Cin)
    R = len(phases)
    xsrc = jnp.stack(srcs, axis=0).reshape(R, B, Hs * Wo, KW * Cin)

    # Fold BN scale into the weights; per-row-tap (KH, KW*Cin, Cout) bf16 matrices.
    w_eff = w.astype(jnp.float32) * scale.astype(jnp.float32)[:, None, None, None]
    w_mat = jnp.transpose(w_eff, (2, 3, 1, 0)).reshape(KH, KW * Cin, Cout)
    w_mat = w_mat.astype(jnp.bfloat16)
    sh = shift.reshape(1, Cout).astype(jnp.float32)

    TR = _pick_row_tile(Ho, Wo)
    TRW = TR * Wo
    grid = (B, Ho // TR)
    row_align = 8 if (Wo % 8 == 0 and TRW % 8 == 0) else 1
    has_res = residual is not None

    in_specs = [
        # whole per-batch source image: block index changes only with b -> fetched once per b
        pl.BlockSpec((R, 1, Hs * Wo, KW * Cin), lambda b, t: (0, b, 0, 0)),
        pl.BlockSpec((KH, KW * Cin, Cout), lambda b, t: (0, 0, 0)),
        pl.BlockSpec((1, Cout), lambda b, t: (0, 0)),
    ]
    args = [xsrc, w_mat, sh]
    if has_res:
        in_specs.append(pl.BlockSpec((1, TRW, Cout), lambda b, t: (b, t, 0)))
        args.append(residual.reshape(B, Ho * Wo, Cout))
    out_spec = pl.BlockSpec((1, TRW, Cout), lambda b, t: (b, t, 0))

    # Explicit VMEM budget: double-buffered blocks + f32 accumulator + headroom,
    # capped well below v7x's 64 MiB per-core VMEM.
    res_bytes = TRW * Cout * residual.dtype.itemsize if has_res else 0
    blk_bytes = (R * Hs * Wo * KW * Cin * 4           # xsrc block (f32)
                 + KH * KW * Cin * Cout * 2           # weights (bf16)
                 + Cout * 4 + res_bytes
                 + TRW * Cout * jnp.dtype(out_dtype).itemsize
                 + TRW * Cout * 4)                    # accumulator
    vmem_limit = int(min(max(4 * blk_bytes, 16 * 1024 * 1024), 48 * 1024 * 1024))

    kernel = functools.partial(
        _conv_bn_kernel, taps=tuple(taps), wo=Wo, trw=TRW,
        relu=relu, has_res=has_res, row_align=row_align)

    y = pl.pallas_call(
        kernel,
        out_shape=jax.ShapeDtypeStruct((B, Ho * Wo, Cout), out_dtype),
        grid=grid,
        in_specs=in_specs,
        out_specs=out_spec,
        compiler_params=pltpu.CompilerParams(
            dimension_semantics=("parallel", "parallel"),
            vmem_limit_bytes=vmem_limit),
    )(*args)
    return y.reshape(B, Ho, Wo, Cout)


# ----------------------------------------------------------------------------
# FeatureExtractionLayer forward (eval-mode BatchNorm, residual basic blocks)
# ----------------------------------------------------------------------------
def _residual_block(x, prm, cfg, out_dtype):
    s, p, d = cfg["stride"], cfg["padding"], cfg["dilation"]
    out = conv2d_bn_act(x, prm["conv1"]["w"], prm["conv1"]["scale"],
                        prm["conv1"]["shift"], stride=s, padding=p, dilation=d,
                        relu=True)
    if cfg["has_ft"]:
        # featureTransformer = CB2D(inC, outC, kSize=1, stride, padding=0, dilation=1)
        sc = conv2d_bn_act(x, prm["ft"]["w"], prm["ft"]["scale"], prm["ft"]["shift"],
                           stride=s, padding=0, dilation=1, relu=False)
    else:
        sc = x
    # conv2 + BN + shortcut add + ReLU all fused into one kernel epilogue.
    return conv2d_bn_act(out, prm["conv2"]["w"], prm["conv2"]["scale"],
                         prm["conv2"]["shift"], stride=1, padding=p, dilation=d,
                         relu=True, residual=sc, out_dtype=out_dtype)


def feature_extraction_forward(x_nchw, params, cfgs):
    x = jnp.transpose(x_nchw, (0, 2, 3, 1))
    for i, (prm, cfg) in enumerate(zip(params, cfgs)):
        last = i == len(params) - 1
        x = _residual_block(x, prm, cfg, jnp.float32 if last else jnp.bfloat16)
    return jnp.transpose(x, (0, 3, 1, 2))


# ----------------------------------------------------------------------------
# Deterministic parameters (shapes per FeatureExtractionLayer.__init__)
# ----------------------------------------------------------------------------
def _make_conv_bn_params(key, cout, cin, k):
    k1, k2, k3, k4, k5 = jax.random.split(key, 5)
    fan_in = cin * k * k
    w = jax.random.normal(k1, (cout, cin, k, k), jnp.float32) / math.sqrt(fan_in)
    gamma = 1.0 + 0.1 * jax.random.normal(k2, (cout,), jnp.float32)
    beta = 0.1 * jax.random.normal(k3, (cout,), jnp.float32)
    mean = 0.1 * jax.random.normal(k4, (cout,), jnp.float32)
    var = 1.0 + 0.2 * jax.random.uniform(k5, (cout,), jnp.float32)
    scale = gamma / jnp.sqrt(var + 1e-5)          # eval-mode BatchNorm folded
    return {"w": w, "scale": scale, "shift": beta - mean * scale}


def make_feature_extraction_layer(key, in_ch, out_ch, n_blocks, stride, padding,
                                  dilation):
    params, cfgs = [], []
    pad_eff = dilation if dilation > 1 else padding
    for i in range(n_blocks):
        ic = in_ch if i == 0 else out_ch
        st = stride if i == 0 else 1
        has_ft = (i == 0) and (stride != 1 or in_ch != out_ch)
        key, kc1, kc2, kft = jax.random.split(key, 4)
        prm = {"conv1": _make_conv_bn_params(kc1, out_ch, ic, 3),
               "conv2": _make_conv_bn_params(kc2, out_ch, out_ch, 3)}
        if has_ft:
            prm["ft"] = _make_conv_bn_params(kft, out_ch, ic, 1)
        params.append(prm)
        cfgs.append({"stride": st, "padding": pad_eff, "dilation": dilation,
                     "has_ft": has_ft})
    return params, cfgs


# ----------------------------------------------------------------------------
# Pure-JAX (XLA) reference for correctness checking
# ----------------------------------------------------------------------------
def _ref_conv_bn(x, w, scale, shift, stride, padding, dilation, relu, residual=None):
    w_hwio = jnp.transpose(w, (2, 3, 1, 0))
    y = jax.lax.conv_general_dilated(
        x, w_hwio, window_strides=(stride, stride),
        padding=((padding, padding), (padding, padding)),
        rhs_dilation=(dilation, dilation),
        dimension_numbers=("NHWC", "HWIO", "NHWC"),
        precision=jax.lax.Precision.HIGHEST)
    y = y * scale + shift
    if residual is not None:
        y = y + residual
    return jnp.maximum(y, 0.0) if relu else y


def reference_forward(x_nchw, params, cfgs):
    x = jnp.transpose(x_nchw, (0, 2, 3, 1)).astype(jnp.float32)
    for prm, cfg in zip(params, cfgs):
        s, p, d = cfg["stride"], cfg["padding"], cfg["dilation"]
        out = _ref_conv_bn(x, prm["conv1"]["w"], prm["conv1"]["scale"],
                           prm["conv1"]["shift"], s, p, d, True)
        if cfg["has_ft"]:
            sc = _ref_conv_bn(x, prm["ft"]["w"], prm["ft"]["scale"],
                              prm["ft"]["shift"], s, 0, 1, False)
        else:
            sc = x
        x = _ref_conv_bn(out, prm["conv2"]["w"], prm["conv2"]["scale"],
                         prm["conv2"]["shift"], 1, p, d, True, residual=sc)
    return jnp.transpose(x, (0, 3, 1, 2))


if __name__ == "__main__":
    key = jax.random.PRNGKey(0)
    kx, kp = jax.random.split(key)

    # FeatureExtractionLayer(block, inChannels=64, outChannels=128, nBlocks=2,
    #                        stride=2, padding=1, dilation=1) on a (2, 64, 16, 16) input.
    B, Cin, H, W = 2, 64, 16, 16
    Cout, n_blocks, stride, padding, dilation = 128, 2, 2, 1, 1

    x = jax.random.normal(kx, (B, Cin, H, W), jnp.float32)
    params, cfgs = make_feature_extraction_layer(kp, Cin, Cout, n_blocks,
                                                 stride, padding, dilation)

    fwd = jax.jit(lambda xx, pp: feature_extraction_forward(xx, pp, cfgs))
    out = fwd(x, params)
    jax.block_until_ready(out)

    ref = reference_forward(x, params, cfgs)
    assert out.shape == (B, Cout, H // stride, W // stride), out.shape
    rel_err = float(jnp.linalg.norm(out.astype(jnp.float32) - ref)
                    / (jnp.linalg.norm(ref) + 1e-6))
    assert rel_err < 3e-2, f"mismatch vs XLA reference: rel_l2={rel_err:.4f}"

    print("KERNEL_OK")
</pallas_src>

<mosaic_0001>
module attributes {stable_mosaic.version = 11 : i64} {
  func.func @_conv_bn_kernel(%arg0: i32, %arg1: i32, %arg2: memref<2x1x72x192xf32, #tpu.memory_space<vmem>>, %arg3: memref<3x192x128xbf16, #tpu.memory_space<vmem>>, %arg4: memref<1x128xf32, #tpu.memory_space<vmem>>, %arg5: memref<1x64x128xbf16, #tpu.memory_space<vmem>>) attributes {dimension_semantics = [#tpu.dimension_semantics<parallel>, #tpu.dimension_semantics<parallel>], iteration_bounds = array<i64: 2, 1>, scalar_prefetch = 0 : i64, scratch_operands = 0 : i64, tpu.core_type = #tpu.core_type<tc>, window_params = [{transform_indices = @transform_0, window_bounds = array<i64: 2, 1, 72, 192>}, {pipeline_mode = #tpu.pipeline_mode<synchronous>, transform_indices = @transform_1, window_bounds = array<i64: 3, 192, 128>}, {pipeline_mode = #tpu.pipeline_mode<synchronous>, transform_indices = @transform_2, window_bounds = array<i64: 1, 128>}, {transform_indices = @transform_3, window_bounds = array<i64: 1, 64, 128>}]} {
    %c64_i32 = arith.constant 64 : i32
    %0 = arith.muli %arg1, %c64_i32 : i32
    %cst = arith.constant 0.000000e+00 : f32
    %1 = vector.broadcast %cst : f32 to vector<64x128xf32>
    %c0_i32 = arith.constant 0 : i32
    %2 = arith.addi %0, %c0_i32 : i32
    %3 = tpu.assume_multiple %2, 8 : i32
    %c0 = arith.constant 0 : index
    %c0_0 = arith.constant 0 : index
    %4 = arith.index_cast %3 : i32 to index
    %c0_1 = arith.constant 0 : index
    %5 = vector.load %arg2[%c0, %c0_0, %4, %c0_1] : memref<2x1x72x192xf32, #tpu.memory_space<vmem>>, vector<1x1x64x192xf32>
    %6 = vector.shape_cast %5 : vector<1x1x64x192xf32> to vector<64x192xf32>
    %7 = arith.truncf %6 : vector<64x192xf32> to vector<64x192xbf16>
    %c0_2 = arith.constant 0 : index
    %c0_3 = arith.constant 0 : index
    %c0_4 = arith.constant 0 : index
    %8 = vector.load %arg3[%c0_2, %c0_3, %c0_4] : memref<3x192x128xbf16, #tpu.memory_space<vmem>>, vector<1x192x128xbf16>
    %9 = vector.shape_cast %8 : vector<1x192x128xbf16> to vector<192x128xbf16>
    %cst_5 = arith.constant dense<0.000000e+00> : vector<64x128xf32>
    %10 = tpu.matmul %7, %9, %cst_5 {dimension_numbers = #tpu.dot_dimension_numbers<[1], [0], [0], [1], [0, 0, 1, 1], [], []>} : vector<64x192xbf16>, vector<192x128xbf16>, vector<64x128xf32> -> vector<64x128xf32>
    %11 = arith.addf %1, %10 : vector<64x128xf32>
    %c0_i32_6 = arith.constant 0 : i32
    %12 = arith.addi %0, %c0_i32_6 : i32
    %13 = tpu.assume_multiple %12, 8 : i32
    %c1 = arith.constant 1 : index
    %c0_7 = arith.constant 0 : index
    %14 = arith.index_cast %13 : i32 to index
    %c0_8 = arith.constant 0 : index
    %15 = vector.load %arg2[%c1, %c0_7, %14, %c0_8] : memref<2x1x72x192xf32, #tpu.memory_space<vmem>>, vector<1x1x64x192xf32>
    %16 = vector.shape_cast %15 : vector<1x1x64x192xf32> to vector<64x192xf32>
    %17 = arith.truncf %16 : vector<64x192xf32> to vector<64x192xbf16>
    %c1_9 = arith.constant 1 : index
    %c0_10 = arith.constant 0 : index
    %c0_11 = arith.constant 0 : index
    %18 = vector.load %arg3[%c1_9, %c0_10, %c0_11] : memref<3x192x128xbf16, #tpu.memory_space<vmem>>, vector<1x192x128xbf16>
    %19 = vector.shape_cast %18 : vector<1x192x128xbf16> to vector<192x128xbf16>
    %cst_12 = arith.constant dense<0.000000e+00> : vector<64x128xf32>
    %20 = tpu.matmul %17, %19, %cst_12 {dimension_numbers = #tpu.dot_dimension_numbers<[1], [0], [0], [1], [0, 0, 1, 1], [], []>} : vector<64x192xbf16>, vector<192x128xbf16>, vector<64x128xf32> -> vector<64x128xf32>
    %21 = arith.addf %11, %20 : vector<64x128xf32>
    %c8_i32 = arith.constant 8 : i32
    %22 = arith.addi %0, %c8_i32 : i32
    %23 = tpu.assume_multiple %22, 8 : i32
    %c0_13 = arith.constant 0 : index
    %c0_14 = arith.constant 0 : index
    %24 = arith.index_cast %23 : i32 to index
    %c0_15 = arith.constant 0 : index
    %25 = vector.load %arg2[%c0_13, %c0_14, %24, %c0_15] : memref<2x1x72x192xf32, #tpu.memory_space<vmem>>, vector<1x1x64x192xf32>
    %26 = vector.shape_cast %25 : vector<1x1x64x192xf32> to vector<64x192xf32>
    %27 = arith.truncf %26 : vector<64x192xf32> to vector<64x192xbf16>
    %c2 = arith.constant 2 : index
    %c0_16 = arith.constant 0 : index
    %c0_17 = arith.constant 0 : index
    %28 = vector.load %arg3[%c2, %c0_16, %c0_17] : memref<3x192x128xbf16, #tpu.memory_space<vmem>>, vector<1x192x128xbf16>
    %29 = vector.shape_cast %28 : vector<1x192x128xbf16> to vector<192x128xbf16>
    %cst_18 = arith.constant dense<0.000000e+00> : vector<64x128xf32>
    %30 = tpu.matmul %27, %29, %cst_18 {dimension_numbers = #tpu.dot_dimension_numbers<[1], [0], [0], [1], [0, 0, 1, 1], [], []>} : vector<64x192xbf16>, vector<192x128xbf16>, vector<64x128xf32> -> vector<64x128xf32>
    %31 = arith.addf %21, %30 : vector<64x128xf32>
    %c0_19 = arith.constant 0 : index
    %c0_20 = arith.constant 0 : index
    %32 = vector.load %arg4[%c0_19, %c0_20] : memref<1x128xf32, #tpu.memory_space<vmem>>, vector<1x128xf32>
    %33 = vector.broadcast %32 : vector<1x128xf32> to vector<64x128xf32>
    %34 = arith.addf %31, %33 : vector<64x128xf32>
    %cst_21 = arith.constant 0.000000e+00 : f32
    %35 = vector.broadcast %cst_21 : f32 to vector<64x128xf32>
    %36 = arith.maximumf %34, %35 : vector<64x128xf32>
    %37 = arith.truncf %36 : vector<64x128xf32> to vector<64x128xbf16>
    %c0_22 = arith.constant 0 : index
    %c0_23 = arith.constant 0 : index
    %c0_24 = arith.constant 0 : index
    %38 = vector.load %arg5[%c0_22, %c0_23, %c0_24] : memref<1x64x128xbf16, #tpu.memory_space<vmem>>, vector<1x64x128xbf16>
    %39 = vector.shape_cast %38 : vector<1x64x128xbf16> to vector<64x128xbf16>
    %40 = vector.shape_cast %37 : vector<64x128xbf16> to vector<1x64x128xbf16>
    tpu.vector_store %arg5[%c0_22, %c0_23, %c0_24], %40 {strides = array<i32>} : memref<1x64x128xbf16, #tpu.memory_space<vmem>>, vector<1x64x128xbf16>,
    return
  }
  func.func @transform_0(%arg0: i32, %arg1: i32) -> (i32, i32, i32, i32) {
    %c0_i32 = arith.constant 0 : i32
    %c0_i32_0 = arith.constant 0 : i32
    %c0_i32_1 = arith.constant 0 : i32
    %c0_i32_2 = arith.constant 0 : i32
    return %c0_i32, %arg0, %c0_i32_0, %c0_i32_1 : i32, i32, i32, i32
  }
  func.func @transform_1(%arg0: i32, %arg1: i32) -> (i32, i32, i32) {
    %c0_i32 = arith.constant 0 : i32
    %c0_i32_0 = arith.constant 0 : i32
    %c0_i32_1 = arith.constant 0 : i32
    %c0_i32_2 = arith.constant 0 : i32
    return %c0_i32, %c0_i32_0, %c0_i32_1 : i32, i32, i32
  }
  func.func @transform_2(%arg0: i32, %arg1: i32) -> (i32, i32) {
    %c0_i32 = arith.constant 0 : i32
    %c0_i32_0 = arith.constant 0 : i32
    %c0_i32_1 = arith.constant 0 : i32
    return %c0_i32, %c0_i32_0 : i32, i32
  }
  func.func @transform_3(%arg0: i32, %arg1: i32) -> (i32, i32, i32) {
    %c0_i32 = arith.constant 0 : i32
    %c0_i32_0 = arith.constant 0 : i32
    return %arg0, %arg1, %c0_i32 : i32, i32, i32
  }
}

module attributes {stable_mosaic.version = 11 : i64} {
  func.func @_conv_bn_kernel(%arg0: i32, %arg1: i32, %arg2: memref<1x1x64x64xf32, #tpu.memory_space<vmem>>, %arg3: memref<1x64x128xbf16, #tpu.memory_space<vmem>>, %arg4: memref<1x128xf32, #tpu.memory_space<vmem>>, %arg5: memref<1x64x128xbf16, #tpu.memory_space<vmem>>) attributes {dimension_semantics = [#tpu.dimension_semantics<parallel>, #tpu.dimension_semantics<parallel>], iteration_bounds = array<i64: 2, 1>, scalar_prefetch = 0 : i64, scratch_operands = 0 : i64, tpu.core_type = #tpu.core_type<tc>, window_params = [{transform_indices = @transform_0, window_bounds = array<i64: 1, 1, 64, 64>}, {pipeline_mode = #tpu.pipeline_mode<synchronous>, transform_indices = @transform_1, window_bounds = array<i64: 1, 64, 128>}, {pipeline_mode = #tpu.pipeline_mode<synchronous>, transform_indices = @transform_2, window_bounds = array<i64: 1, 128>}, {transform_indices = @transform_3, window_bounds = array<i64: 1, 64, 128>}]} {
    %c64_i32 = arith.constant 64 : i32
    %0 = arith.muli %arg1, %c64_i32 : i32
    %cst = arith.constant 0.000000e+00 : f32
    %1 = vector.broadcast %cst : f32 to vector<64x128xf32>
    %c0_i32 = arith.constant 0 : i32
    %2 = arith.addi %0, %c0_i32 : i32
    %3 = tpu.assume_multiple %2, 8 : i32
    %c0 = arith.constant 0 : index
    %c0_0 = arith.constant 0 : index
    %4 = arith.index_cast %3 : i32 to index
    %c0_1 = arith.constant 0 : index
    %5 = vector.load %arg2[%c0, %c0_0, %4, %c0_1] : memref<1x1x64x64xf32, #tpu.memory_space<vmem>>, vector<1x1x64x64xf32>
    %6 = vector.shape_cast %5 : vector<1x1x64x64xf32> to vector<64x64xf32>
    %7 = arith.truncf %6 : vector<64x64xf32> to vector<64x64xbf16>
    %c0_2 = arith.constant 0 : index
    %c0_3 = arith.constant 0 : index
    %c0_4 = arith.constant 0 : index
    %8 = vector.load %arg3[%c0_2, %c0_3, %c0_4] : memref<1x64x128xbf16, #tpu.memory_space<vmem>>, vector<1x64x128xbf16>
    %9 = vector.shape_cast %8 : vector<1x64x128xbf16> to vector<64x128xbf16>
    %cst_5 = arith.constant dense<0.000000e+00> : vector<64x128xf32>
    %10 = tpu.matmul %7, %9, %cst_5 {dimension_numbers = #tpu.dot_dimension_numbers<[1], [0], [0], [1], [0, 0, 1, 1], [], []>} : vector<64x64xbf16>, vector<64x128xbf16>, vector<64x128xf32> -> vector<64x128xf32>
    %11 = arith.addf %1, %10 : vector<64x128xf32>
    %c0_6 = arith.constant 0 : index
    %c0_7 = arith.constant 0 : index
    %12 = vector.load %arg4[%c0_6, %c0_7] : memref<1x128xf32, #tpu.memory_space<vmem>>, vector<1x128xf32>
    %13 = vector.broadcast %12 : vector<1x128xf32> to vector<64x128xf32>
    %14 = arith.addf %11, %13 : vector<64x128xf32>
    %15 = arith.truncf %14 : vector<64x128xf32> to vector<64x128xbf16>
    %c0_8 = arith.constant 0 : index
    %c0_9 = arith.constant 0 : index
    %c0_10 = arith.constant 0 : index
    %16 = vector.load %arg5[%c0_8, %c0_9, %c0_10] : memref<1x64x128xbf16, #tpu.memory_space<vmem>>, vector<1x64x128xbf16>
    %17 = vector.shape_cast %16 : vector<1x64x128xbf16> to vector<64x128xbf16>
    %18 = vector.shape_cast %15 : vector<64x128xbf16> to vector<1x64x128xbf16>
    tpu.vector_store %arg5[%c0_8, %c0_9, %c0_10], %18 {strides = array<i32>} : memref<1x64x128xbf16, #tpu.memory_space<vmem>>, vector<1x64x128xbf16>,
    return
  }
  func.func @transform_0(%arg0: i32, %arg1: i32) -> (i32, i32, i32, i32) {
    %c0_i32 = arith.constant 0 : i32
    %c0_i32_0 = arith.constant 0 : i32
    %c0_i32_1 = arith.constant 0 : i32
    %c0_i32_2 = arith.constant 0 : i32
    return %c0_i32, %arg0, %c0_i32_0, %c0_i32_1 : i32, i32, i32, i32
  }
  func.func @transform_1(%arg0: i32, %arg1: i32) -> (i32, i32, i32) {
    %c0_i32 = arith.constant 0 : i32
    %c0_i32_0 = arith.constant 0 : i32
    %c0_i32_1 = arith.constant 0 : i32
    %c0_i32_2 = arith.constant 0 : i32
    return %c0_i32, %c0_i32_0, %c0_i32_1 : i32, i32, i32
  }
  func.func @transform_2(%arg0: i32, %arg1: i32) -> (i32, i32) {
    %c0_i32 = arith.constant 0 : i32
    %c0_i32_0 = arith.constant 0 : i32
    %c0_i32_1 = arith.constant 0 : i32
    return %c0_i32, %c0_i32_0 : i32, i32
  }
  func.func @transform_3(%arg0: i32, %arg1: i32) -> (i32, i32, i32) {
    %c0_i32 = arith.constant 0 : i32
    %c0_i32_0 = arith.constant 0 : i32
    return %arg0, %arg1, %c0_i32 : i32, i32, i32
  }
}

module attributes {stable_mosaic.version = 11 : i64} {
  func.func @_conv_bn_kernel(%arg0: i32, %arg1: i32, %arg2: memref<1x1x80x384xf32, #tpu.memory_space<vmem>>, %arg3: memref<3x384x128xbf16, #tpu.memory_space<vmem>>, %arg4: memref<1x128xf32, #tpu.memory_space<vmem>>, %arg5: memref<1x64x128xbf16, #tpu.memory_space<vmem>>, %arg6: memref<1x64x128xbf16, #tpu.memory_space<vmem>>) attributes {dimension_semantics = [#tpu.dimension_semantics<parallel>, #tpu.dimension_semantics<parallel>], iteration_bounds = array<i64: 2, 1>, scalar_prefetch = 0 : i64, scratch_operands = 0 : i64, tpu.core_type = #tpu.core_type<tc>, window_params = [{transform_indices = @transform_0, window_bounds = array<i64: 1, 1, 80, 384>}, {pipeline_mode = #tpu.pipeline_mode<synchronous>, transform_indices = @transform_1, window_bounds = array<i64: 3, 384, 128>}, {pipeline_mode = #tpu.pipeline_mode<synchronous>, transform_indices = @transform_2, window_bounds = array<i64: 1, 128>}, {transform_indices = @transform_3, window_bounds = array<i64: 1, 64, 128>}, {transform_indices = @transform_4, window_bounds = array<i64: 1, 64, 128>}]} {
    %c64_i32 = arith.constant 64 : i32
    %0 = arith.muli %arg1, %c64_i32 : i32
    %cst = arith.constant 0.000000e+00 : f32
    %1 = vector.broadcast %cst : f32 to vector<64x128xf32>
    %c0_i32 = arith.constant 0 : i32
    %2 = arith.addi %0, %c0_i32 : i32
    %3 = tpu.assume_multiple %2, 8 : i32
    %c0 = arith.constant 0 : index
    %c0_0 = arith.constant 0 : index
    %4 = arith.index_cast %3 : i32 to index
    %c0_1 = arith.constant 0 : index
    %5 = vector.load %arg2[%c0, %c0_0, %4, %c0_1] : memref<1x1x80x384xf32, #tpu.memory_space<vmem>>, vector<1x1x64x384xf32>
    %6 = vector.shape_cast %5 : vector<1x1x64x384xf32> to vector<64x384xf32>
    %7 = arith.truncf %6 : vector<64x384xf32> to vector<64x384xbf16>
    %c0_2 = arith.constant 0 : index
    %c0_3 = arith.constant 0 : index
    %c0_4 = arith.constant 0 : index
    %8 = vector.load %arg3[%c0_2, %c0_3, %c0_4] : memref<3x384x128xbf16, #tpu.memory_space<vmem>>, vector<1x384x128xbf16>
    %9 = vector.shape_cast %8 : vector<1x384x128xbf16> to vector<384x128xbf16>
    %cst_5 = arith.constant dense<0.000000e+00> : vector<64x128xf32>
    %10 = tpu.matmul %7, %9, %cst_5 {dimension_numbers = #tpu.dot_dimension_numbers<[1], [0], [0], [1], [0, 0, 1, 1], [], []>} : vector<64x384xbf16>, vector<384x128xbf16>, vector<64x128xf32> -> vector<64x128xf32>
    %11 = arith.addf %1, %10 : vector<64x128xf32>
    %c8_i32 = arith.constant 8 : i32
    %12 = arith.addi %0, %c8_i32 : i32
    %13 = tpu.assume_multiple %12, 8 : i32
    %c0_6 = arith.constant 0 : index
    %c0_7 = arith.constant 0 : index
    %14 = arith.index_cast %13 : i32 to index
    %c0_8 = arith.constant 0 : index
    %15 = vector.load %arg2[%c0_6, %c0_7, %14, %c0_8] : memref<1x1x80x384xf32, #tpu.memory_space<vmem>>, vector<1x1x64x384xf32>
    %16 = vector.shape_cast %15 : vector<1x1x64x384xf32> to vector<64x384xf32>
    %17 = arith.truncf %16 : vector<64x384xf32> to vector<64x384xbf16>
    %c1 = arith.constant 1 : index
    %c0_9 = arith.constant 0 : index
    %c0_10 = arith.constant 0 : index
    %18 = vector.load %arg3[%c1, %c0_9, %c0_10] : memref<3x384x128xbf16, #tpu.memory_space<vmem>>, vector<1x384x128xbf16>
    %19 = vector.shape_cast %18 : vector<1x384x128xbf16> to vector<384x128xbf16>
    %cst_11 = arith.constant dense<0.000000e+00> : vector<64x128xf32>
    %20 = tpu.matmul %17, %19, %cst_11 {dimension_numbers = #tpu.dot_dimension_numbers<[1], [0], [0], [1], [0, 0, 1, 1], [], []>} : vector<64x384xbf16>, vector<384x128xbf16>, vector<64x128xf32> -> vector<64x128xf32>
    %21 = arith.addf %11, %20 : vector<64x128xf32>
    %c16_i32 = arith.constant 16 : i32
    %22 = arith.addi %0, %c16_i32 : i32
    %23 = tpu.assume_multiple %22, 8 : i32
    %c0_12 = arith.constant 0 : index
    %c0_13 = arith.constant 0 : index
    %24 = arith.index_cast %23 : i32 to index
    %c0_14 = arith.constant 0 : index
    %25 = vector.load %arg2[%c0_12, %c0_13, %24, %c0_14] : memref<1x1x80x384xf32, #tpu.memory_space<vmem>>, vector<1x1x64x384xf32>
    %26 = vector.shape_cast %25 : vector<1x1x64x384xf32> to vector<64x384xf32>
    %27 = arith.truncf %26 : vector<64x384xf32> to vector<64x384xbf16>
    %c2 = arith.constant 2 : index
    %c0_15 = arith.constant 0 : index
    %c0_16 = arith.constant 0 : index
    %28 = vector.load %arg3[%c2, %c0_15, %c0_16] : memref<3x384x128xbf16, #tpu.memory_space<vmem>>, vector<1x384x128xbf16>
    %29 = vector.shape_cast %28 : vector<1x384x128xbf16> to vector<384x128xbf16>
    %cst_17 = arith.constant dense<0.000000e+00> : vector<64x128xf32>
    %30 = tpu.matmul %27, %29, %cst_17 {dimension_numbers = #tpu.dot_dimension_numbers<[1], [0], [0], [1], [0, 0, 1, 1], [], []>} : vector<64x384xbf16>, vector<384x128xbf16>, vector<64x128xf32> -> vector<64x128xf32>
    %31 = arith.addf %21, %30 : vector<64x128xf32>
    %c0_18 = arith.constant 0 : index
    %c0_19 = arith.constant 0 : index
    %32 = vector.load %arg4[%c0_18, %c0_19] : memref<1x128xf32, #tpu.memory_space<vmem>>, vector<1x128xf32>
    %33 = vector.broadcast %32 : vector<1x128xf32> to vector<64x128xf32>
    %34 = arith.addf %31, %33 : vector<64x128xf32>
    %c0_20 = arith.constant 0 : index
    %c0_21 = arith.constant 0 : index
    %c0_22 = arith.constant 0 : index
    %35 = vector.load %arg5[%c0_20, %c0_21, %c0_22] : memref<1x64x128xbf16, #tpu.memory_space<vmem>>, vector<1x64x128xbf16>
    %36 = vector.shape_cast %35 : vector<1x64x128xbf16> to vector<64x128xbf16>
    %37 = arith.extf %36 : vector<64x128xbf16> to vector<64x128xf32>
    %38 = arith.addf %34, %37 : vector<64x128xf32>
    %cst_23 = arith.constant 0.000000e+00 : f32
    %39 = vector.broadcast %cst_23 : f32 to vector<64x128xf32>
    %40 = arith.maximumf %38, %39 : vector<64x128xf32>
    %41 = arith.truncf %40 : vector<64x128xf32> to vector<64x128xbf16>
    %c0_24 = arith.constant 0 : index
    %c0_25 = arith.constant 0 : index
    %c0_26 = arith.constant 0 : index
    %42 = vector.load %arg6[%c0_24, %c0_25, %c0_26] : memref<1x64x128xbf16, #tpu.memory_space<vmem>>, vector<1x64x128xbf16>
    %43 = vector.shape_cast %42 : vector<1x64x128xbf16> to vector<64x128xbf16>
    %44 = vector.shape_cast %41 : vector<64x128xbf16> to vector<1x64x128xbf16>
    tpu.vector_store %arg6[%c0_24, %c0_25, %c0_26], %44 {strides = array<i32>} : memref<1x64x128xbf16, #tpu.memory_space<vmem>>, vector<1x64x128xbf16>,
    return
  }
  func.func @transform_0(%arg0: i32, %arg1: i32) -> (i32, i32, i32, i32) {
    %c0_i32 = arith.constant 0 : i32
    %c0_i32_0 = arith.constant 0 : i32
    %c0_i32_1 = arith.constant 0 : i32
    %c0_i32_2 = arith.constant 0 : i32
    return %c0_i32, %arg0, %c0_i32_0, %c0_i32_1 : i32, i32, i32, i32
  }
  func.func @transform_1(%arg0: i32, %arg1: i32) -> (i32, i32, i32) {
    %c0_i32 = arith.constant 0 : i32
    %c0_i32_0 = arith.constant 0 : i32
    %c0_i32_1 = arith.constant 0 : i32
    %c0_i32_2 = arith.constant 0 : i32
    return %c0_i32, %c0_i32_0, %c0_i32_1 : i32, i32, i32
  }
  func.func @transform_2(%arg0: i32, %arg1: i32) -> (i32, i32) {
    %c0_i32 = arith.constant 0 : i32
    %c0_i32_0 = arith.constant 0 : i32
    %c0_i32_1 = arith.constant 0 : i32
    return %c0_i32, %c0_i32_0 : i32, i32
  }
  func.func @transform_3(%arg0: i32, %arg1: i32) -> (i32, i32, i32) {
    %c0_i32 = arith.constant 0 : i32
    %c0_i32_0 = arith.constant 0 : i32
    return %arg0, %arg1, %c0_i32 : i32, i32, i32
  }
  func.func @transform_4(%arg0: i32, %arg1: i32) -> (i32, i32, i32) {
    %c0_i32 = arith.constant 0 : i32
    %c0_i32_0 = arith.constant 0 : i32
    return %arg0, %arg1, %c0_i32 : i32, i32, i32
  }
}

module attributes {stable_mosaic.version = 11 : i64} {
  func.func @_conv_bn_kernel(%arg0: i32, %arg1: i32, %arg2: memref<1x1x80x384xf32, #tpu.memory_space<vmem>>, %arg3: memref<3x384x128xbf16, #tpu.memory_space<vmem>>, %arg4: memref<1x128xf32, #tpu.memory_space<vmem>>, %arg5: memref<1x64x128xbf16, #tpu.memory_space<vmem>>) attributes {dimension_semantics = [#tpu.dimension_semantics<parallel>, #tpu.dimension_semantics<parallel>], iteration_bounds = array<i64: 2, 1>, scalar_prefetch = 0 : i64, scratch_operands = 0 : i64, tpu.core_type = #tpu.core_type<tc>, window_params = [{transform_indices = @transform_0, window_bounds = array<i64: 1, 1, 80, 384>}, {pipeline_mode = #tpu.pipeline_mode<synchronous>, transform_indices = @transform_1, window_bounds = array<i64: 3, 384, 128>}, {pipeline_mode = #tpu.pipeline_mode<synchronous>, transform_indices = @transform_2, window_bounds = array<i64: 1, 128>}, {transform_indices = @transform_3, window_bounds = array<i64: 1, 64, 128>}]} {
    %c64_i32 = arith.constant 64 : i32
    %0 = arith.muli %arg1, %c64_i32 : i32
    %cst = arith.constant 0.000000e+00 : f32
    %1 = vector.broadcast %cst : f32 to vector<64x128xf32>
    %c0_i32 = arith.constant 0 : i32
    %2 = arith.addi %0, %c0_i32 : i32
    %3 = tpu.assume_multiple %2, 8 : i32
    %c0 = arith.constant 0 : index
    %c0_0 = arith.constant 0 : index
    %4 = arith.index_cast %3 : i32 to index
    %c0_1 = arith.constant 0 : index
    %5 = vector.load %arg2[%c0, %c0_0, %4, %c0_1] : memref<1x1x80x384xf32, #tpu.memory_space<vmem>>, vector<1x1x64x384xf32>
    %6 = vector.shape_cast %5 : vector<1x1x64x384xf32> to vector<64x384xf32>
    %7 = arith.truncf %6 : vector<64x384xf32> to vector<64x384xbf16>
    %c0_2 = arith.constant 0 : index
    %c0_3 = arith.constant 0 : index
    %c0_4 = arith.constant 0 : index
    %8 = vector.load %arg3[%c0_2, %c0_3, %c0_4] : memref<3x384x128xbf16, #tpu.memory_space<vmem>>, vector<1x384x128xbf16>
    %9 = vector.shape_cast %8 : vector<1x384x128xbf16> to vector<384x128xbf16>
    %cst_5 = arith.constant dense<0.000000e+00> : vector<64x128xf32>
    %10 = tpu.matmul %7, %9, %cst_5 {dimension_numbers = #tpu.dot_dimension_numbers<[1], [0], [0], [1], [0, 0, 1, 1], [], []>} : vector<64x384xbf16>, vector<384x128xbf16>, vector<64x128xf32> -> vector<64x128xf32>
    %11 = arith.addf %1, %10 : vector<64x128xf32>
    %c8_i32 = arith.constant 8 : i32
    %12 = arith.addi %0, %c8_i32 : i32
    %13 = tpu.assume_multiple %12, 8 : i32
    %c0_6 = arith.constant 0 : index
    %c0_7 = arith.constant 0 : index
    %14 = arith.index_cast %13 : i32 to index
    %c0_8 = arith.constant 0 : index
    %15 = vector.load %arg2[%c0_6, %c0_7, %14, %c0_8] : memref<1x1x80x384xf32, #tpu.memory_space<vmem>>, vector<1x1x64x384xf32>
    %16 = vector.shape_cast %15 : vector<1x1x64x384xf32> to vector<64x384xf32>
    %17 = arith.truncf %16 : vector<64x384xf32> to vector<64x384xbf16>
    %c1 = arith.constant 1 : index
    %c0_9 = arith.constant 0 : index
    %c0_10 = arith.constant 0 : index
    %18 = vector.load %arg3[%c1, %c0_9, %c0_10] : memref<3x384x128xbf16, #tpu.memory_space<vmem>>, vector<1x384x128xbf16>
    %19 = vector.shape_cast %18 : vector<1x384x128xbf16> to vector<384x128xbf16>
    %cst_11 = arith.constant dense<0.000000e+00> : vector<64x128xf32>
    %20 = tpu.matmul %17, %19, %cst_11 {dimension_numbers = #tpu.dot_dimension_numbers<[1], [0], [0], [1], [0, 0, 1, 1], [], []>} : vector<64x384xbf16>, vector<384x128xbf16>, vector<64x128xf32> -> vector<64x128xf32>
    %21 = arith.addf %11, %20 : vector<64x128xf32>
    %c16_i32 = arith.constant 16 : i32
    %22 = arith.addi %0, %c16_i32 : i32
    %23 = tpu.assume_multiple %22, 8 : i32
    %c0_12 = arith.constant 0 : index
    %c0_13 = arith.constant 0 : index
    %24 = arith.index_cast %23 : i32 to index
    %c0_14 = arith.constant 0 : index
    %25 = vector.load %arg2[%c0_12, %c0_13, %24, %c0_14] : memref<1x1x80x384xf32, #tpu.memory_space<vmem>>, vector<1x1x64x384xf32>
    %26 = vector.shape_cast %25 : vector<1x1x64x384xf32> to vector<64x384xf32>
    %27 = arith.truncf %26 : vector<64x384xf32> to vector<64x384xbf16>
    %c2 = arith.constant 2 : index
    %c0_15 = arith.constant 0 : index
    %c0_16 = arith.constant 0 : index
    %28 = vector.load %arg3[%c2, %c0_15, %c0_16] : memref<3x384x128xbf16, #tpu.memory_space<vmem>>, vector<1x384x128xbf16>
    %29 = vector.shape_cast %28 : vector<1x384x128xbf16> to vector<384x128xbf16>
    %cst_17 = arith.constant dense<0.000000e+00> : vector<64x128xf32>
    %30 = tpu.matmul %27, %29, %cst_17 {dimension_numbers = #tpu.dot_dimension_numbers<[1], [0], [0], [1], [0, 0, 1, 1], [], []>} : vector<64x384xbf16>, vector<384x128xbf16>, vector<64x128xf32> -> vector<64x128xf32>
    %31 = arith.addf %21, %30 : vector<64x128xf32>
    %c0_18 = arith.constant 0 : index
    %c0_19 = arith.constant 0 : index
    %32 = vector.load %arg4[%c0_18, %c0_19] : memref<1x128xf32, #tpu.memory_space<vmem>>, vector<1x128xf32>
    %33 = vector.broadcast %32 : vector<1x128xf32> to vector<64x128xf32>
    %34 = arith.addf %31, %33 : vector<64x128xf32>
    %cst_20 = arith.constant 0.000000e+00 : f32
    %35 = vector.broadcast %cst_20 : f32 to vector<64x128xf32>
    %36 = arith.maximumf %34, %35 : vector<64x128xf32>
    %37 = arith.truncf %36 : vector<64x128xf32> to vector<64x128xbf16>
    %c0_21 = arith.constant 0 : index
    %c0_22 = arith.constant 0 : index
    %c0_23 = arith.constant 0 : index
    %38 = vector.load %arg5[%c0_21, %c0_22, %c0_23] : memref<1x64x128xbf16, #tpu.memory_space<vmem>>, vector<1x64x128xbf16>
    %39 = vector.shape_cast %38 : vector<1x64x128xbf16> to vector<64x128xbf16>
    %40 = vector.shape_cast %37 : vector<64x128xbf16> to vector<1x64x128xbf16>
    tpu.vector_store %arg5[%c0_21, %c0_22, %c0_23], %40 {strides = array<i32>} : memref<1x64x128xbf16, #tpu.memory_space<vmem>>, vector<1x64x128xbf16>,
    return
  }
  func.func @transform_0(%arg0: i32, %arg1: i32) -> (i32, i32, i32, i32) {
    %c0_i32 = arith.constant 0 : i32
    %c0_i32_0 = arith.constant 0 : i32
    %c0_i32_1 = arith.constant 0 : i32
    %c0_i32_2 = arith.constant 0 : i32
    return %c0_i32, %arg0, %c0_i32_0, %c0_i32_1 : i32, i32, i32, i32
  }
  func.func @transform_1(%arg0: i32, %arg1: i32) -> (i32, i32, i32) {
    %c0_i32 = arith.constant 0 : i32
    %c0_i32_0 = arith.constant 0 : i32
    %c0_i32_1 = arith.constant 0 : i32
    %c0_i32_2 = arith.constant 0 : i32
    return %c0_i32, %c0_i32_0, %c0_i32_1 : i32, i32, i32
  }
  func.func @transform_2(%arg0: i32, %arg1: i32) -> (i32, i32) {
    %c0_i32 = arith.constant 0 : i32
    %c0_i32_0 = arith.constant 0 : i32
    %c0_i32_1 = arith.constant 0 : i32
    return %c0_i32, %c0_i32_0 : i32, i32
  }
  func.func @transform_3(%arg0: i32, %arg1: i32) -> (i32, i32, i32) {
    %c0_i32 = arith.constant 0 : i32
    %c0_i32_0 = arith.constant 0 : i32
    return %arg0, %arg1, %c0_i32 : i32, i32, i32
  }
}

module attributes {stable_mosaic.version = 11 : i64} {
  func.func @_conv_bn_kernel(%arg0: i32, %arg1: i32, %arg2: memref<1x1x80x384xf32, #tpu.memory_space<vmem>>, %arg3: memref<3x384x128xbf16, #tpu.memory_space<vmem>>, %arg4: memref<1x128xf32, #tpu.memory_space<vmem>>, %arg5: memref<1x64x128xbf16, #tpu.memory_space<vmem>>, %arg6: memref<1x64x128xf32, #tpu.memory_space<vmem>>) attributes {dimension_semantics = [#tpu.dimension_semantics<parallel>, #tpu.dimension_semantics<parallel>], iteration_bounds = array<i64: 2, 1>, scalar_prefetch = 0 : i64, scratch_operands = 0 : i64, tpu.core_type = #tpu.core_type<tc>, window_params = [{transform_indices = @transform_0, window_bounds = array<i64: 1, 1, 80, 384>}, {pipeline_mode = #tpu.pipeline_mode<synchronous>, transform_indices = @transform_1, window_bounds = array<i64: 3, 384, 128>}, {pipeline_mode = #tpu.pipeline_mode<synchronous>, transform_indices = @transform_2, window_bounds = array<i64: 1, 128>}, {transform_indices = @transform_3, window_bounds = array<i64: 1, 64, 128>}, {transform_indices = @transform_4, window_bounds = array<i64: 1, 64, 128>}]} {
    %c64_i32 = arith.constant 64 : i32
    %0 = arith.muli %arg1, %c64_i32 : i32
    %cst = arith.constant 0.000000e+00 : f32
    %1 = vector.broadcast %cst : f32 to vector<64x128xf32>
    %c0_i32 = arith.constant 0 : i32
    %2 = arith.addi %0, %c0_i32 : i32
    %3 = tpu.assume_multiple %2, 8 : i32
    %c0 = arith.constant 0 : index
    %c0_0 = arith.constant 0 : index
    %4 = arith.index_cast %3 : i32 to index
    %c0_1 = arith.constant 0 : index
    %5 = vector.load %arg2[%c0, %c0_0, %4, %c0_1] : memref<1x1x80x384xf32, #tpu.memory_space<vmem>>, vector<1x1x64x384xf32>
    %6 = vector.shape_cast %5 : vector<1x1x64x384xf32> to vector<64x384xf32>
    %7 = arith.truncf %6 : vector<64x384xf32> to vector<64x384xbf16>
    %c0_2 = arith.constant 0 : index
    %c0_3 = arith.constant 0 : index
    %c0_4 = arith.constant 0 : index
    %8 = vector.load %arg3[%c0_2, %c0_3, %c0_4] : memref<3x384x128xbf16, #tpu.memory_space<vmem>>, vector<1x384x128xbf16>
    %9 = vector.shape_cast %8 : vector<1x384x128xbf16> to vector<384x128xbf16>
    %cst_5 = arith.constant dense<0.000000e+00> : vector<64x128xf32>
    %10 = tpu.matmul %7, %9, %cst_5 {dimension_numbers = #tpu.dot_dimension_numbers<[1], [0], [0], [1], [0, 0, 1, 1], [], []>} : vector<64x384xbf16>, vector<384x128xbf16>, vector<64x128xf32> -> vector<64x128xf32>
    %11 = arith.addf %1, %10 : vector<64x128xf32>
    %c8_i32 = arith.constant 8 : i32
    %12 = arith.addi %0, %c8_i32 : i32
    %13 = tpu.assume_multiple %12, 8 : i32
    %c0_6 = arith.constant 0 : index
    %c0_7 = arith.constant 0 : index
    %14 = arith.index_cast %13 : i32 to index
    %c0_8 = arith.constant 0 : index
    %15 = vector.load %arg2[%c0_6, %c0_7, %14, %c0_8] : memref<1x1x80x384xf32, #tpu.memory_space<vmem>>, vector<1x1x64x384xf32>
    %16 = vector.shape_cast %15 : vector<1x1x64x384xf32> to vector<64x384xf32>
    %17 = arith.truncf %16 : vector<64x384xf32> to vector<64x384xbf16>
    %c1 = arith.constant 1 : index
    %c0_9 = arith.constant 0 : index
    %c0_10 = arith.constant 0 : index
    %18 = vector.load %arg3[%c1, %c0_9, %c0_10] : memref<3x384x128xbf16, #tpu.memory_space<vmem>>, vector<1x384x128xbf16>
    %19 = vector.shape_cast %18 : vector<1x384x128xbf16> to vector<384x128xbf16>
    %cst_11 = arith.constant dense<0.000000e+00> : vector<64x128xf32>
    %20 = tpu.matmul %17, %19, %cst_11 {dimension_numbers = #tpu.dot_dimension_numbers<[1], [0], [0], [1], [0, 0, 1, 1], [], []>} : vector<64x384xbf16>, vector<384x128xbf16>, vector<64x128xf32> -> vector<64x128xf32>
    %21 = arith.addf %11, %20 : vector<64x128xf32>
    %c16_i32 = arith.constant 16 : i32
    %22 = arith.addi %0, %c16_i32 : i32
    %23 = tpu.assume_multiple %22, 8 : i32
    %c0_12 = arith.constant 0 : index
    %c0_13 = arith.constant 0 : index
    %24 = arith.index_cast %23 : i32 to index
    %c0_14 = arith.constant 0 : index
    %25 = vector.load %arg2[%c0_12, %c0_13, %24, %c0_14] : memref<1x1x80x384xf32, #tpu.memory_space<vmem>>, vector<1x1x64x384xf32>
    %26 = vector.shape_cast %25 : vector<1x1x64x384xf32> to vector<64x384xf32>
    %27 = arith.truncf %26 : vector<64x384xf32> to vector<64x384xbf16>
    %c2 = arith.constant 2 : index
    %c0_15 = arith.constant 0 : index
    %c0_16 = arith.constant 0 : index
    %28 = vector.load %arg3[%c2, %c0_15, %c0_16] : memref<3x384x128xbf16, #tpu.memory_space<vmem>>, vector<1x384x128xbf16>
    %29 = vector.shape_cast %28 : vector<1x384x128xbf16> to vector<384x128xbf16>
    %cst_17 = arith.constant dense<0.000000e+00> : vector<64x128xf32>
    %30 = tpu.matmul %27, %29, %cst_17 {dimension_numbers = #tpu.dot_dimension_numbers<[1], [0], [0], [1], [0, 0, 1, 1], [], []>} : vector<64x384xbf16>, vector<384x128xbf16>, vector<64x128xf32> -> vector<64x128xf32>
    %31 = arith.addf %21, %30 : vector<64x128xf32>
    %c0_18 = arith.constant 0 : index
    %c0_19 = arith.constant 0 : index
    %32 = vector.load %arg4[%c0_18, %c0_19] : memref<1x128xf32, #tpu.memory_space<vmem>>, vector<1x128xf32>
    %33 = vector.broadcast %32 : vector<1x128xf32> to vector<64x128xf32>
    %34 = arith.addf %31, %33 : vector<64x128xf32>
    %c0_20 = arith.constant 0 : index
    %c0_21 = arith.constant 0 : index
    %c0_22 = arith.constant 0 : index
    %35 = vector.load %arg5[%c0_20, %c0_21, %c0_22] : memref<1x64x128xbf16, #tpu.memory_space<vmem>>, vector<1x64x128xbf16>
    %36 = vector.shape_cast %35 : vector<1x64x128xbf16> to vector<64x128xbf16>
    %37 = arith.extf %36 : vector<64x128xbf16> to vector<64x128xf32>
    %38 = arith.addf %34, %37 : vector<64x128xf32>
    %cst_23 = arith.constant 0.000000e+00 : f32
    %39 = vector.broadcast %cst_23 : f32 to vector<64x128xf32>
    %40 = arith.maximumf %38, %39 : vector<64x128xf32>
    %c0_24 = arith.constant 0 : index
    %c0_25 = arith.constant 0 : index
    %c0_26 = arith.constant 0 : index
    %41 = vector.load %arg6[%c0_24, %c0_25, %c0_26] : memref<1x64x128xf32, #tpu.memory_space<vmem>>, vector<1x64x128xf32>
    %42 = vector.shape_cast %41 : vector<1x64x128xf32> to vector<64x128xf32>
    %43 = vector.shape_cast %40 : vector<64x128xf32> to vector<1x64x128xf32>
    tpu.vector_store %arg6[%c0_24, %c0_25, %c0_26], %43 {strides = array<i32>} : memref<1x64x128xf32, #tpu.memory_space<vmem>>, vector<1x64x128xf32>,
    return
  }
  func.func @transform_0(%arg0: i32, %arg1: i32) -> (i32, i32, i32, i32) {
    %c0_i32 = arith.constant 0 : i32
    %c0_i32_0 = arith.constant 0 : i32
    %c0_i32_1 = arith.constant 0 : i32
    %c0_i32_2 = arith.constant 0 : i32
    return %c0_i32, %arg0, %c0_i32_0, %c0_i32_1 : i32, i32, i32, i32
  }
  func.func @transform_1(%arg0: i32, %arg1: i32) -> (i32, i32, i32) {
    %c0_i32 = arith.constant 0 : i32
    %c0_i32_0 = arith.constant 0 : i32
    %c0_i32_1 = arith.constant 0 : i32
    %c0_i32_2 = arith.constant 0 : i32
    return %c0_i32, %c0_i32_0, %c0_i32_1 : i32, i32, i32
  }
  func.func @transform_2(%arg0: i32, %arg1: i32) -> (i32, i32) {
    %c0_i32 = arith.constant 0 : i32
    %c0_i32_0 = arith.constant 0 : i32
    %c0_i32_1 = arith.constant 0 : i32
    return %c0_i32, %c0_i32_0 : i32, i32
  }
  func.func @transform_3(%arg0: i32, %arg1: i32) -> (i32, i32, i32) {
    %c0_i32 = arith.constant 0 : i32
    %c0_i32_0 = arith.constant 0 : i32
    return %arg0, %arg1, %c0_i32 : i32, i32, i32
  }
  func.func @transform_4(%arg0: i32, %arg1: i32) -> (i32, i32, i32) {
    %c0_i32 = arith.constant 0 : i32
    %c0_i32_0 = arith.constant 0 : i32
    return %arg0, %arg1, %c0_i32 : i32, i32, i32
  }
}

</mosaic_0001>

<bundles_post_ra>
// kernel: _lambda_.6
= control target key start
LH: loop header
LB: loop body
LE: loop exit
PB: predicated region body
PF: predicated region fallthrough
CT: control target
= control target key end

     0   :  { %s614_s12 = smov 0   ;;  %s616_s13 = smov 0   ;;  %s670_s0 = inlined_call_operand.vmem [shape: f32[1,2,64,64], index: 0, kind: input, shape index: {}]   ;;  %s671_s1 = inlined_call_operand.vmem [shape: bf16[1,64,128], index: 1, kind: input, shape index: {}]   ;;  %s672_s2 = inlined_call_operand.vmem [shape: f32[1,128], index: 2, kind: input, shape index: {}]   ;;  %s673_s3 = inlined_call_operand.vmem [shape: bf16[2,64,128], index: 3, kind: output, shape index: {}]  }
   0x1   :  { %s618_s14 = smov 0  }
   0x2 LB: > { %s25_s15 = sadd.s32 1, %s588_s13  ;;  %p453_p0 = scmp.ge.s32.totalorder %s592_s14, 1  ;;  %s592_s14 = sphi %s618_s14, %s13_s14   ;;  %s588_s13 = sphi %s616_s13, %s675_s13   ;;  %s584_s12 = sphi %s614_s12, %s674_s12  }
   0x3   : > { %p27_p1 = scmp.ge.s32.totalorder %s25_s15, 2  ;;  %p151_p2 = scmp.lt.s32.totalorder %s592_s14, 3 }
   0x5   : > { %s677_s15 = smov (%p27_p1, %s25_s15), 0  ;;  %p152_p3 = pnand %p453_p0, %p151_p2 }
   0x6   : > { %v566_v0 = vld [vmem:[%s671_s1] sm:$0xff] (!%p152_p3)   ;;  %p179_p4 = scmp.lt.s32.totalorder (!%p152_p3), %s584_s12, 1  ;;  %v567_v1 = vld [vmem:[%s671_s1 + $0x8] sm:$0xff] (!%p152_p3)   ;;  %v568_v2 = vld [vmem:[%s671_s1 + $0x10] sm:$0xff] (!%p152_p3)   ;;  %vm248_vm0 = vcmask (!%p152_p3), 523264  }
   0x7   : > { %155 = sbr.rel (%p152_p3) target bundleno = 244 (0xf4), region = 32  ;;  %518 = vmatprep.subr.bf16.mxu0 (!%p152_p3), %v566_v0  ;;  %534 = vmatprep.subr.bf16.mxu1 (!%p152_p3), %v566_v0  ;;  %v569_v8 = vld [vmem:[%s671_s1 + $0x18] sm:$0xff] (!%p152_p3)   ;;  %v458_v17 = vld [vmem:[%s672_s2] ss:$0 sm:$0xff] (!%p152_p3) }
   0x8   : > { %519 = vmatpush3.bf16.msra.mxu0 (!%p152_p3), %v566_v0  ;;  %538 = vmatpush3.bf16.msra.mxu1 (!%p152_p3), %v566_v0 }
   0x9   : > { %520 = vmatprep.subr.bf16.mxu0 (!%p152_p3), %v567_v1  ;;  %535 = vmatprep.subr.bf16.mxu1 (!%p152_p3), %v567_v1 }
   0xc   : > { %521 = vmatpush3.bf16.msra.mxu0 (!%p152_p3), %v567_v1  ;;  %539 = vmatpush3.bf16.msra.mxu1 (!%p152_p3), %v567_v1 }
   0xd   : > { %522 = vmatprep.subr.bf16.mxu0 (!%p152_p3), %v568_v2  ;;  %536 = vmatprep.subr.bf16.mxu1 (!%p152_p3), %v568_v2 }
   0xe   : > { %s679_s12 = smov (!%p179_p4, %s584_s12), 1 }
   0xf   : > { %s477_s22 = sshll.u32 %s679_s12, 6  ;;  %s478_s30 = sshll.u32 %s679_s12, 5 }
  0x10   : > { %s183_s25 = scalar_lea.vmem %s670_s0, %s477_s22  ;;  %523 = vmatpush3.bf16.msra.mxu0 %v568_v2  ;;  %540 = vmatpush3.bf16.msra.mxu1 %v568_v2  ;;  %s192_s6 = scalar_lea.vmem %s673_s3, %s478_s30 }
  0x11   : > { %v197_v3 = vld [vmem:[%s183_s25] sm:$0xff]  ;;  %v198_v4 = vld [vmem:[%s183_s25 + $0x8] sm:$0xff]  ;;  %v199_v10 = vld [vmem:[%s183_s25 + $0x10] sm:$0xff]  ;;  %524 = vmatprep.subr.bf16.mxu0 %v569_v8  ;;  %537 = vmatprep.subr.bf16.mxu1 %v569_v8 }
  0x12   : > { %v201_v5 = vld [vmem:[%s183_s25 + $0x20] sm:$0xff]  ;;  %v205_v6 = vpack.c.bf16 %v198_v4, %v197_v3  ;;  %v202_v7 = vld [vmem:[%s183_s25 + $0x28] sm:$0xff]  ;;  %v200_v11 = vld [vmem:[%s183_s25 + $0x18] sm:$0xff] }
  0x13   : > { %v207_v9 = vpack.c.bf16 %v202_v7, %v201_v5  ;;  %v203_v12 = vld [vmem:[%s183_s25 + $0x30] sm:$0xff]  ;;  %v204_v13 = vld [vmem:[%s183_s25 + $0x38] sm:$0xff]  ;;  %v206_v14 = vpack.c.bf16 %v200_v11, %v199_v10 }
  0x14   : > { %526 = vmatprep.mubr.msk.bf16.mxu0 %vm248_vm0, %v205_v6  ;;  %v208_v15 = vpack.c.bf16 %v204_v13, %v203_v12  ;;  %525 = vmatpush3.bf16.msra.mxu0 %v569_v8 }
  0x15   : > { %530 = vmatprep.mubr.msk.bf16.mxu1 %vm248_vm0, %v207_v9  ;;  %541 = vmatpush3.bf16.msra.mxu1 %v569_v8 }
  0x17   : > { %527 = vmatmul.mubr.msk.bf16.vlgmr.msra.gmra.mrb[0].mxu0 %vm248_vm0, %v206_v14 }
  0x18   : > { %531 = vmatmul.mubr.msk.bf16.vlgmr.msra.gmra.mrb[0].mxu1 %vm248_vm0, %v208_v15 }
  0xea   : > { %v528_v16 = vpop.f32.mrb[0].mxu0 }
  0xeb   : > { %v532_v18 = vpop.f32.mrb[0].mxu1  ;;  %v295_v19 = vpop.f32.mrb[1].mxu0  ;;  %v304_v23 = vadd.f32 %v528_v16, %v458_v17 }
  0xec   : > { %v311_v20 = vpop.f32.mrb[1].mxu1  ;;  %v529_v21 = vpop.f32.mrb[2].mxu0  ;;  %v320_v24 = vadd.f32 %v532_v18, %v458_v17  ;;  %v296_v29 = vadd.f32 %v458_v17, %v295_v19 }
  0xed   : > { %v533_v22 = vpop.f32.mrb[2].mxu1  ;;  %v307_v25 = vadd.f32 %v529_v21, %v458_v17  ;;  %v298_v27 = vpop.f32.mrb[3].mxu0  ;;  %v312_v30 = vadd.f32 %v458_v17, %v311_v20 }
  0xee   : > { %v323_v26 = vadd.f32 %v533_v22, %v458_v17  ;;  %v314_v28 = vpop.f32.mrb[3].mxu1  ;;  %v299_v31 = vadd.f32 %v458_v17, %v298_v27 }
  0xef   : > { %v315_v32 = vadd.f32 %v458_v17, %v314_v28  ;;  %v495_v33 = vpack.c.bf16 %v307_v25, %v304_v23 }
  0xf0   : > { %v505_v34 = vpack.c.bf16 %v323_v26, %v320_v24  ;;  %v490_v35 = vpack.c.bf16 %v299_v31, %v296_v29 }
  0xf1   : > { %v500_v36 = vpack.c.bf16 %v315_v32, %v312_v30  ;;  %507 = vst [vmem:[%s192_s6 + $0x8] sm:$0xff] %v495_v33  }
  0xf2   : > { %509 = vst [vmem:[%s192_s6 + $0x18] sm:$0xff] %v505_v34   ;;  %491 = vst [vmem:[%s192_s6] sm:$0xff] %v490_v35  }
  0xf3   : > { %508 = vst [vmem:[%s192_s6 + $0x10] sm:$0xff] %v500_v36  }
  0xf4 PF: > { %s13_s14 = sadd.s32 1, %s592_s14   ;;  %s674_s12 = smov %s588_s13 }
  0xf5   : > { %p10_p5 = scmp.ge.s32.totalorder %s13_s14, 4   ;;  %s675_s13 = smov %s677_s15 }
  0xf7   :  { %12 = sbr.rel (!%p10_p5) target bundleno = 2 (0x2), region = 63 }

// kernel: _lambda_.5
= control target key start
LH: loop header
LB: loop body
LE: loop exit
PB: predicated region body
PF: predicated region fallthrough
CT: control target
= control target key end

     0   :  { %s1404_s12 = smov 0   ;;  %s1406_s13 = smov 0   ;;  %s1797_s0 = inlined_call_operand.vmem [shape: f32[2,2,72,192], index: 0, kind: input, shape index: {}]   ;;  %s1798_s1 = inlined_call_operand.vmem [shape: bf16[3,192,128], index: 1, kind: input, shape index: {}]   ;;  %s1799_s2 = inlined_call_operand.vmem [shape: f32[1,128], index: 2, kind: input, shape index: {}]   ;;  %s1800_s3 = inlined_call_operand.vmem [shape: bf16[2,64,128], index: 3, kind: output, shape index: {}]  }
   0x1   :  { %s1408_s14 = smov 0   ;;  %s1410_s15 = smov 0  }
   0x2   :  { %s1412_s16 = smov 0  }
   0x3 LB: > { %s25_s17 = sadd.s32 1, %s1377_s15  ;;  %p39_p1 = scmp.ne.s32.totalorder %s1369_s13, %s1365_s12  ;;  %s1381_s16 = sphi %s1412_s16, %s13_s16   ;;  %s1377_s15 = sphi %s1410_s15, %s1804_s15   ;;  %s1373_s14 = sphi %s1408_s14, %s1803_s14   ;;  %s1369_s13 = sphi %s1406_s13, %s1802_s13   ;;  %s1365_s12 = sphi %s1404_s12, %s1801_s12  }
   0x4   : > { %p27_p0 = scmp.ge.s32.totalorder %s25_s17, 2  ;;  %p40_p2 = scmp.eq.s32.totalorder %s1381_s16, 0 }
   0x5   : > { %s32_s19 = sadd.s32 1, %s1369_s13  ;;  %p1063_p5 = scmp.ge.s32.totalorder %s1381_s16, 2 }
   0x6   : > { %s1806_s17 = smov (%p27_p0, %s25_s17), 0  ;;  %p41_p3 = por %p40_p2, %p39_p1 }
   0x7   : > { %s29_s18 = ssub.s32 %s1377_s15, %s1806_s17  ;;  %141 = sbr.rel (%p1063_p5) target bundleno = 37 (0x25), region = 24 }
   0x8   : > { %p30_p4 = scmp.eq.s32.totalorder %s29_s18, 0 }
   0xa   : > { %s1439_s20 = scalar_select %p30_p4, %s1369_s13, %s32_s19  }
   0xe   : > { %144 = sbr.rel (!%p41_p3) target bundleno = 37 (0x25), region = 28  ;;  %s146_s21 = sand.u32 (%p41_p3), 1, %s1369_s13  }
   0xf   : > { %s1264_s22 = smul.u32 (%p41_p3), 144, %s1377_s15 }
  0x10   : > { %s1263_s23 = smul.u32 (%p41_p3), 288, %s146_s21 }
  0x11   : > { %s1447_s26 = scalar_lea.vmem (%p41_p3), %s1797_s0, %s1264_s22 }
  0x12   : > { %v164_v0 = vld [vmem:[%s1447_s26] sm:$0xff] (%p41_p3)  ;;  %v166_v1 = vld [vmem:[%s1447_s26 + $0x8] sm:$0xff] (%p41_p3)  ;;  %v168_v2 = vld [vmem:[%s1447_s26 + $0x10] sm:$0xff] (%p41_p3)  ;;  %s1452_s27 = scalar_lea.vmem (%p41_p3), [#allocation2], %s1263_s23 }
  0x13   : > { %165 = vst [vmem:[%s1452_s27] sm:$0xff] (%p41_p3), %v164_v0  ;;  %167 = vst [vmem:[%s1452_s27 + $0x8] sm:$0xff] (%p41_p3), %v166_v1  ;;  %v170_v3 = vld [vmem:[%s1447_s26 + $0x18] sm:$0xff] (%p41_p3)  ;;  %v172_v4 = vld [vmem:[%s1447_s26 + $0x20] sm:$0xff] (%p41_p3) }
  0x14   : > { %169 = vst [vmem:[%s1452_s27 + $0x10] sm:$0xff] (%p41_p3), %v168_v2  ;;  %v174_v5 = vld [vmem:[%s1447_s26 + $0x28] sm:$0xff] (%p41_p3)  ;;  %171 = vst [vmem:[%s1452_s27 + $0x18] sm:$0xff] (%p41_p3), %v170_v3  ;;  %v176_v6 = vld [vmem:[%s1447_s26 + $0x30] sm:$0xff] (%p41_p3) }
  0x15   : > { %173 = vst [vmem:[%s1452_s27 + $0x20] sm:$0xff] %v172_v4  ;;  %175 = vst [vmem:[%s1452_s27 + $0x28] sm:$0xff] %v174_v5  ;;  %v178_v7 = vld [vmem:[%s1447_s26 + $0x38] sm:$0xff]  ;;  %v180_v8 = vld [vmem:[%s1447_s26 + $0x40] sm:$0xff] }
  0x16   : > { %177 = vst [vmem:[%s1452_s27 + $0x30] sm:$0xff] %v176_v6  ;;  %179 = vst [vmem:[%s1452_s27 + $0x38] sm:$0xff] %v178_v7  ;;  %v182_v9 = vld [vmem:[%s1447_s26 + $0x48] sm:$0xff]  ;;  %v184_v10 = vld [vmem:[%s1447_s26 + $0x50] sm:$0xff] }
  0x17   : > { %181 = vst [vmem:[%s1452_s27 + $0x40] sm:$0xff] %v180_v8  ;;  %v186_v11 = vld [vmem:[%s1447_s26 + $0x58] sm:$0xff]  ;;  %183 = vst [vmem:[%s1452_s27 + $0x48] sm:$0xff] %v182_v9  ;;  %v188_v12 = vld [vmem:[%s1447_s26 + $0x60] sm:$0xff] }
  0x18   : > { %185 = vst [vmem:[%s1452_s27 + $0x50] sm:$0xff] %v184_v10  ;;  %187 = vst [vmem:[%s1452_s27 + $0x58] sm:$0xff] %v186_v11  ;;  %v190_v13 = vld [vmem:[%s1447_s26 + $0x68] sm:$0xff]  ;;  %v192_v14 = vld [vmem:[%s1447_s26 + $0x70] sm:$0xff] }
  0x19   : > { %189 = vst [vmem:[%s1452_s27 + $0x60] sm:$0xff] %v188_v12  ;;  %191 = vst [vmem:[%s1452_s27 + $0x68] sm:$0xff] %v190_v13  ;;  %v194_v15 = vld [vmem:[%s1447_s26 + $0x78] sm:$0xff]  ;;  %v196_v16 = vld [vmem:[%s1447_s26 + $0x80] sm:$0xff] }
  0x1a   : > { %193 = vst [vmem:[%s1452_s27 + $0x70] sm:$0xff] %v192_v14  ;;  %v198_v17 = vld [vmem:[%s1447_s26 + $0x88] sm:$0xff]  ;;  %195 = vst [vmem:[%s1452_s27 + $0x78] sm:$0xff] %v194_v15  ;;  %v200_v18 = vld [vmem:[%s1447_s26 + $0x120] sm:$0xff] }
  0x1b   : > { %197 = vst [vmem:[%s1452_s27 + $0x80] sm:$0xff] %v196_v16  ;;  %199 = vst [vmem:[%s1452_s27 + $0x88] sm:$0xff] %v198_v17  ;;  %v202_v19 = vld [vmem:[%s1447_s26 + $0x128] sm:$0xff]  ;;  %v204_v20 = vld [vmem:[%s1447_s26 + $0x130] sm:$0xff] }
  0x1c   : > { %201 = vst [vmem:[%s1452_s27 + $0x90] sm:$0xff] %v200_v18  ;;  %203 = vst [vmem:[%s1452_s27 + $0x98] sm:$0xff] %v202_v19  ;;  %v206_v21 = vld [vmem:[%s1447_s26 + $0x138] sm:$0xff]  ;;  %v208_v22 = vld [vmem:[%s1447_s26 + $0x140] sm:$0xff] }
  0x1d   : > { %205 = vst [vmem:[%s1452_s27 + $0xa0] sm:$0xff] %v204_v20  ;;  %v210_v23 = vld [vmem:[%s1447_s26 + $0x148] sm:$0xff]  ;;  %207 = vst [vmem:[%s1452_s27 + $0xa8] sm:$0xff] %v206_v21  ;;  %v212_v24 = vld [vmem:[%s1447_s26 + $0x150] sm:$0xff] }
  0x1e   : > { %209 = vst [vmem:[%s1452_s27 + $0xb0] sm:$0xff] %v208_v22  ;;  %211 = vst [vmem:[%s1452_s27 + $0xb8] sm:$0xff] %v210_v23  ;;  %v214_v25 = vld [vmem:[%s1447_s26 + $0x158] sm:$0xff]  ;;  %v216_v26 = vld [vmem:[%s1447_s26 + $0x160] sm:$0xff] }
  0x1f   : > { %213 = vst [vmem:[%s1452_s27 + $0xc0] sm:$0xff] %v212_v24  ;;  %215 = vst [vmem:[%s1452_s27 + $0xc8] sm:$0xff] %v214_v25  ;;  %v218_v27 = vld [vmem:[%s1447_s26 + $0x168] sm:$0xff]  ;;  %v220_v28 = vld [vmem:[%s1447_s26 + $0x170] sm:$0xff] }
  0x20   : > { %217 = vst [vmem:[%s1452_s27 + $0xd0] sm:$0xff] %v216_v26  ;;  %v222_v29 = vld [vmem:[%s1447_s26 + $0x178] sm:$0xff]  ;;  %219 = vst [vmem:[%s1452_s27 + $0xd8] sm:$0xff] %v218_v27  ;;  %v224_v30 = vld [vmem:[%s1447_s26 + $0x180] sm:$0xff] }
  0x21   : > { %221 = vst [vmem:[%s1452_s27 + $0xe0] sm:$0xff] %v220_v28  ;;  %223 = vst [vmem:[%s1452_s27 + $0xe8] sm:$0xff] %v222_v29  ;;  %v226_v31 = vld [vmem:[%s1447_s26 + $0x188] sm:$0xff]  ;;  %v228_v32 = vld [vmem:[%s1447_s26 + $0x190] sm:$0xff] }
  0x22   : > { %225 = vst [vmem:[%s1452_s27 + $0xf0] sm:$0xff] %v224_v30  ;;  %227 = vst [vmem:[%s1452_s27 + $0xf8] sm:$0xff] %v226_v31  ;;  %v230_v33 = vld [vmem:[%s1447_s26 + $0x198] sm:$0xff]  ;;  %v232_v34 = vld [vmem:[%s1447_s26 + $0x1a0] sm:$0xff] }
  0x23   : > { %229 = vst [vmem:[%s1452_s27 + $0x100] sm:$0xff] %v228_v32  ;;  %v234_v35 = vld [vmem:[%s1447_s26 + $0x1a8] sm:$0xff]  ;;  %231 = vst [vmem:[%s1452_s27 + $0x108] sm:$0xff] %v230_v33 }
  0x24   : > { %233 = vst [vmem:[%s1452_s27 + $0x110] sm:$0xff] %v232_v34  ;;  %235 = vst [vmem:[%s1452_s27 + $0x118] sm:$0xff] %v234_v35 }
  0x25 PF: > { %p1065_p6 = scmp.ge.s32.totalorder %s1381_s16, 1  ;;  %p240_p7 = scmp.lt.s32.totalorder %s1381_s16, 3 }
  0x27   : > { %p241_p8 = pnand %p1065_p6, %p240_p7 }
  0x28   : > { %v1307_v36 = vld [vmem:[%s1798_s1 + $0x60] sm:$0xff] (!%p241_p8)   ;;  %v1383_v37 = vmov (!%p241_p8), 0   ;;  %v1309_v39 = vld [vmem:[%s1798_s1 + $0x68] sm:$0xff] (!%p241_p8)   ;;  %v1311_v41 = vld [vmem:[%s1798_s1 + $0x70] sm:$0xff] (!%p241_p8)   ;;  %s247_s26 = sand.u32 (!%p241_p8), 1, %s1365_s12   ;;  %vm463_vm0 = vcmask (!%p241_p8), 523264  }
  0x29   : > { %244 = sbr.rel (%p241_p8) target bundleno = 369 (0x171), region = 51  ;;  %476 = vmatprep.subr.bf16.mxu0 (!%p241_p8), %v1383_v37  ;;  %625 = vmatprep.subr.bf16.mxu1 (!%p241_p8), %v1383_v37  ;;  %v1308_v38 = vld [vmem:[%s1798_s1] sm:$0xff] (!%p241_p8)   ;;  %v1310_v40 = vld [vmem:[%s1798_s1 + $0x8] sm:$0xff] (!%p241_p8)   ;;  %v1312_v42 = vld [vmem:[%s1798_s1 + $0x10] sm:$0xff] (!%p241_p8)   ;;  %p275_p9 = scmp.lt.s32.totalorder (!%p241_p8), %s1373_s14, 1 }
  0x2a   : > { %477 = vmatpush1.bf16.msra.mxu0 (!%p241_p8), %v1307_v36  ;;  %626 = vmatpush1.bf16.msra.mxu1 (!%p241_p8), %v1308_v38  ;;  %v1313_v43 = vld [vmem:[%s1798_s1 + $0x78] sm:$0xff] (!%p241_p8)   ;;  %v1315_v45 = vld [vmem:[%s1798_s1 + $0x80] sm:$0xff] (!%p241_p8)   ;;  %s1265_s29 = smul.u32 (!%p241_p8), 288, %s247_s26  ;;  %v1317_v47 = vld [vmem:[%s1798_s1 + $0x88] sm:$0xff] (!%p241_p8)  }
  0x2b   : > { %478 = vmatprep.subr.bf16.mxu0 (!%p241_p8), %v1383_v37  ;;  %627 = vmatprep.subr.bf16.mxu1 (!%p241_p8), %v1383_v37  ;;  %v1314_v44 = vld [vmem:[%s1798_s1 + $0x18] sm:$0xff] (!%p241_p8)   ;;  %v1316_v46 = vld [vmem:[%s1798_s1 + $0x20] sm:$0xff] (!%p241_p8)   ;;  %v1318_v48 = vld [vmem:[%s1798_s1 + $0x28] sm:$0xff] (!%p241_p8)  }
  0x2c   : > { %v1319_v49 = vld [vmem:[%s1798_s1 + $0x90] sm:$0xff] (!%p241_p8)   ;;  %s1582_s10 = scalar_lea.vmem (!%p241_p8), [#allocation2], %s1265_s29  ;;  %v1321_v56 = vld [vmem:[%s1798_s1 + $0x98] sm:$0xff] (!%p241_p8)   ;;  %v1323_v59 = vld [vmem:[%s1798_s1 + $0xa0] sm:$0xff] (!%p241_p8)  }
  0x2d   : > { %v1320_v50 = vld [vmem:[%s1798_s1 + $0x30] sm:$0xff] (!%p241_p8)   ;;  %v1069_v51 = vld [vmem:[%s1582_s10 + $0x98] sm:$0xff] (!%p241_p8)  ;;  %v1071_v52 = vld [vmem:[%s1582_s10 + $0xa8] sm:$0xff] (!%p241_p8) }
  0x2e   : > { %479 = vmatpush1.bf16.msra.mxu0 (!%p241_p8), %v1309_v39  ;;  %628 = vmatpush1.bf16.msra.mxu1 (!%p241_p8), %v1310_v40  ;;  %v292_v53 = vld [vmem:[%s1582_s10 + $0x8] sm:$0xff] (!%p241_p8)  ;;  %v359_v54 = vpack.c.bf16 (!%p241_p8), %v1071_v52, %v1069_v51  ;;  %v1588_v55 = vld [vmem:[%s1582_s10 + $0x18] sm:$0xff] (!%p241_p8)  ;;  %v1324_v60 = vld [vmem:[%s1798_s1 + $0x40] sm:$0xff] (!%p241_p8)  }
  0x2f   : > { %480 = vmatprep.subr.bf16.mxu0 (!%p241_p8), %v1383_v37  ;;  %629 = vmatprep.subr.bf16.mxu1 (!%p241_p8), %v1383_v37  ;;  %v308_v57 = vpack.c.bf16 (!%p241_p8), %v1588_v55, %v292_v53  ;;  %v1322_v58 = vld [vmem:[%s1798_s1 + $0x38] sm:$0xff] (!%p241_p8)   ;;  %v1325_v61 = vld [vmem:[%s1798_s1 + $0xa8] sm:$0xff] (!%p241_p8)   ;;  %v1327_v63 = vld [vmem:[%s1798_s1 + $0xb0] sm:$0xff] (!%p241_p8)  }
  0x30   : > { %1120 = vmatprep.mubr.msk.bf16.mxu0 %vm463_vm0, %v359_v54  ;;  %v1326_v62 = vld [vmem:[%s1798_s1 + $0x48] sm:$0xff]   ;;  %v1328_v0 = vld [vmem:[%s1798_s1 + $0x50] sm:$0xff]   ;;  %v1329_v1 = vld [vmem:[%s1798_s1 + $0xb8] sm:$0xff]   ;;  %s1808_s14 = smov (!%p275_p9, %s1373_s14), 1 }
  0x31   : > { %1136 = vmatprep.mubr.msk.bf16.mxu1 %vm463_vm0, %v308_v57  ;;  %v1330_v2 = vld [vmem:[%s1798_s1 + $0x58] sm:$0xff]   ;;  %v1068_v3 = vld [vmem:[%s1582_s10 + $0x90] sm:$0xff]  ;;  %v1070_v4 = vld [vmem:[%s1582_s10 + $0xa0] sm:$0xff]  ;;  %s1207_s23 = sshll.u32 %s1808_s14, 5 }
  0x32   : > { %481 = vmatpush1.bf16.msra.mxu0 %v1311_v41  ;;  %630 = vmatpush1.bf16.msra.mxu1 %v1312_v42  ;;  %v291_v5 = vld [vmem:[%s1582_s10] sm:$0xff]  ;;  %v1636_v6 = vld [vmem:[%s1582_s10 + $0x10] sm:$0xff]  ;;  %v1073_v8 = vld [vmem:[%s1582_s10 + $0xb8] sm:$0xff]  ;;  %v358_v9 = vpack.c.bf16 %v1070_v4, %v1068_v3  ;;  %s282_s26 = scalar_lea.vmem %s1800_s3, %s1207_s23 }
  0x33   : > { %482 = vmatprep.subr.bf16.mxu0 %v1383_v37  ;;  %631 = vmatprep.subr.bf16.mxu1 %v1383_v37  ;;  %v1331_v7 = vld [vmem:[%s1798_s1 + $0xc0] sm:$0xff]   ;;  %v1075_v10 = vld [vmem:[%s1582_s10 + $0xc8] sm:$0xff]  ;;  %v307_v11 = vpack.c.bf16 %v1636_v6, %v291_v5  ;;  %v1649_v13 = vld [vmem:[%s1582_s10 + $0x38] sm:$0xff] }
  0x34   : > { %v1646_v12 = vld [vmem:[%s1582_s10 + $0x28] sm:$0xff]  ;;  %v361_v14 = vpack.c.bf16 %v1075_v10, %v1073_v8  ;;  %v1072_v17 = vld [vmem:[%s1582_s10 + $0xb0] sm:$0xff]  ;;  %v1074_v18 = vld [vmem:[%s1582_s10 + $0xc0] sm:$0xff] }
  0x35   : > { %v310_v15 = vpack.c.bf16 %v1649_v13, %v1646_v12  ;;  %v1332_v16 = vld [vmem:[%s1798_s1 + $0xc8] sm:$0xff]   ;;  %v1662_v19 = vld [vmem:[%s1582_s10 + $0x20] sm:$0xff]  ;;  %v1665_v20 = vld [vmem:[%s1582_s10 + $0x30] sm:$0xff]  ;;  %v360_v21 = vpack.c.bf16 %v1074_v18, %v1072_v17  ;;  %v713_v53 = vpack.c.bf16 %v1646_v12, %v1588_v55 }
  0x36   : > { %483 = vmatpush1.bf16.msra.mxu0 %v1313_v43  ;;  %632 = vmatpush1.bf16.msra.mxu1 %v1314_v44  ;;  %v1077_v22 = vld [vmem:[%s1582_s10 + $0xd8] sm:$0xff]  ;;  %v1079_v23 = vld [vmem:[%s1582_s10 + $0xe8] sm:$0xff]  ;;  %v1333_v24 = vld [vmem:[%s1798_s1 + $0xd0] sm:$0xff]   ;;  %v309_v25 = vpack.c.bf16 %v1665_v20, %v1662_v19 }
  0x37   : > { %484 = vmatprep.subr.bf16.mxu0 %v1383_v37  ;;  %633 = vmatprep.subr.bf16.mxu1 %v1383_v37  ;;  %v1678_v26 = vld [vmem:[%s1582_s10 + $0x48] sm:$0xff]  ;;  %v1681_v27 = vld [vmem:[%s1582_s10 + $0x58] sm:$0xff]  ;;  %v363_v28 = vpack.c.bf16 %v1079_v23, %v1077_v22  ;;  %v1076_v31 = vld [vmem:[%s1582_s10 + $0xd0] sm:$0xff] }
  0x38   : > { %v312_v29 = vpack.c.bf16 %v1681_v27, %v1678_v26  ;;  %v1334_v30 = vld [vmem:[%s1798_s1 + $0xd8] sm:$0xff]   ;;  %v1078_v32 = vld [vmem:[%s1582_s10 + $0xe0] sm:$0xff]  ;;  %v1697_v34 = vld [vmem:[%s1582_s10 + $0x50] sm:$0xff] }
  0x39   : > { %v1694_v33 = vld [vmem:[%s1582_s10 + $0x40] sm:$0xff]  ;;  %v362_v35 = vpack.c.bf16 %v1078_v32, %v1076_v31  ;;  %v1081_v36 = vld [vmem:[%s1582_s10 + $0xf8] sm:$0xff]  ;;  %v1083_v38 = vld [vmem:[%s1582_s10 + $0x108] sm:$0xff] }
  0x3a   : > { %485 = vmatpush1.bf16.msra.mxu0 %v1315_v45  ;;  %634 = vmatpush1.bf16.msra.mxu1 %v1316_v46  ;;  %v1335_v39 = vld [vmem:[%s1798_s1 + $0xe0] sm:$0xff]   ;;  %v311_v40 = vpack.c.bf16 %v1697_v34, %v1694_v33  ;;  %v304_v41 = vld [vmem:[%s1582_s10 + $0x68] sm:$0xff]  ;;  %v1711_v42 = vld [vmem:[%s1582_s10 + $0x78] sm:$0xff]  ;;  %v365_v43 = vpack.c.bf16 %v1083_v38, %v1081_v36 }
  0x3b   : > { %486 = vmatprep.subr.bf16.mxu0 %v1383_v37  ;;  %635 = vmatprep.subr.bf16.mxu1 %v1383_v37  ;;  %v314_v44 = vpack.c.bf16 %v1711_v42, %v304_v41  ;;  %v1336_v45 = vld [vmem:[%s1798_s1 + $0xe8] sm:$0xff]   ;;  %v1080_v46 = vld [vmem:[%s1582_s10 + $0xf0] sm:$0xff]  ;;  %v717_v54 = vpack.c.bf16 %v304_v41, %v1681_v27  ;;  %v1339_v55 = vld [vmem:[%s1798_s1 + $0x100] sm:$0xff]  }
  0x3c   : > { %v1337_v51 = vld [vmem:[%s1798_s1 + $0xf0] sm:$0xff]   ;;  %v1340_v57 = vld [vmem:[%s1798_s1 + $0x108] sm:$0xff]  }
  0x3e   : > { %487 = vmatpush1.bf16.msra.mxu0 %v1317_v47  ;;  %636 = vmatpush1.bf16.msra.mxu1 %v1318_v48  ;;  %v1082_v47 = vld [vmem:[%s1582_s10 + $0x100] sm:$0xff] }
  0x3f   : > { %488 = vmatprep.subr.bf16.mxu0 %v1383_v37  ;;  %637 = vmatprep.subr.bf16.mxu1 %v1383_v37  ;;  %v303_v48 = vld [vmem:[%s1582_s10 + $0x60] sm:$0xff] }
  0x42   : > { %489 = vmatpush1.bf16.msra.mxu0 %v1319_v49  ;;  %638 = vmatpush1.bf16.msra.mxu1 %v1320_v50  ;;  %v305_v49 = vld [vmem:[%s1582_s10 + $0x70] sm:$0xff]  ;;  %v364_v50 = vpack.c.bf16 %v1082_v47, %v1080_v46 }
  0x43   : > { %490 = vmatprep.subr.bf16.mxu0 %v1383_v37  ;;  %639 = vmatprep.subr.bf16.mxu1 %v1383_v37  ;;  %v313_v52 = vpack.c.bf16 %v305_v49, %v303_v48 }
  0x46   : > { %491 = vmatpush1.bf16.msra.mxu0 %v1321_v56  ;;  %640 = vmatpush1.bf16.msra.mxu1 %v1322_v58  ;;  %v1338_v56 = vld [vmem:[%s1798_s1 + $0xf8] sm:$0xff]   ;;  %v1341_v58 = vld [vmem:[%s1798_s1 + $0x110] sm:$0xff]  }
  0x47   : > { %492 = vmatprep.subr.bf16.mxu0 %v1383_v37  ;;  %641 = vmatprep.subr.bf16.mxu1 %v1383_v37 }
  0x4a   : > { %493 = vmatpush1.bf16.msra.mxu0 %v1323_v59  ;;  %642 = vmatpush1.bf16.msra.mxu1 %v1324_v60  ;;  %v1342_v59 = vld [vmem:[%s1798_s1 + $0x118] sm:$0xff]   ;;  %v1155_v60 = vld [vmem:[%s1582_s10 + $0x88] sm:$0xff] }
  0x4b   : > { %494 = vmatprep.subr.bf16.mxu0 %v1383_v37  ;;  %643 = vmatprep.subr.bf16.mxu1 %v1383_v37 }
  0x4e   : > { %495 = vmatpush1.bf16.msra.mxu0 %v1325_v61  ;;  %644 = vmatpush1.bf16.msra.mxu1 %v1326_v62  ;;  %v712_v61 = vpack.c.bf16 %v1662_v19, %v1636_v6  ;;  %v716_v62 = vpack.c.bf16 %v303_v48, %v1697_v34 }
  0x4f   : > { %496 = vmatprep.subr.bf16.mxu0 %v1383_v37  ;;  %645 = vmatprep.subr.bf16.mxu1 %v1383_v37 }
  0x52   : > { %497 = vmatpush1.bf16.msra.mxu0 %v1327_v63  ;;  %646 = vmatpush1.bf16.msra.mxu1 %v1328_v0  ;;  %v715_v63 = vpack.c.bf16 %v1678_v26, %v1649_v13  ;;  %v719_v0 = vpack.c.bf16 %v1155_v60, %v1711_v42 }
  0x53   : > { %498 = vmatprep.subr.bf16.mxu0 %v1383_v37  ;;  %647 = vmatprep.subr.bf16.mxu1 %v1383_v37 }
  0x56   : > { %499 = vmatpush1.bf16.msra.mxu0 %v1329_v1  ;;  %648 = vmatpush1.bf16.msra.mxu1 %v1330_v2  ;;  %v714_v1 = vpack.c.bf16 %v1694_v33, %v1665_v20 }
  0x57   : > { %829 = vmatprep.subr.bf16.mxu0 %v1383_v37  ;;  %1239 = vmatprep.subr.bf16.mxu1 %v1383_v37 }
  0x59   : > { %509 = vmatmul.mubr.bf16.vlgmr.msra.gmra.mrb[0].mxu0 %v358_v9  ;;  %658 = vmatmul.mubr.bf16.vlgmr.msra.gmra.mrb[0].mxu1 %v307_v11 }
  0x5a   : > { %830 = vmatpush1.bf16.msra.mxu0 %v1331_v7  ;;  %1251 = vmatpush1.bf16.msra.mxu1 %v1331_v7 }
  0x5b   : > { %831 = vmatprep.subr.bf16.mxu0 %v1383_v37  ;;  %1240 = vmatprep.subr.bf16.mxu1 %v1383_v37 }
  0x5c   : > { %1121 = vmatprep.mubr.msk.bf16.mxu0 %vm463_vm0, %v361_v14  ;;  %1137 = vmatprep.mubr.msk.bf16.mxu1 %vm463_vm0, %v310_v15 }
  0x5e   : > { %832 = vmatpush1.bf16.msra.mxu0 %v1332_v16  ;;  %1252 = vmatpush1.bf16.msra.mxu1 %v1332_v16 }
  0x5f   : > { %833 = vmatprep.subr.bf16.mxu0 %v1383_v37  ;;  %1241 = vmatprep.subr.bf16.mxu1 %v1383_v37 }
  0x61   : > { %517 = vmatmul.mubr.bf16.gmra.mrb[4].mxu0 %v360_v21  ;;  %666 = vmatmul.mubr.bf16.gmra.mrb[4].mxu1 %v309_v25 }
  0x62   : > { %834 = vmatpush1.bf16.msra.mxu0 %v1333_v24  ;;  %1253 = vmatpush1.bf16.msra.mxu1 %v1333_v24 }
  0x63   : > { %835 = vmatprep.subr.bf16.mxu0 %v1383_v37  ;;  %1242 = vmatprep.subr.bf16.mxu1 %v1383_v37 }
  0x64   : > { %1122 = vmatprep.mubr.msk.bf16.mxu0 %vm463_vm0, %v363_v28  ;;  %1138 = vmatprep.mubr.msk.bf16.mxu1 %vm463_vm0, %v312_v29 }
  0x66   : > { %836 = vmatpush1.bf16.msra.mxu0 %v1334_v30  ;;  %1254 = vmatpush1.bf16.msra.mxu1 %v1334_v30 }
  0x67   : > { %837 = vmatprep.subr.bf16.mxu0 %v1383_v37  ;;  %1243 = vmatprep.subr.bf16.mxu1 %v1383_v37 }
  0x69   : > { %525 = vmatmul.mubr.bf16.gmra.mrb[8].mxu0 %v362_v35  ;;  %674 = vmatmul.mubr.bf16.gmra.mrb[8].mxu1 %v311_v40 }
  0x6a   : > { %838 = vmatpush1.bf16.msra.mxu0 %v1335_v39  ;;  %1255 = vmatpush1.bf16.msra.mxu1 %v1335_v39 }
  0x6b   : > { %839 = vmatprep.subr.bf16.mxu0 %v1383_v37  ;;  %1244 = vmatprep.subr.bf16.mxu1 %v1383_v37 }
  0x6c   : > { %1123 = vmatprep.mubr.msk.bf16.mxu0 %vm463_vm0, %v365_v43  ;;  %1139 = vmatprep.mubr.msk.bf16.mxu1 %vm463_vm0, %v314_v44 }
  0x6e   : > { %840 = vmatpush1.bf16.msra.mxu0 %v1336_v45  ;;  %1256 = vmatpush1.bf16.msra.mxu1 %v1336_v45  ;;  %v1196_v45 = vld [vmem:[%s1799_s2] ss:$0 sm:$0xff] }
  0x6f   : > { %841 = vmatprep.subr.bf16.mxu0 %v1383_v37  ;;  %1245 = vmatprep.subr.bf16.mxu1 %v1383_v37 }
  0x71   : > { %533 = vmatmul.mubr.bf16.gmra.mrb[12].mxu0 %v364_v50  ;;  %682 = vmatmul.mubr.bf16.gmra.mrb[12].mxu1 %v313_v52 }
  0x72   : > { %842 = vmatpush1.bf16.msra.mxu0 %v1337_v51  ;;  %1257 = vmatpush1.bf16.msra.mxu1 %v1337_v51 }
  0x73   : > { %843 = vmatprep.subr.bf16.mxu0 %v1383_v37  ;;  %1246 = vmatprep.subr.bf16.mxu1 %v1383_v37 }
  0x74   : > { %1192 = vmatprep.mubr.msk.bf16.mxu0 %vm463_vm0, %v713_v53  ;;  %1194 = vmatprep.mubr.msk.bf16.mxu1 %vm463_vm0, %v717_v54 }
  0x76   : > { %844 = vmatpush1.bf16.msra.mxu0 %v1338_v56  ;;  %1258 = vmatpush1.bf16.msra.mxu1 %v1338_v56 }
  0x77   : > { %845 = vmatprep.subr.bf16.mxu0 %v1383_v37  ;;  %1247 = vmatprep.subr.bf16.mxu1 %v1383_v37 }
  0x7a   : > { %846 = vmatpush1.bf16.msra.mxu0 %v1339_v55  ;;  %1259 = vmatpush1.bf16.msra.mxu1 %v1339_v55 }
  0x7b   : > { %847 = vmatprep.subr.bf16.mxu0 %v1383_v37  ;;  %1248 = vmatprep.subr.bf16.mxu1 %v1383_v37 }
  0x7e   : > { %848 = vmatpush1.bf16.msra.mxu0 %v1340_v57  ;;  %1260 = vmatpush1.bf16.msra.mxu1 %v1340_v57 }
  0x7f   : > { %849 = vmatprep.subr.bf16.mxu0 %v1383_v37  ;;  %1249 = vmatprep.subr.bf16.mxu1 %v1383_v37 }
  0x82   : > { %850 = vmatpush1.bf16.msra.mxu0 %v1341_v58  ;;  %1261 = vmatpush1.bf16.msra.mxu1 %v1341_v58 }
  0x83   : > { %851 = vmatprep.subr.bf16.mxu0 %v1383_v37  ;;  %1250 = vmatprep.subr.bf16.mxu1 %v1383_v37  ;;  %v1154_v37 = vld [vmem:[%s1582_s10 + $0x80] sm:$0xff] }
  0x84   : > { %v718_v2 = vpack.c.bf16 %v1154_v37, %v305_v49 }
  0x86   : > { %852 = vmatpush1.bf16.msra.mxu0 %v1342_v59  ;;  %1262 = vmatpush1.bf16.msra.mxu1 %v1342_v59 }
  0x89   : > { %862 = vmatmul.mubr.bf16.vlgmr.msra.gmra.mrb[16].mxu0 %v712_v61  ;;  %878 = vmatmul.mubr.bf16.vlgmr.msra.gmra.mrb[16].mxu1 %v716_v62 }
  0x8a   : > { %1193 = vmatprep.mubr.msk.bf16.mxu0 %vm463_vm0, %v715_v63  ;;  %1195 = vmatprep.mubr.msk.bf16.mxu1 %vm463_vm0, %v719_v0 }
  0x91   : > { %870 = vmatmul.mubr.bf16.gmra.mrb[20].mxu0 %v714_v1  ;;  %886 = vmatmul.mubr.bf16.gmra.mrb[20].mxu1 %v718_v2 }
 0x12c   : > { %v510_v3 = vpop.f32.mrb[0].mxu0  ;;  %v659_v4 = vpop.f32.mrb[0].mxu1 }
 0x12d   : > { %v512_v5 = vpop.f32.mrb[1].mxu0  ;;  %v660_v6 = vadd.f32 %v659_v4, %v510_v3  ;;  %v661_v7 = vpop.f32.mrb[1].mxu1 }
 0x12e   : > { %v513_v8 = vpop.f32.mrb[2].mxu0  ;;  %v662_v9 = vpop.f32.mrb[2].mxu1 }
 0x12f   : > { %v515_v10 = vpop.f32.mrb[3].mxu0  ;;  %v663_v11 = vadd.f32 %v662_v9, %v513_v8  ;;  %v664_v12 = vpop.f32.mrb[3].mxu1 }
 0x134   : > { %v518_v13 = vpop.f32.mrb[4].mxu0  ;;  %v667_v14 = vpop.f32.mrb[4].mxu1 }
 0x135   : > { %v520_v15 = vpop.f32.mrb[5].mxu0  ;;  %v668_v16 = vadd.f32 %v667_v14, %v518_v13  ;;  %v669_v17 = vpop.f32.mrb[5].mxu1 }
 0x136   : > { %v521_v18 = vpop.f32.mrb[6].mxu0  ;;  %v670_v19 = vpop.f32.mrb[6].mxu1 }
 0x137   : > { %v523_v20 = vpop.f32.mrb[7].mxu0  ;;  %v671_v21 = vadd.f32 %v670_v19, %v521_v18  ;;  %v672_v22 = vpop.f32.mrb[7].mxu1 }
 0x13c   : > { %v526_v23 = vpop.f32.mrb[8].mxu0  ;;  %v675_v24 = vpop.f32.mrb[8].mxu1 }
 0x13d   : > { %v528_v25 = vpop.f32.mrb[9].mxu0  ;;  %v676_v26 = vadd.f32 %v675_v24, %v526_v23  ;;  %v677_v27 = vpop.f32.mrb[9].mxu1 }
 0x13e   : > { %v529_v28 = vpop.f32.mrb[10].mxu0  ;;  %v678_v29 = vpop.f32.mrb[10].mxu1 }
 0x13f   : > { %v531_v30 = vpop.f32.mrb[11].mxu0  ;;  %v679_v31 = vadd.f32 %v678_v29, %v529_v28  ;;  %v680_v32 = vpop.f32.mrb[11].mxu1 }
 0x144   : > { %v534_v33 = vpop.f32.mrb[12].mxu0  ;;  %v683_v34 = vpop.f32.mrb[12].mxu1 }
 0x145   : > { %v536_v35 = vpop.f32.mrb[13].mxu0  ;;  %v684_v36 = vadd.f32 %v683_v34, %v534_v33  ;;  %v685_v38 = vpop.f32.mrb[13].mxu1 }
 0x146   : > { %v537_v39 = vpop.f32.mrb[14].mxu0  ;;  %v686_v40 = vpop.f32.mrb[14].mxu1 }
 0x147   : > { %v539_v41 = vpop.f32.mrb[15].mxu0  ;;  %v687_v42 = vadd.f32 %v686_v40, %v537_v39  ;;  %v688_v43 = vpop.f32.mrb[15].mxu1 }
 0x15c   : > { %v863_v44 = vpop.f32.mrb[16].mxu0  ;;  %v879_v47 = vpop.f32.mrb[16].mxu1 }
 0x15d   : > { %v894_v46 = vadd.f32 %v863_v44, %v660_v6  ;;  %v865_v48 = vpop.f32.mrb[17].mxu0  ;;  %v898_v49 = vadd.f32 %v879_v47, %v676_v26  ;;  %v881_v50 = vpop.f32.mrb[17].mxu1 }
 0x15e   : > { %v866_v51 = vpop.f32.mrb[18].mxu0  ;;  %v882_v54 = vpop.f32.mrb[18].mxu1 }
 0x15f   : > { %v909_v52 = vadd.f32 %v1196_v45, %v894_v46  ;;  %v895_v53 = vadd.f32 %v866_v51, %v663_v11  ;;  %v868_v56 = vpop.f32.mrb[19].mxu0  ;;  %v913_v55 = vadd.f32 %v1196_v45, %v898_v49  ;;  %v899_v57 = vadd.f32 %v882_v54, %v679_v31  ;;  %v884_v58 = vpop.f32.mrb[19].mxu1 }
 0x161   : > { %v910_v59 = vadd.f32 %v1196_v45, %v895_v53  ;;  %v914_v60 = vadd.f32 %v1196_v45, %v899_v57  ;;  %v917_v61 = vmax.f32 %v909_v52, 0.0  ;;  %v921_v63 = vmax.f32 %v913_v55, 0.0 }
 0x163   : > { %v918_v62 = vmax.f32 %v910_v59, 0.0  ;;  %v922_v0 = vmax.f32 %v914_v60, 0.0 }
 0x164   : > { %v871_v37 = vpop.f32.mrb[20].mxu0  ;;  %v887_v3 = vpop.f32.mrb[20].mxu1 }
 0x165   : > { %v1219_v1 = vpack.c.bf16 %v918_v62, %v917_v61  ;;  %v896_v2 = vadd.f32 %v871_v37, %v668_v16  ;;  %v873_v4 = vpop.f32.mrb[21].mxu0  ;;  %v1229_v5 = vpack.c.bf16 %v922_v0, %v921_v63  ;;  %v900_v6 = vadd.f32 %v887_v3, %v684_v36  ;;  %v889_v7 = vpop.f32.mrb[21].mxu1 }
 0x166   : > { %v874_v8 = vpop.f32.mrb[22].mxu0  ;;  %v890_v11 = vpop.f32.mrb[22].mxu1 }
 0x167   : > { %1220 = vst [vmem:[%s282_s26] sm:$0xff] %v1219_v1   ;;  %v911_v9 = vadd.f32 %v1196_v45, %v896_v2  ;;  %v897_v10 = vadd.f32 %v874_v8, %v671_v21  ;;  %v876_v12 = vpop.f32.mrb[23].mxu0  ;;  %1237 = vst [vmem:[%s282_s26 + $0x10] sm:$0xff] %v1229_v5   ;;  %v915_v13 = vadd.f32 %v1196_v45, %v900_v6  ;;  %v892_v15 = vpop.f32.mrb[23].mxu1 }
 0x168   : > { %v901_v14 = vadd.f32 %v890_v11, %v687_v42 }
 0x169   : > { %v912_v17 = vadd.f32 %v1196_v45, %v897_v10  ;;  %v919_v19 = vmax.f32 %v911_v9, 0.0  ;;  %v923_v16 = vmax.f32 %v915_v13, 0.0 }
 0x16a   : > { %v916_v18 = vadd.f32 %v1196_v45, %v901_v14 }
 0x16b   : > { %v920_v20 = vmax.f32 %v912_v17, 0.0 }
 0x16c   : > { %v924_v22 = vmax.f32 %v916_v18, 0.0 }
 0x16d   : > { %v1224_v23 = vpack.c.bf16 %v920_v20, %v919_v19 }
 0x16e   : > { %v1234_v24 = vpack.c.bf16 %v924_v22, %v923_v16 }
 0x16f   : > { %1236 = vst [vmem:[%s282_s26 + $0x8] sm:$0xff] %v1224_v23  }
 0x170   : > { %1238 = vst [vmem:[%s282_s26 + $0x18] sm:$0xff] %v1234_v24  }
 0x171 PF: > { %s13_s16 = sadd.s32 1, %s1381_s16   ;;  %s1801_s12 = smov %s1369_s13 }
 0x172   : > { %p10_p10 = scmp.ge.s32.totalorder %s13_s16, 4   ;;  %s1802_s13 = smov %s1439_s20 }
 0x173   : > { %s1803_s14 = smov %s1377_s15  ;;  %s1804_s15 = smov %s1806_s17 }
 0x174   :  { %12 = sbr.rel (!%p10_p10) target bundleno = 3 (0x3), region = 95 }

// kernel: _lambda_.7
= control target key start
LH: loop header
LB: loop body
LE: loop exit
PB: predicated region body
PF: predicated region fallthrough
CT: control target
= control target key end

     0   :  { %s2255_s15 = smov 0   ;;  %s2257_s16 = smov 0   ;;  %s2684_s0 = inlined_call_operand.vmem [shape: f32[1,2,80,384], index: 0, kind: input, shape index: {}]   ;;  %s2685_s1 = inlined_call_operand.vmem [shape: bf16[3,384,128], index: 1, kind: input, shape index: {}]   ;;  %s2686_s2 = inlined_call_operand.vmem [shape: f32[1,128], index: 2, kind: input, shape index: {}]   ;;  %s2687_s3 = inlined_call_operand.vmem [shape: bf16[2,64,128], index: 3, kind: input, shape index: {}]   ;;  %s2688_s4 = inlined_call_operand.vmem [shape: bf16[2,64,128], index: 4, kind: output, shape index: {}]  }
   0x1   :  { %s2259_s17 = smov 0  }
   0x2 LB: > { %s26_s18 = sadd.s32 1, %s2224_s16  ;;  %p1556_p0 = scmp.ge.s32.totalorder %s2228_s17, 1  ;;  %s2228_s17 = sphi %s2259_s17, %s14_s17   ;;  %s2224_s16 = sphi %s2257_s16, %s2690_s16   ;;  %s2220_s15 = sphi %s2255_s15, %s2689_s15  }
   0x3   : > { %p28_p1 = scmp.ge.s32.totalorder %s26_s18, 2  ;;  %p193_p2 = scmp.lt.s32.totalorder %s2228_s17, 3 }
   0x5   : > { %s2692_s18 = smov (%p28_p1, %s26_s18), 0  ;;  %p194_p3 = pnand %p1556_p0, %p193_p2 }
   0x6   : > { %v2134_v0 = vld [vmem:[%s2685_s1 + $0x100] sm:$0xff] (!%p194_p3)   ;;  %v2137_v3 = vld [vmem:[%s2685_s1 + $0x108] sm:$0xff] (!%p194_p3)   ;;  %v2140_v6 = vld [vmem:[%s2685_s1 + $0x110] sm:$0xff] (!%p194_p3)   ;;  %p232_p4 = scmp.lt.s32.totalorder (!%p194_p3), %s2220_s15, 1 }
   0x7   : > { %197 = sbr.rel (%p194_p3) target bundleno = 358 (0x166), region = 36  ;;  %v2135_v1 = vld [vmem:[%s2685_s1 + $0x140] sm:$0xff] (!%p194_p3)   ;;  %1841 = vmatprep.subr.bf16.mxu0 (!%p194_p3), %v2134_v0  ;;  %v2138_v4 = vld [vmem:[%s2685_s1 + $0x148] sm:$0xff] (!%p194_p3)   ;;  %v2141_v7 = vld [vmem:[%s2685_s1 + $0x150] sm:$0xff] (!%p194_p3)  }
   0x8   : > { %v2136_v2 = vld [vmem:[%s2685_s1 + $0xc0] sm:$0xff] (!%p194_p3)   ;;  %1997 = vmatprep.subr.bf16.mxu1 (!%p194_p3), %v2135_v1  ;;  %v2139_v5 = vld [vmem:[%s2685_s1 + $0xc8] sm:$0xff] (!%p194_p3)   ;;  %v2142_v8 = vld [vmem:[%s2685_s1 + $0xd0] sm:$0xff] (!%p194_p3)  }
   0x9   : > { %1842 = vmatpush3.bf16.msra.mxu0 (!%p194_p3), %v2136_v2  ;;  %1998 = vmatpush3.bf16.msra.mxu1 (!%p194_p3), %v2135_v1  ;;  %v2143_v9 = vld [vmem:[%s2685_s1 + $0x118] sm:$0xff] (!%p194_p3)   ;;  %v2146_v12 = vld [vmem:[%s2685_s1 + $0x120] sm:$0xff] (!%p194_p3)   ;;  %v2149_v15 = vld [vmem:[%s2685_s1 + $0x128] sm:$0xff] (!%p194_p3)  }
   0xa   : > { %1843 = vmatprep.subr.bf16.mxu0 (!%p194_p3), %v2137_v3  ;;  %1999 = vmatprep.subr.bf16.mxu1 (!%p194_p3), %v2138_v4  ;;  %v2144_v10 = vld [vmem:[%s2685_s1 + $0x158] sm:$0xff] (!%p194_p3)   ;;  %v2147_v13 = vld [vmem:[%s2685_s1 + $0x160] sm:$0xff] (!%p194_p3)   ;;  %v2150_v16 = vld [vmem:[%s2685_s1 + $0x168] sm:$0xff] (!%p194_p3)  }
   0xb   : > { %v2145_v11 = vld [vmem:[%s2685_s1 + $0xd8] sm:$0xff] (!%p194_p3)   ;;  %v2148_v14 = vld [vmem:[%s2685_s1 + $0xe0] sm:$0xff] (!%p194_p3)   ;;  %v2151_v17 = vld [vmem:[%s2685_s1 + $0xe8] sm:$0xff] (!%p194_p3)  }
   0xc   : > { %v2152_v18 = vld [vmem:[%s2685_s1 + $0x130] sm:$0xff] (!%p194_p3)   ;;  %v2155_v21 = vld [vmem:[%s2685_s1 + $0x138] sm:$0xff] (!%p194_p3)   ;;  %v2158_v32 = vld [vmem:[%s2685_s1 + $0x40] sm:$0xff] (!%p194_p3)  }
   0xd   : > { %1844 = vmatpush3.bf16.msra.mxu0 (!%p194_p3), %v2139_v5  ;;  %2000 = vmatpush3.bf16.msra.mxu1 (!%p194_p3), %v2138_v4  ;;  %v2153_v19 = vld [vmem:[%s2685_s1 + $0x170] sm:$0xff] (!%p194_p3)   ;;  %v2156_v24 = vld [vmem:[%s2685_s1 + $0x178] sm:$0xff] (!%p194_p3)   ;;  %v2159_v35 = vld [vmem:[%s2685_s1 + $0x80] sm:$0xff] (!%p194_p3)  }
   0xe   : > { %1845 = vmatprep.subr.bf16.mxu0 %v2140_v6  ;;  %2001 = vmatprep.subr.bf16.mxu1 %v2141_v7  ;;  %s2694_s15 = smov (!%p232_p4, %s2220_s15), 1  ;;  %v2154_v20 = vld [vmem:[%s2685_s1 + $0xf0] sm:$0xff]   ;;  %v2157_v28 = vld [vmem:[%s2685_s1 + $0xf8] sm:$0xff]   ;;  %v2160_v38 = vld [vmem:[%s2685_s1] sm:$0xff]  }
   0xf   : > { %s2109_s5 = smul.u32 240, %s2694_s15  ;;  %v2161_v40 = vld [vmem:[%s2685_s1 + $0x48] sm:$0xff]   ;;  %v2164_v47 = vld [vmem:[%s2685_s1 + $0x50] sm:$0xff]   ;;  %v2167_v51 = vld [vmem:[%s2685_s1 + $0x58] sm:$0xff]  }
  0x10   : > { %v2162_v41 = vld [vmem:[%s2685_s1 + $0x88] sm:$0xff]   ;;  %v2165_v48 = vld [vmem:[%s2685_s1 + $0x90] sm:$0xff]   ;;  %v2168_v54 = vld [vmem:[%s2685_s1 + $0x98] sm:$0xff]  }
  0x11   : > { %1846 = vmatpush3.bf16.msra.mxu0 %v2142_v8  ;;  %2002 = vmatpush3.bf16.msra.mxu1 %v2141_v7  ;;  %s2343_s14 = scalar_lea.vmem %s2684_s0, %s2109_s5  ;;  %v2163_v43 = vld [vmem:[%s2685_s1 + $0x8] sm:$0xff]   ;;  %v2166_v50 = vld [vmem:[%s2685_s1 + $0x10] sm:$0xff]   ;;  %v2169_v55 = vld [vmem:[%s2685_s1 + $0x18] sm:$0xff]  }
  0x12   : > { %1847 = vmatprep.subr.bf16.mxu0 %v2143_v9  ;;  %2003 = vmatprep.subr.bf16.mxu1 %v2144_v10  ;;  %v2352_v22 = vld [vmem:[%s2343_s14 + $0x20] sm:$0xff]  ;;  %v2355_v23 = vld [vmem:[%s2343_s14 + $0x38] sm:$0xff]  ;;  %v2363_v26 = vld [vmem:[%s2343_s14 + $0x28] sm:$0xff] }
  0x13   : > { %v379_v25 = vpack.c.bf16 %v2355_v23, %v2352_v22  ;;  %v2366_v27 = vld [vmem:[%s2343_s14 + $0x40] sm:$0xff]  ;;  %v2372_v29 = vld [vmem:[%s2343_s14 + $0x18] sm:$0xff]  ;;  %v2375_v30 = vld [vmem:[%s2343_s14 + $0x30] sm:$0xff] }
  0x14   : > { %v380_v31 = vpack.c.bf16 %v2366_v27, %v2363_v26  ;;  %v2383_v33 = vld [vmem:[%s2343_s14 + $0x58] sm:$0xff]  ;;  %v2386_v34 = vld [vmem:[%s2343_s14 + $0x70] sm:$0xff]  ;;  %v378_v36 = vpack.c.bf16 %v2375_v30, %v2372_v29  ;;  %v2408_v42 = vld [vmem:[%s2343_s14 + $0x68] sm:$0xff] }
  0x15   : > { %1848 = vmatpush3.bf16.msra.mxu0 %v2145_v11  ;;  %2004 = vmatpush3.bf16.msra.mxu1 %v2144_v10  ;;  %v383_v37 = vpack.c.bf16 %v2386_v34, %v2383_v33  ;;  %v2399_v39 = vld [vmem:[%s2343_s14 + $0x50] sm:$0xff]  ;;  %v2416_v45 = vld [vmem:[%s2343_s14 + $0x48] sm:$0xff]  ;;  %v2419_v46 = vld [vmem:[%s2343_s14 + $0x60] sm:$0xff] }
  0x16   : > { %1849 = vmatprep.subr.bf16.mxu0 %v2146_v12  ;;  %2005 = vmatprep.subr.bf16.mxu1 %v2147_v13  ;;  %v382_v44 = vpack.c.bf16 %v2408_v42, %v2399_v39  ;;  %v381_v49 = vpack.c.bf16 %v2419_v46, %v2416_v45  ;;  %v2436_v52 = vld [vmem:[%s2343_s14 + $0x80] sm:$0xff]  ;;  %v2439_v53 = vld [vmem:[%s2343_s14 + $0x98] sm:$0xff]  ;;  %v2453_v58 = vld [vmem:[%s2343_s14 + $0x90] sm:$0xff] }
  0x17   : > { %615 = vmatprep.mubr.bf16.mxu0 %v379_v25  ;;  %2013 = vmatprep.mubr.bf16.mxu1 %v380_v31  ;;  %v385_v56 = vpack.c.bf16 %v2439_v53, %v2436_v52  ;;  %v2450_v57 = vld [vmem:[%s2343_s14 + $0x78] sm:$0xff]  ;;  %v2170_v59 = vld [vmem:[%s2685_s1 + $0x60] sm:$0xff]   ;;  %v2467_v63 = vld [vmem:[%s2343_s14 + $0xb0] sm:$0xff] }
  0x18   : > { %v2171_v60 = vld [vmem:[%s2685_s1 + $0xa0] sm:$0xff]   ;;  %v384_v61 = vpack.c.bf16 %v2453_v58, %v2450_v57  ;;  %v2470_v0 = vld [vmem:[%s2343_s14 + $0xc8] sm:$0xff]  ;;  %v1582_v10 = vld [vmem:[%s2343_s14 + $0xb8] sm:$0xff] }
  0x19   : > { %1850 = vmatpush3.bf16.msra.mxu0 %v2148_v14  ;;  %2006 = vmatpush3.bf16.msra.mxu1 %v2147_v13  ;;  %v2172_v62 = vld [vmem:[%s2685_s1 + $0x20] sm:$0xff]   ;;  %v2173_v1 = vld [vmem:[%s2685_s1 + $0x68] sm:$0xff]   ;;  %v388_v6 = vpack.c.bf16 %v2470_v0, %v2467_v63  ;;  %v2496_v11 = vld [vmem:[%s2343_s14 + $0xd0] sm:$0xff] }
  0x1a   : > { %1851 = vmatprep.subr.bf16.mxu0 %v2149_v15  ;;  %2007 = vmatprep.subr.bf16.mxu1 %v2150_v16  ;;  %v2174_v2 = vld [vmem:[%s2685_s1 + $0xa8] sm:$0xff]   ;;  %v2480_v4 = vld [vmem:[%s2343_s14 + $0xa0] sm:$0xff]  ;;  %v2176_v12 = vld [vmem:[%s2685_s1 + $0x70] sm:$0xff]   ;;  %v389_v13 = vpack.c.bf16 %v2496_v11, %v1582_v10 }
  0x1b   : > { %v1576_v3 = vld [vmem:[%s2343_s14 + $0x88] sm:$0xff]  ;;  %v2492_v9 = vld [vmem:[%s2343_s14 + $0xc0] sm:$0xff]  ;;  %v2177_v14 = vld [vmem:[%s2685_s1 + $0xb0] sm:$0xff]  }
  0x1c   : > { %v2175_v5 = vld [vmem:[%s2685_s1 + $0x28] sm:$0xff]   ;;  %v386_v8 = vpack.c.bf16 %v2480_v4, %v1576_v3  ;;  %v2182_v31 = vld [vmem:[%s2685_s1 + $0x1c0] sm:$0xff]  }
  0x1d   : > { %1852 = vmatpush3.bf16.msra.mxu0 %v2151_v17  ;;  %2008 = vmatpush3.bf16.msra.mxu1 %v2150_v16  ;;  %v2488_v7 = vld [vmem:[%s2343_s14 + $0xa8] sm:$0xff]  ;;  %v2178_v16 = vld [vmem:[%s2685_s1 + $0x30] sm:$0xff]   ;;  %v2179_v17 = vld [vmem:[%s2685_s1 + $0x78] sm:$0xff]  }
  0x1e   : > { %1853 = vmatprep.subr.bf16.mxu0 %v2152_v18  ;;  %2009 = vmatprep.subr.bf16.mxu1 %v2153_v19  ;;  %v387_v15 = vpack.c.bf16 %v2492_v9, %v2488_v7  ;;  %v265_v18 = vld [vmem:[%s2343_s14 + $0x8] sm:$0xff] }
  0x1f   : > { %v289_v25 = vpack.c.bf16 %v2352_v22, %v265_v18  ;;  %v293_v22 = vpack.c.bf16 %v2383_v33, %v2366_v27  ;;  %v2547_v27 = vpack.c.bf16 %v1576_v3, %v2386_v34  ;;  %v2187_v33 = vld [vmem:[%s2685_s1 + $0x188] sm:$0xff]   ;;  %v291_v34 = vpack.c.bf16 %v2416_v45, %v2375_v30  ;;  %v2194_v45 = vld [vmem:[%s2685_s1 + $0x1e0] sm:$0xff]  }
  0x20   : > { %v295_v30 = vpack.c.bf16 %v2436_v52, %v2408_v42  ;;  %v294_v42 = vpack.c.bf16 %v2450_v57, %v2419_v46  ;;  %v298_v46 = vpack.c.bf16 %v2467_v63, %v2439_v53  ;;  %v297_v53 = vpack.c.bf16 %v2488_v7, %v2453_v58  ;;  %v2202_v57 = vld [vmem:[%s2685_s1 + $0x1b0] sm:$0xff]   ;;  %v2205_v58 = vld [vmem:[%s2685_s1 + $0x1b8] sm:$0xff]   ;;  %v1704_v63 = vld [vmem:[%s2343_s14 + $0xe0] sm:$0xff] }
  0x21   : > { %1854 = vmatpush3.bf16.msra.mxu0 %v2154_v20  ;;  %2010 = vmatpush3.bf16.msra.mxu1 %v2153_v19  ;;  %v266_v19 = vld [vmem:[%s2343_s14 + $0x10] sm:$0xff]  ;;  %v2180_v20 = vld [vmem:[%s2685_s1 + $0xb8] sm:$0xff]  }
  0x22   : > { %1855 = vmatprep.subr.bf16.mxu0 %v2155_v21  ;;  %2011 = vmatprep.subr.bf16.mxu1 %v2156_v24  ;;  %v290_v21 = vpack.c.bf16 %v2363_v26, %v266_v19  ;;  %v2183_v26 = vld [vmem:[%s2685_s1 + $0x200] sm:$0xff]  }
  0x25   : > { %1856 = vmatpush3.bf16.msra.mxu0 %v2157_v28  ;;  %2012 = vmatpush3.bf16.msra.mxu1 %v2156_v24  ;;  %v2181_v24 = vld [vmem:[%s2685_s1 + $0x38] sm:$0xff]   ;;  %v264_v28 = vld [vmem:[%s2343_s14] sm:$0xff] }
  0x26   : > { %1893 = vmatprep.subr.bf16.mxu0 %v2158_v32  ;;  %2021 = vmatprep.subr.bf16.mxu1 %v2159_v35  ;;  %v288_v32 = vpack.c.bf16 %v2372_v29, %v264_v28  ;;  %v2544_v29 = vpack.c.bf16 %v2399_v39, %v2355_v23  ;;  %v2189_v23 = vld [vmem:[%s2685_s1 + $0x210] sm:$0xff]  }
  0x27   : > { %v2190_v39 = vld [vmem:[%s2685_s1 + $0x190] sm:$0xff]  }
  0x28   : > { %616 = vmatmul.mubr.bf16.vlgmr.msra.gmra.mrb[0].mxu0 %v378_v36  ;;  %2014 = vmatmul.mubr.bf16.vlgmr.msra.gmra.mrb[0].mxu1 %v383_v37  ;;  %v2185_v36 = vld [vmem:[%s2685_s1 + $0x1c8] sm:$0xff]  }
  0x29   : > { %1894 = vmatpush3.bf16.msra.mxu0 %v2160_v38  ;;  %2022 = vmatpush3.bf16.msra.mxu1 %v2159_v35  ;;  %v2184_v35 = vld [vmem:[%s2685_s1 + $0x180] sm:$0xff]   ;;  %v2186_v37 = vld [vmem:[%s2685_s1 + $0x208] sm:$0xff]   ;;  %v2188_v38 = vld [vmem:[%s2685_s1 + $0x1d0] sm:$0xff]  }
  0x2a   : > { %1895 = vmatprep.subr.bf16.mxu0 %v2161_v40  ;;  %2023 = vmatprep.subr.bf16.mxu1 %v2162_v41  ;;  %v299_v40 = vpack.c.bf16 %v1582_v10, %v2480_v4 }
  0x2b   : > { %623 = vmatprep.mubr.bf16.mxu0 %v382_v44  ;;  %2017 = vmatprep.mubr.bf16.mxu1 %v386_v8  ;;  %v2193_v44 = vld [vmem:[%s2685_s1 + $0x198] sm:$0xff]  }
  0x2d   : > { %1896 = vmatpush3.bf16.msra.mxu0 %v2163_v43  ;;  %2024 = vmatpush3.bf16.msra.mxu1 %v2162_v41  ;;  %v2191_v41 = vld [vmem:[%s2685_s1 + $0x1d8] sm:$0xff]  }
  0x2e   : > { %1897 = vmatprep.subr.bf16.mxu0 %v2164_v47  ;;  %2025 = vmatprep.subr.bf16.mxu1 %v2165_v48  ;;  %v2192_v43 = vld [vmem:[%s2685_s1 + $0x218] sm:$0xff]   ;;  %v2195_v47 = vld [vmem:[%s2685_s1 + $0x220] sm:$0xff]  }
  0x30   : > { %624 = vmatmul.mubr.bf16.gmra.mrb[4].mxu0 %v381_v49  ;;  %2018 = vmatmul.mubr.bf16.gmra.mrb[4].mxu1 %v389_v13  ;;  %v2197_v49 = vld [vmem:[%s2685_s1 + $0x1e8] sm:$0xff]  }
  0x31   : > { %1898 = vmatpush3.bf16.msra.mxu0 %v2166_v50  ;;  %2026 = vmatpush3.bf16.msra.mxu1 %v2165_v48  ;;  %v2196_v48 = vld [vmem:[%s2685_s1 + $0x1a0] sm:$0xff]   ;;  %v2198_v50 = vld [vmem:[%s2685_s1 + $0x228] sm:$0xff]  }
  0x32   : > { %1899 = vmatprep.subr.bf16.mxu0 %v2167_v51  ;;  %2027 = vmatprep.subr.bf16.mxu1 %v2168_v54  ;;  %v1703_v51 = vld [vmem:[%s2343_s14 + $0xd8] sm:$0xff] }
  0x33   : > { %631 = vmatprep.mubr.bf16.mxu0 %v385_v56  ;;  %2037 = vmatprep.mubr.bf16.mxu1 %v290_v21  ;;  %v1026_v52 = vpack.c.bf16 %v1703_v51, %v2492_v9  ;;  %v2201_v56 = vld [vmem:[%s2685_s1 + $0x230] sm:$0xff]  }
  0x35   : > { %1900 = vmatpush3.bf16.msra.mxu0 %v2169_v55  ;;  %2028 = vmatpush3.bf16.msra.mxu1 %v2168_v54  ;;  %v2199_v54 = vld [vmem:[%s2685_s1 + $0x1a8] sm:$0xff]   ;;  %v2200_v55 = vld [vmem:[%s2685_s1 + $0x1f0] sm:$0xff]  }
  0x36   : > { %1901 = vmatprep.subr.bf16.mxu0 %v2170_v59  ;;  %2029 = vmatprep.subr.bf16.mxu1 %v2171_v60  ;;  %v2203_v59 = vld [vmem:[%s2685_s1 + $0x1f8] sm:$0xff]  }
  0x38   : > { %632 = vmatmul.mubr.bf16.gmra.mrb[8].mxu0 %v384_v61  ;;  %v1705_v61 = vld [vmem:[%s2343_s14 + $0xe8] sm:$0xff]  ;;  %s1789_s14 = sshll.u32 %s2694_s15, 5 }
  0x39   : > { %1902 = vmatpush3.bf16.msra.mxu0 %v2172_v62  ;;  %2030 = vmatpush3.bf16.msra.mxu1 %v2171_v60  ;;  %v2204_v60 = vld [vmem:[%s2685_s1 + $0x238] sm:$0xff]   ;;  %v1028_v62 = vpack.c.bf16 %v1705_v61, %v2496_v11  ;;  %s2641_s20 = scalar_lea.vmem %s2687_s3, %s1789_s14  ;;  %s2657_s25 = scalar_lea.vmem %s2688_s4, %s1789_s14 }
  0x3a   : > { %1903 = vmatprep.subr.bf16.mxu0 %v2173_v1  ;;  %2031 = vmatprep.subr.bf16.mxu1 %v2174_v2  ;;  %v1027_v1 = vpack.c.bf16 %v1704_v63, %v2470_v0 }
  0x3b   : > { %639 = vmatprep.mubr.bf16.mxu0 %v388_v6 }
  0x3d   : > { %1904 = vmatpush3.bf16.msra.mxu0 %v2175_v5  ;;  %2032 = vmatpush3.bf16.msra.mxu1 %v2174_v2 }
  0x3e   : > { %1905 = vmatprep.subr.bf16.mxu0 %v2176_v12  ;;  %2033 = vmatprep.subr.bf16.mxu1 %v2177_v14 }
  0x40   : > { %640 = vmatmul.mubr.bf16.gmra.mrb[12].mxu0 %v387_v15 }
  0x41   : > { %1906 = vmatpush3.bf16.msra.mxu0 %v2178_v16  ;;  %2034 = vmatpush3.bf16.msra.mxu1 %v2177_v14 }
  0x42   : > { %1907 = vmatprep.subr.bf16.mxu0 %v2179_v17  ;;  %2035 = vmatprep.subr.bf16.mxu1 %v2180_v20 }
  0x43   : > { %889 = vmatprep.mubr.bf16.mxu0 %v289_v25 }
  0x45   : > { %1908 = vmatpush3.bf16.msra.mxu0 %v2181_v24  ;;  %2036 = vmatpush3.bf16.msra.mxu1 %v2180_v20 }
  0x46   : > { %1945 = vmatprep.subr.bf16.mxu0 %v2182_v31  ;;  %2045 = vmatprep.subr.bf16.mxu1 %v2183_v26 }
  0x48   : > { %890 = vmatmul.mubr.bf16.vlgmr.msra.gmra.mrb[16].mxu0 %v288_v32  ;;  %2038 = vmatmul.mubr.bf16.vlgmr.msra.gmra.mrb[0].mxu1 %v293_v22 }
  0x49   : > { %1946 = vmatpush3.bf16.msra.mxu0 %v2184_v35  ;;  %2046 = vmatpush3.bf16.msra.mxu1 %v2183_v26 }
  0x4a   : > { %1947 = vmatprep.subr.bf16.mxu0 %v2185_v36  ;;  %2047 = vmatprep.subr.bf16.mxu1 %v2186_v37 }
  0x4b   : > { %897 = vmatprep.mubr.bf16.mxu0 %v2544_v29  ;;  %2041 = vmatprep.mubr.bf16.mxu1 %v2547_v27 }
  0x4d   : > { %1948 = vmatpush3.bf16.msra.mxu0 %v2187_v33  ;;  %2048 = vmatpush3.bf16.msra.mxu1 %v2186_v37 }
  0x4e   : > { %1949 = vmatprep.subr.bf16.mxu0 %v2188_v38  ;;  %2049 = vmatprep.subr.bf16.mxu1 %v2189_v23 }
  0x50   : > { %898 = vmatmul.mubr.bf16.gmra.mrb[20].mxu0 %v291_v34  ;;  %2042 = vmatmul.mubr.bf16.gmra.mrb[4].mxu1 %v299_v40 }
  0x51   : > { %1950 = vmatpush3.bf16.msra.mxu0 %v2190_v39  ;;  %2050 = vmatpush3.bf16.msra.mxu1 %v2189_v23 }
  0x52   : > { %1951 = vmatprep.subr.bf16.mxu0 %v2191_v41  ;;  %2051 = vmatprep.subr.bf16.mxu1 %v2192_v43 }
  0x53   : > { %905 = vmatprep.mubr.bf16.mxu0 %v295_v30  ;;  %2061 = vmatprep.mubr.bf16.mxu1 %v293_v22 }
  0x55   : > { %1952 = vmatpush3.bf16.msra.mxu0 %v2193_v44  ;;  %2052 = vmatpush3.bf16.msra.mxu1 %v2192_v43 }
  0x56   : > { %1953 = vmatprep.subr.bf16.mxu0 %v2194_v45  ;;  %2053 = vmatprep.subr.bf16.mxu1 %v2195_v47 }
  0x58   : > { %906 = vmatmul.mubr.bf16.gmra.mrb[24].mxu0 %v294_v42 }
  0x59   : > { %1954 = vmatpush3.bf16.msra.mxu0 %v2196_v48  ;;  %2054 = vmatpush3.bf16.msra.mxu1 %v2195_v47 }
  0x5a   : > { %1955 = vmatprep.subr.bf16.mxu0 %v2197_v49  ;;  %2055 = vmatprep.subr.bf16.mxu1 %v2198_v50 }
  0x5b   : > { %913 = vmatprep.mubr.bf16.mxu0 %v298_v46 }
  0x5d   : > { %1956 = vmatpush3.bf16.msra.mxu0 %v2199_v54  ;;  %2056 = vmatpush3.bf16.msra.mxu1 %v2198_v50 }
  0x5e   : > { %1957 = vmatprep.subr.bf16.mxu0 %v2200_v55  ;;  %2057 = vmatprep.subr.bf16.mxu1 %v2201_v56 }
  0x60   : > { %914 = vmatmul.mubr.bf16.gmra.mrb[28].mxu0 %v297_v53 }
  0x61   : > { %1958 = vmatpush3.bf16.msra.mxu0 %v2202_v57  ;;  %2058 = vmatpush3.bf16.msra.mxu1 %v2201_v56 }
  0x62   : > { %1959 = vmatprep.subr.bf16.mxu0 %v2203_v59  ;;  %2059 = vmatprep.subr.bf16.mxu1 %v2204_v60 }
  0x63   : > { %1254 = vmatprep.mubr.bf16.mxu0 %v2544_v29 }
  0x65   : > { %1960 = vmatpush3.bf16.msra.mxu0 %v2205_v58  ;;  %2060 = vmatpush3.bf16.msra.mxu1 %v2204_v60 }
  0x68   : > { %1255 = vmatmul.mubr.bf16.vlgmr.msra.gmra.mrb[32].mxu0 %v291_v34  ;;  %2062 = vmatmul.mubr.bf16.vlgmr.msra.gmra.mrb[0].mxu1 %v2547_v27 }
  0x69   : > { %1262 = vmatprep.mubr.bf16.mxu0 %v295_v30  ;;  %2065 = vmatprep.mubr.bf16.mxu1 %v299_v40 }
  0x70   : > { %1263 = vmatmul.mubr.bf16.gmra.mrb[36].mxu0 %v294_v42  ;;  %2066 = vmatmul.mubr.bf16.gmra.mrb[4].mxu1 %v1028_v62 }
  0x71   : > { %1270 = vmatprep.mubr.bf16.mxu0 %v298_v46 }
  0x78   : > { %1271 = vmatmul.mubr.bf16.gmra.mrb[40].mxu0 %v297_v53 }
  0x79   : > { %1278 = vmatprep.mubr.bf16.mxu0 %v1027_v1  ;;  %v1800_v1 = vld [vmem:[%s2641_s20] sm:$0xff]  }
  0x80   : > { %1279 = vmatmul.mubr.bf16.gmra.mrb[44].mxu0 %v1026_v52 }
  0xfb   : > { %v1857_v2 = vpop.f32.mrb[0].mxu0 }
  0xfc   : > { %v1858_v3 = vpop.f32.mrb[1].mxu0 }
  0xfd   : > { %v1859_v4 = vadd.f32 %v1858_v3, %v1857_v2  ;;  %v1860_v5 = vpop.f32.mrb[2].mxu0 }
  0xfe   : > { %v1861_v6 = vpop.f32.mrb[3].mxu0 }
  0xff   : > { %v1862_v7 = vadd.f32 %v1861_v6, %v1860_v5  ;;  %v2647_v6 = vld [vmem:[%s2686_s2] ss:$0 sm:$0xff] }
 0x103   : > { %v1863_v8 = vpop.f32.mrb[4].mxu0 }
 0x104   : > { %v1864_v9 = vpop.f32.mrb[5].mxu0 }
 0x105   : > { %v1865_v10 = vadd.f32 %v1864_v9, %v1863_v8  ;;  %v1866_v12 = vpop.f32.mrb[6].mxu0  ;;  %v1801_v8 = vunpack.c.l.bf16 %v1800_v1 }
 0x106   : > { %v1867_v11 = vpop.f32.mrb[7].mxu0 }
 0x107   : > { %v1868_v13 = vadd.f32 %v1867_v11, %v1866_v12  ;;  %v1802_v11 = vunpack.c.h.bf16 %v1800_v1  ;;  %v1837_v1 = vld [vmem:[%s2641_s20 + $0x18] sm:$0xff]  }
 0x10b   : > { %v1869_v14 = vpop.f32.mrb[8].mxu0 }
 0x10c   : > { %v1870_v15 = vpop.f32.mrb[9].mxu0 }
 0x10d   : > { %v1871_v16 = vadd.f32 %v1870_v15, %v1869_v14  ;;  %v1872_v17 = vpop.f32.mrb[10].mxu0 }
 0x10e   : > { %v1873_v0 = vpop.f32.mrb[11].mxu0 }
 0x10f   : > { %v1874_v18 = vadd.f32 %v1873_v0, %v1872_v17 }
 0x113   : > { %v1875_v19 = vpop.f32.mrb[12].mxu0 }
 0x114   : > { %v1876_v20 = vpop.f32.mrb[13].mxu0 }
 0x115   : > { %v1877_v21 = vadd.f32 %v1876_v20, %v1875_v19  ;;  %v1878_v24 = vpop.f32.mrb[14].mxu0  ;;  %v1835_v19 = vld [vmem:[%s2641_s20 + $0x8] sm:$0xff]  }
 0x116   : > { %v1879_v25 = vpop.f32.mrb[15].mxu0 }
 0x117   : > { %v1880_v28 = vadd.f32 %v1879_v25, %v1878_v24 }
 0x11b   : > { %v1909_v31 = vpop.f32.mrb[16].mxu0 }
 0x11c   : > { %v1910_v26 = vpop.f32.mrb[17].mxu0 }
 0x11d   : > { %v1911_v32 = vadd.f32 %v1910_v26, %v1909_v31  ;;  %v1912_v22 = vpop.f32.mrb[18].mxu0 }
 0x11e   : > { %v1913_v35 = vpop.f32.mrb[19].mxu0 }
 0x11f   : > { %v2072_v36 = vadd.f32 %v1911_v32, %v1859_v4  ;;  %v1914_v37 = vadd.f32 %v1913_v35, %v1912_v22  ;;  %v1805_v32 = vunpack.c.l.bf16 %v1835_v19 }
 0x121   : > { %v2078_v29 = vadd.f32 %v1914_v37, %v1862_v7 }
 0x123   : > { %v1915_v27 = vpop.f32.mrb[20].mxu0 }
 0x124   : > { %v1916_v33 = vpop.f32.mrb[21].mxu0 }
 0x125   : > { %v1917_v38 = vadd.f32 %v1916_v33, %v1915_v27  ;;  %v1918_v23 = vpop.f32.mrb[22].mxu0 }
 0x126   : > { %v1919_v34 = vpop.f32.mrb[23].mxu0 }
 0x127   : > { %v2069_v39 = vadd.f32 %v1917_v38, %v1865_v10  ;;  %v1920_v40 = vadd.f32 %v1919_v34, %v1918_v23  ;;  %v1806_v38 = vunpack.c.h.bf16 %v1835_v19 }
 0x129   : > { %v2075_v41 = vadd.f32 %v1920_v40, %v1868_v13 }
 0x12b   : > { %v1921_v43 = vpop.f32.mrb[24].mxu0 }
 0x12c   : > { %v1922_v30 = vpop.f32.mrb[25].mxu0 }
 0x12d   : > { %v1923_v44 = vadd.f32 %v1922_v30, %v1921_v43  ;;  %v1924_v45 = vpop.f32.mrb[26].mxu0 }
 0x12e   : > { %v1925_v47 = vpop.f32.mrb[27].mxu0 }
 0x12f   : > { %v2627_v42 = vadd.f32 %v1923_v44, %v1871_v16  ;;  %v1926_v48 = vadd.f32 %v1925_v47, %v1924_v45 }
 0x131   : > { %v2629_v49 = vadd.f32 %v1926_v48, %v1874_v18 }
 0x133   : > { %v1927_v50 = vpop.f32.mrb[28].mxu0 }
 0x134   : > { %v1928_v51 = vpop.f32.mrb[29].mxu0 }
 0x135   : > { %v1929_v46 = vadd.f32 %v1928_v51, %v1927_v50  ;;  %v1930_v52 = vpop.f32.mrb[30].mxu0 }
 0x136   : > { %v1931_v54 = vpop.f32.mrb[31].mxu0 }
 0x137   : > { %v2631_v55 = vadd.f32 %v1929_v46, %v1877_v21  ;;  %v1932_v56 = vadd.f32 %v1931_v54, %v1930_v52 }
 0x139   : > { %v2634_v53 = vadd.f32 %v1932_v56, %v1880_v28 }
 0x13b   : > { %v1961_v57 = vpop.f32.mrb[32].mxu0  ;;  %v2063_v59 = vpop.f32.mrb[0].mxu1 }
 0x13c   : > { %v1962_v60 = vpop.f32.mrb[33].mxu0  ;;  %v1321_v58 = vpop.f32.mrb[1].mxu1 }
 0x13d   : > { %v1963_v61 = vadd.f32 %v1962_v60, %v1961_v57  ;;  %v1964_v62 = vpop.f32.mrb[34].mxu0  ;;  %v2064_v63 = vpop.f32.mrb[2].mxu1 }
 0x13e   : > { %v1965_v2 = vpop.f32.mrb[35].mxu0  ;;  %v1324_v3 = vpop.f32.mrb[3].mxu1 }
 0x13f   : > { %v2073_v4 = vadd.f32 %v2072_v36, %v1963_v61  ;;  %v1966_v5 = vadd.f32 %v1965_v2, %v1964_v62 }
 0x141   : > { %v2074_v7 = vadd.f32 %v2073_v4, %v1321_v58  ;;  %v2079_v9 = vadd.f32 %v2078_v29, %v1966_v5 }
 0x143   : > { %v1367_v10 = vadd.f32 %v2074_v7, %v2647_v6  ;;  %v2080_v12 = vadd.f32 %v2079_v9, %v1324_v3  ;;  %v1967_v13 = vpop.f32.mrb[36].mxu0  ;;  %v2067_v14 = vpop.f32.mrb[4].mxu1  ;;  %v1813_v7 = vunpack.c.l.bf16 %v1837_v1 }
 0x144   : > { %v1968_v15 = vpop.f32.mrb[37].mxu0  ;;  %v1337_v16 = vpop.f32.mrb[5].mxu1 }
 0x145   : > { %v1391_v17 = vadd.f32 %v1801_v8, %v1367_v10  ;;  %v1368_v0 = vadd.f32 %v2080_v12, %v2647_v6  ;;  %v1969_v18 = vadd.f32 %v1968_v15, %v1967_v13  ;;  %v1970_v20 = vpop.f32.mrb[38].mxu0  ;;  %v2068_v21 = vpop.f32.mrb[6].mxu1 }
 0x146   : > { %v1971_v24 = vpop.f32.mrb[39].mxu0  ;;  %v1340_v25 = vpop.f32.mrb[7].mxu1 }
 0x147   : > { %v1392_v28 = vadd.f32 %v1802_v11, %v1368_v0  ;;  %v2070_v31 = vadd.f32 %v2069_v39, %v1969_v18  ;;  %v1972_v26 = vadd.f32 %v1971_v24, %v1970_v20  ;;  %v1399_v22 = vmax.f32 %v1391_v17, 0.0 }
 0x149   : > { %v1400_v35 = vmax.f32 %v1392_v28, 0.0  ;;  %v2071_v36 = vadd.f32 %v2070_v31, %v2063_v59  ;;  %v2076_v37 = vadd.f32 %v2075_v41, %v1972_v26  ;;  %v1836_v41 = vld [vmem:[%s2641_s20 + $0x10] sm:$0xff]  }
 0x14a   : > { %v1809_v50 = vunpack.c.l.bf16 %v1836_v41  ;;  %v1810_v60 = vunpack.c.h.bf16 %v1836_v41 }
 0x14b   : > { %v1818_v29 = vpack.c.bf16 %v1400_v35, %v1399_v22  ;;  %v1369_v27 = vadd.f32 %v2071_v36, %v2647_v6  ;;  %v2077_v33 = vadd.f32 %v2076_v37, %v2064_v63  ;;  %v1973_v23 = vpop.f32.mrb[40].mxu0 }
 0x14c   : > { %v1974_v34 = vpop.f32.mrb[41].mxu0 }
 0x14d   : > { %1819 = vst [vmem:[%s2657_s25] sm:$0xff] %v1818_v29   ;;  %v1393_v39 = vadd.f32 %v1805_v32, %v1369_v27  ;;  %v1370_v40 = vadd.f32 %v2077_v33, %v2647_v6  ;;  %v1975_v43 = vadd.f32 %v1974_v34, %v1973_v23  ;;  %v1976_v30 = vpop.f32.mrb[42].mxu0 }
 0x14e   : > { %v1977_v44 = vpop.f32.mrb[43].mxu0 }
 0x14f   : > { %v1394_v45 = vadd.f32 %v1806_v38, %v1370_v40  ;;  %v2085_v47 = vadd.f32 %v2627_v42, %v1975_v43  ;;  %v1978_v48 = vadd.f32 %v1977_v44, %v1976_v30  ;;  %v1401_v51 = vmax.f32 %v1393_v39, 0.0 }
 0x151   : > { %v1402_v46 = vmax.f32 %v1394_v45, 0.0  ;;  %v2086_v52 = vadd.f32 %v2085_v47, %v1337_v16  ;;  %v2091_v54 = vadd.f32 %v2629_v49, %v1978_v48  ;;  %v1814_v16 = vunpack.c.h.bf16 %v1837_v1 }
 0x153   : > { %v1823_v56 = vpack.c.bf16 %v1402_v46, %v1401_v51  ;;  %v1371_v57 = vadd.f32 %v2086_v52, %v2647_v6  ;;  %v2092_v59 = vadd.f32 %v2091_v54, %v1340_v25  ;;  %v1979_v58 = vpop.f32.mrb[44].mxu0 }
 0x154   : > { %v1980_v61 = vpop.f32.mrb[45].mxu0 }
 0x155   : > { %1838 = vst [vmem:[%s2657_s25 + $0x8] sm:$0xff] %v1823_v56   ;;  %v1395_v62 = vadd.f32 %v1809_v50, %v1371_v57  ;;  %v1372_v63 = vadd.f32 %v2092_v59, %v2647_v6  ;;  %v1981_v42 = vadd.f32 %v1980_v61, %v1979_v58  ;;  %v1982_v2 = vpop.f32.mrb[46].mxu0 }
 0x156   : > { %v1983_v3 = vpop.f32.mrb[47].mxu0 }
 0x157   : > { %v1396_v4 = vadd.f32 %v1810_v60, %v1372_v63  ;;  %v2082_v5 = vadd.f32 %v2631_v55, %v1981_v42  ;;  %v1984_v49 = vadd.f32 %v1983_v3, %v1982_v2  ;;  %v1403_v8 = vmax.f32 %v1395_v62, 0.0 }
 0x159   : > { %v1404_v9 = vmax.f32 %v1396_v4, 0.0  ;;  %v2083_v10 = vadd.f32 %v2082_v5, %v2067_v14  ;;  %v2088_v12 = vadd.f32 %v2634_v53, %v1984_v49 }
 0x15b   : > { %v1828_v11 = vpack.c.bf16 %v1404_v9, %v1403_v8  ;;  %v1373_v13 = vadd.f32 %v2083_v10, %v2647_v6  ;;  %v2089_v15 = vadd.f32 %v2088_v12, %v2068_v21 }
 0x15d   : > { %1839 = vst [vmem:[%s2657_s25 + $0x10] sm:$0xff] %v1828_v11   ;;  %v1397_v17 = vadd.f32 %v1813_v7, %v1373_v13  ;;  %v1374_v0 = vadd.f32 %v2089_v15, %v2647_v6 }
 0x15f   : > { %v1398_v18 = vadd.f32 %v1814_v16, %v1374_v0  ;;  %v1405_v19 = vmax.f32 %v1397_v17, 0.0 }
 0x161   : > { %v1406_v55 = vmax.f32 %v1398_v18, 0.0 }
 0x163   : > { %v1833_v20 = vpack.c.bf16 %v1406_v55, %v1405_v19 }
 0x165   : > { %1840 = vst [vmem:[%s2657_s25 + $0x18] sm:$0xff] %v1833_v20  }
 0x166 PF: > { %s14_s17 = sadd.s32 1, %s2228_s17   ;;  %s2689_s15 = smov %s2224_s16 }
 0x167   : > { %p11_p5 = scmp.ge.s32.totalorder %s14_s17, 4   ;;  %s2690_s16 = smov %s2692_s18 }
 0x169   :  { %13 = sbr.rel (!%p11_p5) target bundleno = 2 (0x2), region = 74 }

// kernel: _lambda_.8
= control target key start
LH: loop header
LB: loop body
LE: loop exit
PB: predicated region body
PF: predicated region fallthrough
CT: control target
= control target key end

     0   :  { %s2123_s12 = smov 0   ;;  %s2125_s13 = smov 0   ;;  %s2523_s0 = inlined_call_operand.vmem [shape: f32[1,2,80,384], index: 0, kind: input, shape index: {}]   ;;  %s2524_s1 = inlined_call_operand.vmem [shape: bf16[3,384,128], index: 1, kind: input, shape index: {}]   ;;  %s2525_s2 = inlined_call_operand.vmem [shape: f32[1,128], index: 2, kind: input, shape index: {}]   ;;  %s2526_s3 = inlined_call_operand.vmem [shape: bf16[2,64,128], index: 3, kind: output, shape index: {}]  }
   0x1   :  { %s2127_s14 = smov 0  }
   0x2 LB: > { %s25_s15 = sadd.s32 1, %s2097_s13  ;;  %p1451_p0 = scmp.ge.s32.totalorder %s2101_s14, 1  ;;  %s2101_s14 = sphi %s2127_s14, %s13_s14   ;;  %s2097_s13 = sphi %s2125_s13, %s2528_s13   ;;  %s2093_s12 = sphi %s2123_s12, %s2527_s12  }
   0x3   : > { %p27_p1 = scmp.ge.s32.totalorder %s25_s15, 2  ;;  %p151_p2 = scmp.lt.s32.totalorder %s2101_s14, 3 }
   0x5   : > { %s2530_s15 = smov (%p27_p1, %s25_s15), 0  ;;  %p152_p3 = pnand %p1451_p0, %p151_p2 }
   0x6   : > { %v2007_v0 = vld [vmem:[%s2524_s1 + $0x100] sm:$0xff] (!%p152_p3)   ;;  %v2010_v3 = vld [vmem:[%s2524_s1 + $0x108] sm:$0xff] (!%p152_p3)   ;;  %v2013_v6 = vld [vmem:[%s2524_s1 + $0x110] sm:$0xff] (!%p152_p3)   ;;  %p179_p4 = scmp.lt.s32.totalorder (!%p152_p3), %s2093_s12, 1 }
   0x7   : > { %155 = sbr.rel (%p152_p3) target bundleno = 356 (0x164), region = 32  ;;  %v2008_v1 = vld [vmem:[%s2524_s1 + $0x140] sm:$0xff] (!%p152_p3)   ;;  %1714 = vmatprep.subr.bf16.mxu0 (!%p152_p3), %v2007_v0  ;;  %v2011_v4 = vld [vmem:[%s2524_s1 + $0x148] sm:$0xff] (!%p152_p3)   ;;  %v2014_v7 = vld [vmem:[%s2524_s1 + $0x150] sm:$0xff] (!%p152_p3)  }
   0x8   : > { %v2009_v2 = vld [vmem:[%s2524_s1 + $0xc0] sm:$0xff] (!%p152_p3)   ;;  %1870 = vmatprep.subr.bf16.mxu1 (!%p152_p3), %v2008_v1  ;;  %v2012_v5 = vld [vmem:[%s2524_s1 + $0xc8] sm:$0xff] (!%p152_p3)   ;;  %v2015_v8 = vld [vmem:[%s2524_s1 + $0xd0] sm:$0xff] (!%p152_p3)  }
   0x9   : > { %1715 = vmatpush3.bf16.msra.mxu0 (!%p152_p3), %v2009_v2  ;;  %1871 = vmatpush3.bf16.msra.mxu1 (!%p152_p3), %v2008_v1  ;;  %v2016_v9 = vld [vmem:[%s2524_s1 + $0x118] sm:$0xff] (!%p152_p3)   ;;  %v2019_v12 = vld [vmem:[%s2524_s1 + $0x120] sm:$0xff] (!%p152_p3)   ;;  %v2022_v15 = vld [vmem:[%s2524_s1 + $0x128] sm:$0xff] (!%p152_p3)  }
   0xa   : > { %1716 = vmatprep.subr.bf16.mxu0 (!%p152_p3), %v2010_v3  ;;  %1872 = vmatprep.subr.bf16.mxu1 (!%p152_p3), %v2011_v4  ;;  %v2017_v10 = vld [vmem:[%s2524_s1 + $0x158] sm:$0xff] (!%p152_p3)   ;;  %v2020_v13 = vld [vmem:[%s2524_s1 + $0x160] sm:$0xff] (!%p152_p3)   ;;  %v2023_v16 = vld [vmem:[%s2524_s1 + $0x168] sm:$0xff] (!%p152_p3)  }
   0xb   : > { %v2018_v11 = vld [vmem:[%s2524_s1 + $0xd8] sm:$0xff] (!%p152_p3)   ;;  %v2021_v14 = vld [vmem:[%s2524_s1 + $0xe0] sm:$0xff] (!%p152_p3)   ;;  %v2024_v17 = vld [vmem:[%s2524_s1 + $0xe8] sm:$0xff] (!%p152_p3)  }
   0xc   : > { %v2025_v18 = vld [vmem:[%s2524_s1 + $0x130] sm:$0xff] (!%p152_p3)   ;;  %v2028_v21 = vld [vmem:[%s2524_s1 + $0x138] sm:$0xff] (!%p152_p3)   ;;  %v2031_v32 = vld [vmem:[%s2524_s1 + $0x40] sm:$0xff] (!%p152_p3)  }
   0xd   : > { %1717 = vmatpush3.bf16.msra.mxu0 (!%p152_p3), %v2012_v5  ;;  %1873 = vmatpush3.bf16.msra.mxu1 (!%p152_p3), %v2011_v4  ;;  %v2026_v19 = vld [vmem:[%s2524_s1 + $0x170] sm:$0xff] (!%p152_p3)   ;;  %v2029_v24 = vld [vmem:[%s2524_s1 + $0x178] sm:$0xff] (!%p152_p3)   ;;  %v2032_v35 = vld [vmem:[%s2524_s1 + $0x80] sm:$0xff] (!%p152_p3)  }
   0xe   : > { %1718 = vmatprep.subr.bf16.mxu0 %v2013_v6  ;;  %1874 = vmatprep.subr.bf16.mxu1 %v2014_v7  ;;  %s2532_s12 = smov (!%p179_p4, %s2093_s12), 1  ;;  %v2027_v20 = vld [vmem:[%s2524_s1 + $0xf0] sm:$0xff]   ;;  %v2030_v28 = vld [vmem:[%s2524_s1 + $0xf8] sm:$0xff]   ;;  %v2033_v38 = vld [vmem:[%s2524_s1] sm:$0xff]  }
   0xf   : > { %s1982_s27 = smul.u32 240, %s2532_s12  ;;  %v2034_v40 = vld [vmem:[%s2524_s1 + $0x48] sm:$0xff]   ;;  %v2037_v47 = vld [vmem:[%s2524_s1 + $0x50] sm:$0xff]   ;;  %v2040_v51 = vld [vmem:[%s2524_s1 + $0x58] sm:$0xff]   ;;  %s1682_s4 = sshll.u32 %s2532_s12, 5 }
  0x10   : > { %v2035_v41 = vld [vmem:[%s2524_s1 + $0x88] sm:$0xff]   ;;  %v2038_v48 = vld [vmem:[%s2524_s1 + $0x90] sm:$0xff]   ;;  %v2041_v54 = vld [vmem:[%s2524_s1 + $0x98] sm:$0xff]   ;;  %s2506_s7 = scalar_lea.vmem %s2526_s3, %s1682_s4 }
  0x11   : > { %1719 = vmatpush3.bf16.msra.mxu0 %v2015_v8  ;;  %1875 = vmatpush3.bf16.msra.mxu1 %v2014_v7  ;;  %s2211_s9 = scalar_lea.vmem %s2523_s0, %s1982_s27  ;;  %v2036_v43 = vld [vmem:[%s2524_s1 + $0x8] sm:$0xff]   ;;  %v2039_v50 = vld [vmem:[%s2524_s1 + $0x10] sm:$0xff]   ;;  %v2042_v55 = vld [vmem:[%s2524_s1 + $0x18] sm:$0xff]  }
  0x12   : > { %1720 = vmatprep.subr.bf16.mxu0 %v2016_v9  ;;  %1876 = vmatprep.subr.bf16.mxu1 %v2017_v10  ;;  %v2220_v22 = vld [vmem:[%s2211_s9 + $0x20] sm:$0xff]  ;;  %v2223_v23 = vld [vmem:[%s2211_s9 + $0x38] sm:$0xff]  ;;  %v2231_v26 = vld [vmem:[%s2211_s9 + $0x28] sm:$0xff] }
  0x13   : > { %v316_v25 = vpack.c.bf16 %v2223_v23, %v2220_v22  ;;  %v2234_v27 = vld [vmem:[%s2211_s9 + $0x40] sm:$0xff]  ;;  %v2240_v29 = vld [vmem:[%s2211_s9 + $0x18] sm:$0xff]  ;;  %v2243_v30 = vld [vmem:[%s2211_s9 + $0x30] sm:$0xff] }
  0x14   : > { %v317_v31 = vpack.c.bf16 %v2234_v27, %v2231_v26  ;;  %v2251_v33 = vld [vmem:[%s2211_s9 + $0x58] sm:$0xff]  ;;  %v2254_v34 = vld [vmem:[%s2211_s9 + $0x70] sm:$0xff]  ;;  %v315_v36 = vpack.c.bf16 %v2243_v30, %v2240_v29  ;;  %v2276_v42 = vld [vmem:[%s2211_s9 + $0x68] sm:$0xff] }
  0x15   : > { %1721 = vmatpush3.bf16.msra.mxu0 %v2018_v11  ;;  %1877 = vmatpush3.bf16.msra.mxu1 %v2017_v10  ;;  %v320_v37 = vpack.c.bf16 %v2254_v34, %v2251_v33  ;;  %v2267_v39 = vld [vmem:[%s2211_s9 + $0x50] sm:$0xff]  ;;  %v2284_v45 = vld [vmem:[%s2211_s9 + $0x48] sm:$0xff]  ;;  %v2287_v46 = vld [vmem:[%s2211_s9 + $0x60] sm:$0xff] }
  0x16   : > { %1722 = vmatprep.subr.bf16.mxu0 %v2019_v12  ;;  %1878 = vmatprep.subr.bf16.mxu1 %v2020_v13  ;;  %v319_v44 = vpack.c.bf16 %v2276_v42, %v2267_v39  ;;  %v318_v49 = vpack.c.bf16 %v2287_v46, %v2284_v45  ;;  %v2304_v52 = vld [vmem:[%s2211_s9 + $0x80] sm:$0xff]  ;;  %v2307_v53 = vld [vmem:[%s2211_s9 + $0x98] sm:$0xff]  ;;  %v2321_v58 = vld [vmem:[%s2211_s9 + $0x90] sm:$0xff] }
  0x17   : > { %552 = vmatprep.mubr.bf16.mxu0 %v316_v25  ;;  %1886 = vmatprep.mubr.bf16.mxu1 %v317_v31  ;;  %v322_v56 = vpack.c.bf16 %v2307_v53, %v2304_v52  ;;  %v2318_v57 = vld [vmem:[%s2211_s9 + $0x78] sm:$0xff]  ;;  %v2043_v59 = vld [vmem:[%s2524_s1 + $0x60] sm:$0xff]   ;;  %v2335_v63 = vld [vmem:[%s2211_s9 + $0xb0] sm:$0xff] }
  0x18   : > { %v2044_v60 = vld [vmem:[%s2524_s1 + $0xa0] sm:$0xff]   ;;  %v321_v61 = vpack.c.bf16 %v2321_v58, %v2318_v57  ;;  %v2338_v0 = vld [vmem:[%s2211_s9 + $0xc8] sm:$0xff]  ;;  %v1475_v10 = vld [vmem:[%s2211_s9 + $0xb8] sm:$0xff] }
  0x19   : > { %1723 = vmatpush3.bf16.msra.mxu0 %v2021_v14  ;;  %1879 = vmatpush3.bf16.msra.mxu1 %v2020_v13  ;;  %v2045_v62 = vld [vmem:[%s2524_s1 + $0x20] sm:$0xff]   ;;  %v2046_v1 = vld [vmem:[%s2524_s1 + $0x68] sm:$0xff]   ;;  %v325_v6 = vpack.c.bf16 %v2338_v0, %v2335_v63  ;;  %v2364_v11 = vld [vmem:[%s2211_s9 + $0xd0] sm:$0xff] }
  0x1a   : > { %1724 = vmatprep.subr.bf16.mxu0 %v2022_v15  ;;  %1880 = vmatprep.subr.bf16.mxu1 %v2023_v16  ;;  %v2047_v2 = vld [vmem:[%s2524_s1 + $0xa8] sm:$0xff]   ;;  %v2348_v4 = vld [vmem:[%s2211_s9 + $0xa0] sm:$0xff]  ;;  %v2049_v12 = vld [vmem:[%s2524_s1 + $0x70] sm:$0xff]   ;;  %v326_v13 = vpack.c.bf16 %v2364_v11, %v1475_v10 }
  0x1b   : > { %v1469_v3 = vld [vmem:[%s2211_s9 + $0x88] sm:$0xff]  ;;  %v2360_v9 = vld [vmem:[%s2211_s9 + $0xc0] sm:$0xff]  ;;  %v2050_v14 = vld [vmem:[%s2524_s1 + $0xb0] sm:$0xff]  }
  0x1c   : > { %v2048_v5 = vld [vmem:[%s2524_s1 + $0x28] sm:$0xff]   ;;  %v323_v8 = vpack.c.bf16 %v2348_v4, %v1469_v3  ;;  %v2055_v31 = vld [vmem:[%s2524_s1 + $0x1c0] sm:$0xff]  }
  0x1d   : > { %1725 = vmatpush3.bf16.msra.mxu0 %v2024_v17  ;;  %1881 = vmatpush3.bf16.msra.mxu1 %v2023_v16  ;;  %v2356_v7 = vld [vmem:[%s2211_s9 + $0xa8] sm:$0xff]  ;;  %v2051_v16 = vld [vmem:[%s2524_s1 + $0x30] sm:$0xff]   ;;  %v2052_v17 = vld [vmem:[%s2524_s1 + $0x78] sm:$0xff]  }
  0x1e   : > { %1726 = vmatprep.subr.bf16.mxu0 %v2025_v18  ;;  %1882 = vmatprep.subr.bf16.mxu1 %v2026_v19  ;;  %v324_v15 = vpack.c.bf16 %v2360_v9, %v2356_v7  ;;  %v202_v18 = vld [vmem:[%s2211_s9 + $0x8] sm:$0xff] }
  0x1f   : > { %v226_v25 = vpack.c.bf16 %v2220_v22, %v202_v18  ;;  %v230_v22 = vpack.c.bf16 %v2251_v33, %v2234_v27  ;;  %v2415_v27 = vpack.c.bf16 %v1469_v3, %v2254_v34  ;;  %v2060_v33 = vld [vmem:[%s2524_s1 + $0x188] sm:$0xff]   ;;  %v228_v34 = vpack.c.bf16 %v2284_v45, %v2243_v30  ;;  %v2067_v45 = vld [vmem:[%s2524_s1 + $0x1e0] sm:$0xff]  }
  0x20   : > { %v232_v30 = vpack.c.bf16 %v2304_v52, %v2276_v42  ;;  %v231_v42 = vpack.c.bf16 %v2318_v57, %v2287_v46  ;;  %v235_v46 = vpack.c.bf16 %v2335_v63, %v2307_v53  ;;  %v234_v53 = vpack.c.bf16 %v2356_v7, %v2321_v58  ;;  %v2075_v57 = vld [vmem:[%s2524_s1 + $0x1b0] sm:$0xff]   ;;  %v2078_v58 = vld [vmem:[%s2524_s1 + $0x1b8] sm:$0xff]   ;;  %v1597_v63 = vld [vmem:[%s2211_s9 + $0xe0] sm:$0xff] }
  0x21   : > { %1727 = vmatpush3.bf16.msra.mxu0 %v2027_v20  ;;  %1883 = vmatpush3.bf16.msra.mxu1 %v2026_v19  ;;  %v203_v19 = vld [vmem:[%s2211_s9 + $0x10] sm:$0xff]  ;;  %v2053_v20 = vld [vmem:[%s2524_s1 + $0xb8] sm:$0xff]  }
  0x22   : > { %1728 = vmatprep.subr.bf16.mxu0 %v2028_v21  ;;  %1884 = vmatprep.subr.bf16.mxu1 %v2029_v24  ;;  %v227_v21 = vpack.c.bf16 %v2231_v26, %v203_v19  ;;  %v2056_v26 = vld [vmem:[%s2524_s1 + $0x200] sm:$0xff]  }
  0x25   : > { %1729 = vmatpush3.bf16.msra.mxu0 %v2030_v28  ;;  %1885 = vmatpush3.bf16.msra.mxu1 %v2029_v24  ;;  %v2054_v24 = vld [vmem:[%s2524_s1 + $0x38] sm:$0xff]   ;;  %v201_v28 = vld [vmem:[%s2211_s9] sm:$0xff] }
  0x26   : > { %1766 = vmatprep.subr.bf16.mxu0 %v2031_v32  ;;  %1894 = vmatprep.subr.bf16.mxu1 %v2032_v35  ;;  %v225_v32 = vpack.c.bf16 %v2240_v29, %v201_v28  ;;  %v2412_v29 = vpack.c.bf16 %v2267_v39, %v2223_v23  ;;  %v2062_v23 = vld [vmem:[%s2524_s1 + $0x210] sm:$0xff]  }
  0x27   : > { %v2063_v39 = vld [vmem:[%s2524_s1 + $0x190] sm:$0xff]  }
  0x28   : > { %553 = vmatmul.mubr.bf16.vlgmr.msra.gmra.mrb[0].mxu0 %v315_v36  ;;  %1887 = vmatmul.mubr.bf16.vlgmr.msra.gmra.mrb[0].mxu1 %v320_v37  ;;  %v2058_v36 = vld [vmem:[%s2524_s1 + $0x1c8] sm:$0xff]  }
  0x29   : > { %1767 = vmatpush3.bf16.msra.mxu0 %v2033_v38  ;;  %1895 = vmatpush3.bf16.msra.mxu1 %v2032_v35  ;;  %v2057_v35 = vld [vmem:[%s2524_s1 + $0x180] sm:$0xff]   ;;  %v2059_v37 = vld [vmem:[%s2524_s1 + $0x208] sm:$0xff]   ;;  %v2061_v38 = vld [vmem:[%s2524_s1 + $0x1d0] sm:$0xff]  }
  0x2a   : > { %1768 = vmatprep.subr.bf16.mxu0 %v2034_v40  ;;  %1896 = vmatprep.subr.bf16.mxu1 %v2035_v41  ;;  %v236_v40 = vpack.c.bf16 %v1475_v10, %v2348_v4 }
  0x2b   : > { %560 = vmatprep.mubr.bf16.mxu0 %v319_v44  ;;  %1890 = vmatprep.mubr.bf16.mxu1 %v323_v8  ;;  %v2066_v44 = vld [vmem:[%s2524_s1 + $0x198] sm:$0xff]  }
  0x2d   : > { %1769 = vmatpush3.bf16.msra.mxu0 %v2036_v43  ;;  %1897 = vmatpush3.bf16.msra.mxu1 %v2035_v41  ;;  %v2064_v41 = vld [vmem:[%s2524_s1 + $0x1d8] sm:$0xff]  }
  0x2e   : > { %1770 = vmatprep.subr.bf16.mxu0 %v2037_v47  ;;  %1898 = vmatprep.subr.bf16.mxu1 %v2038_v48  ;;  %v2065_v43 = vld [vmem:[%s2524_s1 + $0x218] sm:$0xff]   ;;  %v2068_v47 = vld [vmem:[%s2524_s1 + $0x220] sm:$0xff]  }
  0x30   : > { %561 = vmatmul.mubr.bf16.gmra.mrb[4].mxu0 %v318_v49  ;;  %1891 = vmatmul.mubr.bf16.gmra.mrb[4].mxu1 %v326_v13  ;;  %v2070_v49 = vld [vmem:[%s2524_s1 + $0x1e8] sm:$0xff]  }
  0x31   : > { %1771 = vmatpush3.bf16.msra.mxu0 %v2039_v50  ;;  %1899 = vmatpush3.bf16.msra.mxu1 %v2038_v48  ;;  %v2069_v48 = vld [vmem:[%s2524_s1 + $0x1a0] sm:$0xff]   ;;  %v2071_v50 = vld [vmem:[%s2524_s1 + $0x228] sm:$0xff]  }
  0x32   : > { %1772 = vmatprep.subr.bf16.mxu0 %v2040_v51  ;;  %1900 = vmatprep.subr.bf16.mxu1 %v2041_v54  ;;  %v1596_v51 = vld [vmem:[%s2211_s9 + $0xd8] sm:$0xff] }
  0x33   : > { %568 = vmatprep.mubr.bf16.mxu0 %v322_v56  ;;  %1910 = vmatprep.mubr.bf16.mxu1 %v227_v21  ;;  %v963_v52 = vpack.c.bf16 %v1596_v51, %v2360_v9  ;;  %v2074_v56 = vld [vmem:[%s2524_s1 + $0x230] sm:$0xff]  }
  0x35   : > { %1773 = vmatpush3.bf16.msra.mxu0 %v2042_v55  ;;  %1901 = vmatpush3.bf16.msra.mxu1 %v2041_v54  ;;  %v2072_v54 = vld [vmem:[%s2524_s1 + $0x1a8] sm:$0xff]   ;;  %v2073_v55 = vld [vmem:[%s2524_s1 + $0x1f0] sm:$0xff]  }
  0x36   : > { %1774 = vmatprep.subr.bf16.mxu0 %v2043_v59  ;;  %1902 = vmatprep.subr.bf16.mxu1 %v2044_v60  ;;  %v2076_v59 = vld [vmem:[%s2524_s1 + $0x1f8] sm:$0xff]  }
  0x38   : > { %569 = vmatmul.mubr.bf16.gmra.mrb[8].mxu0 %v321_v61  ;;  %v1598_v61 = vld [vmem:[%s2211_s9 + $0xe8] sm:$0xff] }
  0x39   : > { %1775 = vmatpush3.bf16.msra.mxu0 %v2045_v62  ;;  %1903 = vmatpush3.bf16.msra.mxu1 %v2044_v60  ;;  %v2077_v60 = vld [vmem:[%s2524_s1 + $0x238] sm:$0xff]   ;;  %v965_v62 = vpack.c.bf16 %v1598_v61, %v2364_v11 }
  0x3a   : > { %1776 = vmatprep.subr.bf16.mxu0 %v2046_v1  ;;  %1904 = vmatprep.subr.bf16.mxu1 %v2047_v2  ;;  %v964_v1 = vpack.c.bf16 %v1597_v63, %v2338_v0 }
  0x3b   : > { %576 = vmatprep.mubr.bf16.mxu0 %v325_v6 }
  0x3d   : > { %1777 = vmatpush3.bf16.msra.mxu0 %v2048_v5  ;;  %1905 = vmatpush3.bf16.msra.mxu1 %v2047_v2 }
  0x3e   : > { %1778 = vmatprep.subr.bf16.mxu0 %v2049_v12  ;;  %1906 = vmatprep.subr.bf16.mxu1 %v2050_v14 }
  0x40   : > { %577 = vmatmul.mubr.bf16.gmra.mrb[12].mxu0 %v324_v15 }
  0x41   : > { %1779 = vmatpush3.bf16.msra.mxu0 %v2051_v16  ;;  %1907 = vmatpush3.bf16.msra.mxu1 %v2050_v14 }
  0x42   : > { %1780 = vmatprep.subr.bf16.mxu0 %v2052_v17  ;;  %1908 = vmatprep.subr.bf16.mxu1 %v2053_v20 }
  0x43   : > { %826 = vmatprep.mubr.bf16.mxu0 %v226_v25 }
  0x45   : > { %1781 = vmatpush3.bf16.msra.mxu0 %v2054_v24  ;;  %1909 = vmatpush3.bf16.msra.mxu1 %v2053_v20 }
  0x46   : > { %1818 = vmatprep.subr.bf16.mxu0 %v2055_v31  ;;  %1918 = vmatprep.subr.bf16.mxu1 %v2056_v26 }
  0x48   : > { %827 = vmatmul.mubr.bf16.vlgmr.msra.gmra.mrb[16].mxu0 %v225_v32  ;;  %1911 = vmatmul.mubr.bf16.vlgmr.msra.gmra.mrb[0].mxu1 %v230_v22 }
  0x49   : > { %1819 = vmatpush3.bf16.msra.mxu0 %v2057_v35  ;;  %1919 = vmatpush3.bf16.msra.mxu1 %v2056_v26 }
  0x4a   : > { %1820 = vmatprep.subr.bf16.mxu0 %v2058_v36  ;;  %1920 = vmatprep.subr.bf16.mxu1 %v2059_v37 }
  0x4b   : > { %834 = vmatprep.mubr.bf16.mxu0 %v2412_v29  ;;  %1914 = vmatprep.mubr.bf16.mxu1 %v2415_v27 }
  0x4d   : > { %1821 = vmatpush3.bf16.msra.mxu0 %v2060_v33  ;;  %1921 = vmatpush3.bf16.msra.mxu1 %v2059_v37 }
  0x4e   : > { %1822 = vmatprep.subr.bf16.mxu0 %v2061_v38  ;;  %1922 = vmatprep.subr.bf16.mxu1 %v2062_v23 }
  0x50   : > { %835 = vmatmul.mubr.bf16.gmra.mrb[20].mxu0 %v228_v34  ;;  %1915 = vmatmul.mubr.bf16.gmra.mrb[4].mxu1 %v236_v40 }
  0x51   : > { %1823 = vmatpush3.bf16.msra.mxu0 %v2063_v39  ;;  %1923 = vmatpush3.bf16.msra.mxu1 %v2062_v23 }
  0x52   : > { %1824 = vmatprep.subr.bf16.mxu0 %v2064_v41  ;;  %1924 = vmatprep.subr.bf16.mxu1 %v2065_v43 }
  0x53   : > { %842 = vmatprep.mubr.bf16.mxu0 %v232_v30  ;;  %1934 = vmatprep.mubr.bf16.mxu1 %v230_v22 }
  0x55   : > { %1825 = vmatpush3.bf16.msra.mxu0 %v2066_v44  ;;  %1925 = vmatpush3.bf16.msra.mxu1 %v2065_v43 }
  0x56   : > { %1826 = vmatprep.subr.bf16.mxu0 %v2067_v45  ;;  %1926 = vmatprep.subr.bf16.mxu1 %v2068_v47 }
  0x58   : > { %843 = vmatmul.mubr.bf16.gmra.mrb[24].mxu0 %v231_v42 }
  0x59   : > { %1827 = vmatpush3.bf16.msra.mxu0 %v2069_v48  ;;  %1927 = vmatpush3.bf16.msra.mxu1 %v2068_v47 }
  0x5a   : > { %1828 = vmatprep.subr.bf16.mxu0 %v2070_v49  ;;  %1928 = vmatprep.subr.bf16.mxu1 %v2071_v50 }
  0x5b   : > { %850 = vmatprep.mubr.bf16.mxu0 %v235_v46 }
  0x5d   : > { %1829 = vmatpush3.bf16.msra.mxu0 %v2072_v54  ;;  %1929 = vmatpush3.bf16.msra.mxu1 %v2071_v50 }
  0x5e   : > { %1830 = vmatprep.subr.bf16.mxu0 %v2073_v55  ;;  %1930 = vmatprep.subr.bf16.mxu1 %v2074_v56 }
  0x60   : > { %851 = vmatmul.mubr.bf16.gmra.mrb[28].mxu0 %v234_v53 }
  0x61   : > { %1831 = vmatpush3.bf16.msra.mxu0 %v2075_v57  ;;  %1931 = vmatpush3.bf16.msra.mxu1 %v2074_v56 }
  0x62   : > { %1832 = vmatprep.subr.bf16.mxu0 %v2076_v59  ;;  %1932 = vmatprep.subr.bf16.mxu1 %v2077_v60 }
  0x63   : > { %1191 = vmatprep.mubr.bf16.mxu0 %v2412_v29 }
  0x65   : > { %1833 = vmatpush3.bf16.msra.mxu0 %v2078_v58  ;;  %1933 = vmatpush3.bf16.msra.mxu1 %v2077_v60 }
  0x68   : > { %1192 = vmatmul.mubr.bf16.vlgmr.msra.gmra.mrb[32].mxu0 %v228_v34  ;;  %1935 = vmatmul.mubr.bf16.vlgmr.msra.gmra.mrb[0].mxu1 %v2415_v27 }
  0x69   : > { %1199 = vmatprep.mubr.bf16.mxu0 %v232_v30  ;;  %1938 = vmatprep.mubr.bf16.mxu1 %v236_v40 }
  0x70   : > { %1200 = vmatmul.mubr.bf16.gmra.mrb[36].mxu0 %v231_v42  ;;  %1939 = vmatmul.mubr.bf16.gmra.mrb[4].mxu1 %v965_v62 }
  0x71   : > { %1207 = vmatprep.mubr.bf16.mxu0 %v235_v46 }
  0x78   : > { %1208 = vmatmul.mubr.bf16.gmra.mrb[40].mxu0 %v234_v53 }
  0x79   : > { %1215 = vmatprep.mubr.bf16.mxu0 %v964_v1 }
  0x80   : > { %1216 = vmatmul.mubr.bf16.gmra.mrb[44].mxu0 %v963_v52 }
  0xfb   : > { %v1730_v2 = vpop.f32.mrb[0].mxu0 }
  0xfc   : > { %v1731_v3 = vpop.f32.mrb[1].mxu0 }
  0xfd   : > { %v1732_v4 = vadd.f32 %v1731_v3, %v1730_v2  ;;  %v1733_v5 = vpop.f32.mrb[2].mxu0 }
  0xfe   : > { %v1734_v6 = vpop.f32.mrb[3].mxu0 }
  0xff   : > { %v1735_v7 = vadd.f32 %v1734_v6, %v1733_v5  ;;  %v1671_v5 = vld [vmem:[%s2525_s2] ss:$0 sm:$0xff] }
 0x103   : > { %v1736_v8 = vpop.f32.mrb[4].mxu0 }
 0x104   : > { %v1737_v9 = vpop.f32.mrb[5].mxu0 }
 0x105   : > { %v1738_v10 = vadd.f32 %v1737_v9, %v1736_v8  ;;  %v1739_v12 = vpop.f32.mrb[6].mxu0 }
 0x106   : > { %v1740_v11 = vpop.f32.mrb[7].mxu0 }
 0x107   : > { %v1741_v13 = vadd.f32 %v1740_v11, %v1739_v12 }
 0x10b   : > { %v1742_v14 = vpop.f32.mrb[8].mxu0 }
 0x10c   : > { %v1743_v15 = vpop.f32.mrb[9].mxu0 }
 0x10d   : > { %v1744_v16 = vadd.f32 %v1743_v15, %v1742_v14  ;;  %v1745_v17 = vpop.f32.mrb[10].mxu0 }
 0x10e   : > { %v1746_v0 = vpop.f32.mrb[11].mxu0 }
 0x10f   : > { %v1747_v18 = vadd.f32 %v1746_v0, %v1745_v17 }
 0x113   : > { %v1748_v19 = vpop.f32.mrb[12].mxu0 }
 0x114   : > { %v1749_v20 = vpop.f32.mrb[13].mxu0 }
 0x115   : > { %v1750_v21 = vadd.f32 %v1749_v20, %v1748_v19  ;;  %v1751_v24 = vpop.f32.mrb[14].mxu0 }
 0x116   : > { %v1752_v25 = vpop.f32.mrb[15].mxu0 }
 0x117   : > { %v1753_v28 = vadd.f32 %v1752_v25, %v1751_v24 }
 0x11b   : > { %v1782_v31 = vpop.f32.mrb[16].mxu0 }
 0x11c   : > { %v1783_v26 = vpop.f32.mrb[17].mxu0 }
 0x11d   : > { %v1784_v32 = vadd.f32 %v1783_v26, %v1782_v31  ;;  %v1785_v22 = vpop.f32.mrb[18].mxu0 }
 0x11e   : > { %v1786_v35 = vpop.f32.mrb[19].mxu0 }
 0x11f   : > { %v1945_v36 = vadd.f32 %v1784_v32, %v1732_v4  ;;  %v1787_v37 = vadd.f32 %v1786_v35, %v1785_v22 }
 0x121   : > { %v1951_v29 = vadd.f32 %v1787_v37, %v1735_v7 }
 0x123   : > { %v1788_v27 = vpop.f32.mrb[20].mxu0 }
 0x124   : > { %v1789_v33 = vpop.f32.mrb[21].mxu0 }
 0x125   : > { %v1790_v38 = vadd.f32 %v1789_v33, %v1788_v27  ;;  %v1791_v23 = vpop.f32.mrb[22].mxu0 }
 0x126   : > { %v1792_v34 = vpop.f32.mrb[23].mxu0 }
 0x127   : > { %v1942_v39 = vadd.f32 %v1790_v38, %v1738_v10  ;;  %v1793_v40 = vadd.f32 %v1792_v34, %v1791_v23 }
 0x129   : > { %v1948_v41 = vadd.f32 %v1793_v40, %v1741_v13 }
 0x12b   : > { %v1794_v43 = vpop.f32.mrb[24].mxu0 }
 0x12c   : > { %v1795_v30 = vpop.f32.mrb[25].mxu0 }
 0x12d   : > { %v1796_v44 = vadd.f32 %v1795_v30, %v1794_v43  ;;  %v1797_v45 = vpop.f32.mrb[26].mxu0 }
 0x12e   : > { %v1798_v47 = vpop.f32.mrb[27].mxu0 }
 0x12f   : > { %v1957_v42 = vadd.f32 %v1796_v44, %v1744_v16  ;;  %v1799_v48 = vadd.f32 %v1798_v47, %v1797_v45 }
 0x131   : > { %v1963_v49 = vadd.f32 %v1799_v48, %v1747_v18 }
 0x133   : > { %v1800_v50 = vpop.f32.mrb[28].mxu0 }
 0x134   : > { %v1801_v51 = vpop.f32.mrb[29].mxu0 }
 0x135   : > { %v1802_v46 = vadd.f32 %v1801_v51, %v1800_v50  ;;  %v1803_v52 = vpop.f32.mrb[30].mxu0 }
 0x136   : > { %v1804_v54 = vpop.f32.mrb[31].mxu0 }
 0x137   : > { %v2495_v55 = vadd.f32 %v1802_v46, %v1750_v21  ;;  %v1805_v56 = vadd.f32 %v1804_v54, %v1803_v52 }
 0x139   : > { %v2497_v53 = vadd.f32 %v1805_v56, %v1753_v28 }
 0x13b   : > { %v1834_v57 = vpop.f32.mrb[32].mxu0  ;;  %v1936_v59 = vpop.f32.mrb[0].mxu1 }
 0x13c   : > { %v1835_v60 = vpop.f32.mrb[33].mxu0  ;;  %v1258_v58 = vpop.f32.mrb[1].mxu1 }
 0x13d   : > { %v1836_v61 = vadd.f32 %v1835_v60, %v1834_v57  ;;  %v1837_v62 = vpop.f32.mrb[34].mxu0  ;;  %v1937_v63 = vpop.f32.mrb[2].mxu1 }
 0x13e   : > { %v1838_v1 = vpop.f32.mrb[35].mxu0  ;;  %v1261_v2 = vpop.f32.mrb[3].mxu1 }
 0x13f   : > { %v1946_v3 = vadd.f32 %v1945_v36, %v1836_v61  ;;  %v1839_v4 = vadd.f32 %v1838_v1, %v1837_v62 }
 0x141   : > { %v1947_v6 = vadd.f32 %v1946_v3, %v1258_v58  ;;  %v1952_v7 = vadd.f32 %v1951_v29, %v1839_v4 }
 0x143   : > { %v1304_v8 = vadd.f32 %v1947_v6, %v1671_v5  ;;  %v1953_v9 = vadd.f32 %v1952_v7, %v1261_v2  ;;  %v1840_v10 = vpop.f32.mrb[36].mxu0  ;;  %v1940_v12 = vpop.f32.mrb[4].mxu1 }
 0x144   : > { %v1841_v11 = vpop.f32.mrb[37].mxu0  ;;  %v1274_v13 = vpop.f32.mrb[5].mxu1 }
 0x145   : > { %v1305_v14 = vadd.f32 %v1953_v9, %v1671_v5  ;;  %v1842_v15 = vadd.f32 %v1841_v11, %v1840_v10  ;;  %v1843_v16 = vpop.f32.mrb[38].mxu0  ;;  %v1941_v17 = vpop.f32.mrb[6].mxu1  ;;  %v1312_v19 = vmax.f32 %v1304_v8, 0.0 }
 0x146   : > { %v1844_v0 = vpop.f32.mrb[39].mxu0  ;;  %v1277_v18 = vpop.f32.mrb[7].mxu1 }
 0x147   : > { %v1313_v20 = vmax.f32 %v1305_v14, 0.0  ;;  %v1943_v21 = vadd.f32 %v1942_v39, %v1842_v15  ;;  %v1845_v24 = vadd.f32 %v1844_v0, %v1843_v16 }
 0x149   : > { %v1694_v25 = vpack.c.bf16 %v1313_v20, %v1312_v19  ;;  %v1944_v28 = vadd.f32 %v1943_v21, %v1936_v59  ;;  %v1949_v31 = vadd.f32 %v1948_v41, %v1845_v24 }
 0x14b   : > { %1695 = vst [vmem:[%s2506_s7] sm:$0xff] %v1694_v25   ;;  %v1306_v26 = vadd.f32 %v1944_v28, %v1671_v5  ;;  %v1950_v32 = vadd.f32 %v1949_v31, %v1937_v63  ;;  %v1846_v22 = vpop.f32.mrb[40].mxu0 }
 0x14c   : > { %v1847_v35 = vpop.f32.mrb[41].mxu0 }
 0x14d   : > { %v1307_v36 = vadd.f32 %v1950_v32, %v1671_v5  ;;  %v1848_v37 = vadd.f32 %v1847_v35, %v1846_v22  ;;  %v1849_v29 = vpop.f32.mrb[42].mxu0  ;;  %v1314_v33 = vmax.f32 %v1306_v26, 0.0 }
 0x14e   : > { %v1850_v27 = vpop.f32.mrb[43].mxu0 }
 0x14f   : > { %v1315_v38 = vmax.f32 %v1307_v36, 0.0  ;;  %v1958_v23 = vadd.f32 %v1957_v42, %v1848_v37  ;;  %v1851_v34 = vadd.f32 %v1850_v27, %v1849_v29 }
 0x151   : > { %v1699_v39 = vpack.c.bf16 %v1315_v38, %v1314_v33  ;;  %v1959_v40 = vadd.f32 %v1958_v23, %v1274_v13  ;;  %v1964_v43 = vadd.f32 %v1963_v49, %v1851_v34 }
 0x153   : > { %1711 = vst [vmem:[%s2506_s7 + $0x8] sm:$0xff] %v1699_v39   ;;  %v1308_v41 = vadd.f32 %v1959_v40, %v1671_v5  ;;  %v1965_v30 = vadd.f32 %v1964_v43, %v1277_v18  ;;  %v1852_v44 = vpop.f32.mrb[44].mxu0 }
 0x154   : > { %v1853_v45 = vpop.f32.mrb[45].mxu0 }
 0x155   : > { %v1309_v47 = vadd.f32 %v1965_v30, %v1671_v5  ;;  %v1854_v48 = vadd.f32 %v1853_v45, %v1852_v44  ;;  %v1855_v50 = vpop.f32.mrb[46].mxu0  ;;  %v1316_v46 = vmax.f32 %v1308_v41, 0.0 }
 0x156   : > { %v1856_v51 = vpop.f32.mrb[47].mxu0 }
 0x157   : > { %v1317_v52 = vmax.f32 %v1309_v47, 0.0  ;;  %v1955_v54 = vadd.f32 %v2495_v55, %v1854_v48  ;;  %v1857_v42 = vadd.f32 %v1856_v51, %v1855_v50 }
 0x159   : > { %v1704_v56 = vpack.c.bf16 %v1317_v52, %v1316_v46  ;;  %v1956_v57 = vadd.f32 %v1955_v54, %v1940_v12  ;;  %v1961_v49 = vadd.f32 %v2497_v53, %v1857_v42 }
 0x15b   : > { %1712 = vst [vmem:[%s2506_s7 + $0x10] sm:$0xff] %v1704_v56   ;;  %v1310_v59 = vadd.f32 %v1956_v57, %v1671_v5  ;;  %v1962_v60 = vadd.f32 %v1961_v49, %v1941_v17 }
 0x15d   : > { %v1311_v58 = vadd.f32 %v1962_v60, %v1671_v5  ;;  %v1318_v61 = vmax.f32 %v1310_v59, 0.0 }
 0x15f   : > { %v1319_v62 = vmax.f32 %v1311_v58, 0.0 }
 0x161   : > { %v1709_v63 = vpack.c.bf16 %v1319_v62, %v1318_v61 }
 0x163   : > { %1713 = vst [vmem:[%s2506_s7 + $0x18] sm:$0xff] %v1709_v63  }
 0x164 PF: > { %s13_s14 = sadd.s32 1, %s2101_s14   ;;  %s2527_s12 = smov %s2097_s13 }
 0x165   : > { %p10_p5 = scmp.ge.s32.totalorder %s13_s14, 4   ;;  %s2528_s13 = smov %s2530_s15 }
 0x167   :  { %12 = sbr.rel (!%p10_p5) target bundleno = 2 (0x2), region = 67 }

// kernel: _lambda_.9
= control target key start
LH: loop header
LB: loop body
LE: loop exit
PB: predicated region body
PF: predicated region fallthrough
CT: control target
= control target key end

     0   :  { %9 = vsyncpa [#allocation3], 0  ;;  %s2788_s0 = inlined_call_operand.vmem [shape: f32[1,2,80,384], index: 0, kind: input, shape index: {}]   ;;  %s2789_s1 = inlined_call_operand.vmem [shape: bf16[3,384,128], index: 1, kind: input, shape index: {}]   ;;  %s2790_s2 = inlined_call_operand.vmem [shape: f32[1,128], index: 2, kind: input, shape index: {}]   ;;  %s2791_s3 = inlined_call_operand.vmem [shape: bf16[2,64,128], index: 3, kind: input, shape index: {}]   ;;  %s2792_s4 = inlined_call_operand.hbm [shape: f32[2,64,128], index: 4, kind: output, shape index: {}]  }
   0x1   :  { %11 = vsyncpa [#allocation3 + $0x1], 0  ;;  %s2276_s15 = smov 0   ;;  %s2278_s16 = smov 0  }
   0x2   :  { %s2280_s17 = smov 0   ;;  %s2282_s18 = smov 0  }
   0x3   :  { %s2284_s19 = smov 0   ;;  %s2286_s20 = smov 0  }
   0x4 LB: > { %s1518_s21 = sadd.s32 4294967295, %s2246_s20   ;;  %s1519_s22 = sadd.s32 4294967294, %s2246_s20   ;;  %s2246_s20 = sphi %s2286_s20, %s17_s20   ;;  %s2242_s19 = sphi %s2284_s19, %s2799_s19   ;;  %s2238_s18 = sphi %s2282_s18, %s2798_s18   ;;  %s2234_s17 = sphi %s2280_s17, %s2797_s17   ;;  %s2230_s16 = sphi %s2278_s16, %s2796_s16   ;;  %s2226_s15 = sphi %s2276_s15, %s2795_s15  }
   0x5   : > { %s29_s23 = sadd.s32 1, %s2242_s19  ;;  %s134_s24 = sadd.s32 1, %s2234_s17 }
   0x6   : > { %p31_p0 = scmp.ge.s32.totalorder %s29_s23, 2  ;;  %p144_p1 = scmp.ne.s32.totalorder %s2234_s17, %s2230_s16 }
   0x7   : > { %p145_p2 = scmp.eq.s32.totalorder %s1518_s21, 1  ;;  %p150_p3 = scmp.ne.s32.totalorder %s2230_s16, %s2226_s15 }
   0x8   : > { %s2801_s23 = smov (%p31_p0, %s29_s23), 0  ;;  %p151_p5 = scmp.eq.s32.totalorder %s1519_s22, 1 }
   0x9   : > { %p2316_p4 = por %p145_p2, %p144_p1  ;;  %s129_s26 = ssub.s32 %s2242_s19, %s2801_s23 }
   0xa   : > { %p1522_p6 = scmp.ge.s32.totalorder %s2246_s20, 1  ;;  %p132_p7 = scmp.eq.s32.totalorder %s129_s26, 0 }
   0xb   : > { %p2323_p8 = por %p151_p5, %p150_p3  ;;  %p196_p9 = scmp.lt.s32.totalorder %s2246_s20, 3 }
   0xc   : > { %s2329_s28 = scalar_select %p132_p7, %s2234_s17, %s134_s24  }
   0xd   : > { %p197_p10 = pnand %p1522_p6, %p196_p9 }
   0xe   : > { %v2096_v0 = vld [vmem:[%s2789_s1 + $0x100] sm:$0xff] (!%p197_p10)   ;;  %v2099_v3 = vld [vmem:[%s2789_s1 + $0x108] sm:$0xff] (!%p197_p10)   ;;  %v2102_v6 = vld [vmem:[%s2789_s1 + $0x110] sm:$0xff] (!%p197_p10)   ;;  %p231_p11 = scmp.lt.s32.totalorder (!%p197_p10), %s2238_s18, 1  ;;  %s1750_s14 = sshll.u32 (!%p197_p10), %s2238_s18, 10 }
   0xf   : > { %200 = sbr.rel (%p197_p10) target bundleno = 378 (0x17a), region = 36  ;;  %v2097_v1 = vld [vmem:[%s2789_s1 + $0x140] sm:$0xff] (!%p197_p10)   ;;  %1770 = vmatprep.subr.bf16.mxu0 (!%p197_p10), %v2096_v0  ;;  %v2100_v4 = vld [vmem:[%s2789_s1 + $0x148] sm:$0xff] (!%p197_p10)   ;;  %v2103_v7 = vld [vmem:[%s2789_s1 + $0x150] sm:$0xff] (!%p197_p10)   ;;  %s2734_s30 = scalar_lea.hbm (!%p197_p10), %s2792_s4, %s1750_s14 }
  0x10   : > { %v2098_v2 = vld [vmem:[%s2789_s1 + $0xc0] sm:$0xff] (!%p197_p10)   ;;  %1926 = vmatprep.subr.bf16.mxu1 (!%p197_p10), %v2097_v1  ;;  %v2101_v5 = vld [vmem:[%s2789_s1 + $0xc8] sm:$0xff] (!%p197_p10)   ;;  %v2104_v8 = vld [vmem:[%s2789_s1 + $0xd0] sm:$0xff] (!%p197_p10)  }
  0x11   : > { %1771 = vmatpush3.bf16.msra.mxu0 (!%p197_p10), %v2098_v2  ;;  %1927 = vmatpush3.bf16.msra.mxu1 (!%p197_p10), %v2097_v1  ;;  %v2105_v9 = vld [vmem:[%s2789_s1 + $0x118] sm:$0xff] (!%p197_p10)   ;;  %v2108_v12 = vld [vmem:[%s2789_s1 + $0x120] sm:$0xff] (!%p197_p10)   ;;  %v2111_v15 = vld [vmem:[%s2789_s1 + $0x128] sm:$0xff] (!%p197_p10)  }
  0x12   : > { %1772 = vmatprep.subr.bf16.mxu0 (!%p197_p10), %v2099_v3  ;;  %1928 = vmatprep.subr.bf16.mxu1 (!%p197_p10), %v2100_v4  ;;  %v2106_v10 = vld [vmem:[%s2789_s1 + $0x158] sm:$0xff] (!%p197_p10)   ;;  %v2109_v13 = vld [vmem:[%s2789_s1 + $0x160] sm:$0xff] (!%p197_p10)   ;;  %v2112_v16 = vld [vmem:[%s2789_s1 + $0x168] sm:$0xff] (!%p197_p10)  }
  0x13   : > { %v2107_v11 = vld [vmem:[%s2789_s1 + $0xd8] sm:$0xff] (!%p197_p10)   ;;  %v2110_v14 = vld [vmem:[%s2789_s1 + $0xe0] sm:$0xff] (!%p197_p10)   ;;  %v2113_v17 = vld [vmem:[%s2789_s1 + $0xe8] sm:$0xff] (!%p197_p10)  }
  0x14   : > { %v2114_v18 = vld [vmem:[%s2789_s1 + $0x130] sm:$0xff] (!%p197_p10)   ;;  %v2117_v21 = vld [vmem:[%s2789_s1 + $0x138] sm:$0xff] (!%p197_p10)   ;;  %v2120_v32 = vld [vmem:[%s2789_s1 + $0x40] sm:$0xff] (!%p197_p10)  }
  0x15   : > { %1773 = vmatpush3.bf16.msra.mxu0 (!%p197_p10), %v2101_v5  ;;  %1929 = vmatpush3.bf16.msra.mxu1 (!%p197_p10), %v2100_v4  ;;  %v2115_v19 = vld [vmem:[%s2789_s1 + $0x170] sm:$0xff] (!%p197_p10)   ;;  %v2118_v24 = vld [vmem:[%s2789_s1 + $0x178] sm:$0xff] (!%p197_p10)   ;;  %v2121_v35 = vld [vmem:[%s2789_s1 + $0x80] sm:$0xff] (!%p197_p10)  }
  0x16   : > { %1774 = vmatprep.subr.bf16.mxu0 %v2102_v6  ;;  %1930 = vmatprep.subr.bf16.mxu1 %v2103_v7  ;;  %s2375_s21 = scalar_select %p231_p11, %s2238_s18, 1  ;;  %v2116_v20 = vld [vmem:[%s2789_s1 + $0xf0] sm:$0xff]   ;;  %v2119_v28 = vld [vmem:[%s2789_s1 + $0xf8] sm:$0xff]   ;;  %v2122_v38 = vld [vmem:[%s2789_s1] sm:$0xff]  }
  0x17   : > { %v2123_v40 = vld [vmem:[%s2789_s1 + $0x48] sm:$0xff]   ;;  %v2126_v47 = vld [vmem:[%s2789_s1 + $0x50] sm:$0xff]   ;;  %v2129_v51 = vld [vmem:[%s2789_s1 + $0x58] sm:$0xff]  }
  0x18   : > { %s2038_s6 = smul.u32 240, %s2375_s21  ;;  %v2124_v41 = vld [vmem:[%s2789_s1 + $0x88] sm:$0xff]   ;;  %v2127_v48 = vld [vmem:[%s2789_s1 + $0x90] sm:$0xff]   ;;  %v2130_v54 = vld [vmem:[%s2789_s1 + $0x98] sm:$0xff]  }
  0x19   : > { %1775 = vmatpush3.bf16.msra.mxu0 %v2104_v8  ;;  %1931 = vmatpush3.bf16.msra.mxu1 %v2103_v7  ;;  %v2125_v43 = vld [vmem:[%s2789_s1 + $0x8] sm:$0xff]   ;;  %v2128_v50 = vld [vmem:[%s2789_s1 + $0x10] sm:$0xff]   ;;  %v2131_v55 = vld [vmem:[%s2789_s1 + $0x18] sm:$0xff]  }
  0x1a   : > { %1776 = vmatprep.subr.bf16.mxu0 %v2105_v9  ;;  %1932 = vmatprep.subr.bf16.mxu1 %v2106_v10  ;;  %s2399_s22 = scalar_lea.vmem %s2788_s0, %s2038_s6  ;;  %v2132_v59 = vld [vmem:[%s2789_s1 + $0x60] sm:$0xff]   ;;  %v2135_v1 = vld [vmem:[%s2789_s1 + $0x68] sm:$0xff]   ;;  %s2248_s6 = smov [#allocation2]  }
  0x1b   : > { %v2408_v22 = vld [vmem:[%s2399_s22 + $0x20] sm:$0xff]  ;;  %v2411_v23 = vld [vmem:[%s2399_s22 + $0x38] sm:$0xff]  ;;  %v2419_v26 = vld [vmem:[%s2399_s22 + $0x28] sm:$0xff] }
  0x1c   : > { %v369_v25 = vpack.c.bf16 %v2411_v23, %v2408_v22  ;;  %v2422_v27 = vld [vmem:[%s2399_s22 + $0x40] sm:$0xff]  ;;  %v2428_v29 = vld [vmem:[%s2399_s22 + $0x18] sm:$0xff]  ;;  %v2431_v30 = vld [vmem:[%s2399_s22 + $0x30] sm:$0xff] }
  0x1d   : > { %1777 = vmatpush3.bf16.msra.mxu0 %v2107_v11  ;;  %1933 = vmatpush3.bf16.msra.mxu1 %v2106_v10  ;;  %v370_v31 = vpack.c.bf16 %v2422_v27, %v2419_v26  ;;  %v2439_v33 = vld [vmem:[%s2399_s22 + $0x58] sm:$0xff]  ;;  %v2442_v34 = vld [vmem:[%s2399_s22 + $0x70] sm:$0xff]  ;;  %v368_v36 = vpack.c.bf16 %v2431_v30, %v2428_v29  ;;  %v2464_v42 = vld [vmem:[%s2399_s22 + $0x68] sm:$0xff] }
  0x1e   : > { %1778 = vmatprep.subr.bf16.mxu0 %v2108_v12  ;;  %1934 = vmatprep.subr.bf16.mxu1 %v2109_v13  ;;  %v373_v37 = vpack.c.bf16 %v2442_v34, %v2439_v33  ;;  %v2455_v39 = vld [vmem:[%s2399_s22 + $0x50] sm:$0xff]  ;;  %v2472_v45 = vld [vmem:[%s2399_s22 + $0x48] sm:$0xff]  ;;  %v2475_v46 = vld [vmem:[%s2399_s22 + $0x60] sm:$0xff] }
  0x1f   : > { %605 = vmatprep.mubr.bf16.mxu0 %v369_v25  ;;  %1942 = vmatprep.mubr.bf16.mxu1 %v370_v31  ;;  %v372_v44 = vpack.c.bf16 %v2464_v42, %v2455_v39  ;;  %v371_v49 = vpack.c.bf16 %v2475_v46, %v2472_v45  ;;  %v2492_v52 = vld [vmem:[%s2399_s22 + $0x80] sm:$0xff]  ;;  %v2495_v53 = vld [vmem:[%s2399_s22 + $0x98] sm:$0xff]  ;;  %v2509_v58 = vld [vmem:[%s2399_s22 + $0x90] sm:$0xff] }
  0x20   : > { %v375_v56 = vpack.c.bf16 %v2495_v53, %v2492_v52  ;;  %v2506_v57 = vld [vmem:[%s2399_s22 + $0x78] sm:$0xff]  ;;  %v2133_v60 = vld [vmem:[%s2789_s1 + $0xa0] sm:$0xff]   ;;  %v2523_v63 = vld [vmem:[%s2399_s22 + $0xb0] sm:$0xff] }
  0x21   : > { %1779 = vmatpush3.bf16.msra.mxu0 %v2110_v14  ;;  %1935 = vmatpush3.bf16.msra.mxu1 %v2109_v13  ;;  %v374_v61 = vpack.c.bf16 %v2509_v58, %v2506_v57  ;;  %v2134_v62 = vld [vmem:[%s2789_s1 + $0x20] sm:$0xff]   ;;  %v2526_v0 = vld [vmem:[%s2399_s22 + $0xc8] sm:$0xff]  ;;  %v1547_v10 = vld [vmem:[%s2399_s22 + $0xb8] sm:$0xff] }
  0x22   : > { %1780 = vmatprep.subr.bf16.mxu0 %v2111_v15  ;;  %1936 = vmatprep.subr.bf16.mxu1 %v2112_v16  ;;  %v2136_v2 = vld [vmem:[%s2789_s1 + $0xa8] sm:$0xff]   ;;  %v2536_v4 = vld [vmem:[%s2399_s22 + $0xa0] sm:$0xff]  ;;  %v378_v6 = vpack.c.bf16 %v2526_v0, %v2523_v63  ;;  %v2552_v11 = vld [vmem:[%s2399_s22 + $0xd0] sm:$0xff] }
  0x23   : > { %v1541_v3 = vld [vmem:[%s2399_s22 + $0x88] sm:$0xff]  ;;  %v2548_v9 = vld [vmem:[%s2399_s22 + $0xc0] sm:$0xff]  ;;  %v2138_v12 = vld [vmem:[%s2789_s1 + $0x70] sm:$0xff]   ;;  %v379_v13 = vpack.c.bf16 %v2552_v11, %v1547_v10 }
  0x24   : > { %v2137_v5 = vld [vmem:[%s2789_s1 + $0x28] sm:$0xff]   ;;  %v376_v8 = vpack.c.bf16 %v2536_v4, %v1541_v3  ;;  %v2139_v14 = vld [vmem:[%s2789_s1 + $0xb0] sm:$0xff]   ;;  %v2144_v31 = vld [vmem:[%s2789_s1 + $0x1c0] sm:$0xff]  }
  0x25   : > { %1781 = vmatpush3.bf16.msra.mxu0 %v2113_v17  ;;  %1937 = vmatpush3.bf16.msra.mxu1 %v2112_v16  ;;  %v2544_v7 = vld [vmem:[%s2399_s22 + $0xa8] sm:$0xff]  ;;  %v2140_v16 = vld [vmem:[%s2789_s1 + $0x30] sm:$0xff]   ;;  %v2141_v17 = vld [vmem:[%s2789_s1 + $0x78] sm:$0xff]  }
  0x26   : > { %1782 = vmatprep.subr.bf16.mxu0 %v2114_v18  ;;  %1938 = vmatprep.subr.bf16.mxu1 %v2115_v19  ;;  %v377_v15 = vpack.c.bf16 %v2548_v9, %v2544_v7  ;;  %v255_v18 = vld [vmem:[%s2399_s22 + $0x8] sm:$0xff] }
  0x27   : > { %v279_v25 = vpack.c.bf16 %v2408_v22, %v255_v18  ;;  %v283_v22 = vpack.c.bf16 %v2439_v33, %v2422_v27  ;;  %v2603_v27 = vpack.c.bf16 %v1541_v3, %v2442_v34  ;;  %v2149_v33 = vld [vmem:[%s2789_s1 + $0x188] sm:$0xff]   ;;  %v281_v34 = vpack.c.bf16 %v2472_v45, %v2431_v30  ;;  %v2156_v45 = vld [vmem:[%s2789_s1 + $0x1e0] sm:$0xff]  }
  0x28   : > { %v285_v30 = vpack.c.bf16 %v2492_v52, %v2464_v42  ;;  %v284_v42 = vpack.c.bf16 %v2506_v57, %v2475_v46  ;;  %v288_v46 = vpack.c.bf16 %v2523_v63, %v2495_v53  ;;  %v287_v53 = vpack.c.bf16 %v2544_v7, %v2509_v58  ;;  %v2164_v57 = vld [vmem:[%s2789_s1 + $0x1b0] sm:$0xff]   ;;  %v2167_v58 = vld [vmem:[%s2789_s1 + $0x1b8] sm:$0xff]   ;;  %v1669_v63 = vld [vmem:[%s2399_s22 + $0xe0] sm:$0xff] }
  0x29   : > { %1783 = vmatpush3.bf16.msra.mxu0 %v2116_v20  ;;  %1939 = vmatpush3.bf16.msra.mxu1 %v2115_v19  ;;  %v256_v19 = vld [vmem:[%s2399_s22 + $0x10] sm:$0xff]  ;;  %v2142_v20 = vld [vmem:[%s2789_s1 + $0xb8] sm:$0xff]  }
  0x2a   : > { %1784 = vmatprep.subr.bf16.mxu0 %v2117_v21  ;;  %1940 = vmatprep.subr.bf16.mxu1 %v2118_v24  ;;  %v280_v21 = vpack.c.bf16 %v2419_v26, %v256_v19  ;;  %v2145_v26 = vld [vmem:[%s2789_s1 + $0x200] sm:$0xff]  }
  0x2d   : > { %1785 = vmatpush3.bf16.msra.mxu0 %v2119_v28  ;;  %1941 = vmatpush3.bf16.msra.mxu1 %v2118_v24  ;;  %v2143_v24 = vld [vmem:[%s2789_s1 + $0x38] sm:$0xff]   ;;  %v254_v28 = vld [vmem:[%s2399_s22] sm:$0xff] }
  0x2e   : > { %1822 = vmatprep.subr.bf16.mxu0 %v2120_v32  ;;  %1950 = vmatprep.subr.bf16.mxu1 %v2121_v35  ;;  %v278_v32 = vpack.c.bf16 %v2428_v29, %v254_v28  ;;  %v2600_v29 = vpack.c.bf16 %v2455_v39, %v2411_v23  ;;  %v2151_v23 = vld [vmem:[%s2789_s1 + $0x210] sm:$0xff]  }
  0x2f   : > { %v2152_v39 = vld [vmem:[%s2789_s1 + $0x190] sm:$0xff]  }
  0x30   : > { %606 = vmatmul.mubr.bf16.vlgmr.msra.gmra.mrb[0].mxu0 %v368_v36  ;;  %1943 = vmatmul.mubr.bf16.vlgmr.msra.gmra.mrb[0].mxu1 %v373_v37  ;;  %v2147_v36 = vld [vmem:[%s2789_s1 + $0x1c8] sm:$0xff]  }
  0x31   : > { %1823 = vmatpush3.bf16.msra.mxu0 %v2122_v38  ;;  %1951 = vmatpush3.bf16.msra.mxu1 %v2121_v35  ;;  %v2146_v35 = vld [vmem:[%s2789_s1 + $0x180] sm:$0xff]   ;;  %v2148_v37 = vld [vmem:[%s2789_s1 + $0x208] sm:$0xff]   ;;  %v2150_v38 = vld [vmem:[%s2789_s1 + $0x1d0] sm:$0xff]  }
  0x32   : > { %1824 = vmatprep.subr.bf16.mxu0 %v2123_v40  ;;  %1952 = vmatprep.subr.bf16.mxu1 %v2124_v41  ;;  %v289_v40 = vpack.c.bf16 %v1547_v10, %v2536_v4 }
  0x33   : > { %613 = vmatprep.mubr.bf16.mxu0 %v372_v44  ;;  %1946 = vmatprep.mubr.bf16.mxu1 %v376_v8  ;;  %v2155_v44 = vld [vmem:[%s2789_s1 + $0x198] sm:$0xff]  }
  0x35   : > { %1825 = vmatpush3.bf16.msra.mxu0 %v2125_v43  ;;  %1953 = vmatpush3.bf16.msra.mxu1 %v2124_v41  ;;  %v2153_v41 = vld [vmem:[%s2789_s1 + $0x1d8] sm:$0xff]  }
  0x36   : > { %1826 = vmatprep.subr.bf16.mxu0 %v2126_v47  ;;  %1954 = vmatprep.subr.bf16.mxu1 %v2127_v48  ;;  %v2154_v43 = vld [vmem:[%s2789_s1 + $0x218] sm:$0xff]   ;;  %v2157_v47 = vld [vmem:[%s2789_s1 + $0x220] sm:$0xff]  }
  0x38   : > { %614 = vmatmul.mubr.bf16.gmra.mrb[4].mxu0 %v371_v49  ;;  %1947 = vmatmul.mubr.bf16.gmra.mrb[4].mxu1 %v379_v13  ;;  %v2159_v49 = vld [vmem:[%s2789_s1 + $0x1e8] sm:$0xff]  }
  0x39   : > { %1827 = vmatpush3.bf16.msra.mxu0 %v2128_v50  ;;  %1955 = vmatpush3.bf16.msra.mxu1 %v2127_v48  ;;  %v2158_v48 = vld [vmem:[%s2789_s1 + $0x1a0] sm:$0xff]   ;;  %v2160_v50 = vld [vmem:[%s2789_s1 + $0x228] sm:$0xff]  }
  0x3a   : > { %1828 = vmatprep.subr.bf16.mxu0 %v2129_v51  ;;  %1956 = vmatprep.subr.bf16.mxu1 %v2130_v54  ;;  %v1668_v51 = vld [vmem:[%s2399_s22 + $0xd8] sm:$0xff] }
  0x3b   : > { %621 = vmatprep.mubr.bf16.mxu0 %v375_v56  ;;  %1966 = vmatprep.mubr.bf16.mxu1 %v280_v21  ;;  %v1016_v52 = vpack.c.bf16 %v1668_v51, %v2548_v9  ;;  %v2163_v56 = vld [vmem:[%s2789_s1 + $0x230] sm:$0xff]  }
  0x3d   : > { %1829 = vmatpush3.bf16.msra.mxu0 %v2131_v55  ;;  %1957 = vmatpush3.bf16.msra.mxu1 %v2130_v54  ;;  %v2161_v54 = vld [vmem:[%s2789_s1 + $0x1a8] sm:$0xff]   ;;  %v2162_v55 = vld [vmem:[%s2789_s1 + $0x1f0] sm:$0xff]  }
  0x3e   : > { %1830 = vmatprep.subr.bf16.mxu0 %v2132_v59  ;;  %1958 = vmatprep.subr.bf16.mxu1 %v2133_v60  ;;  %v2165_v59 = vld [vmem:[%s2789_s1 + $0x1f8] sm:$0xff]  }
  0x40   : > { %622 = vmatmul.mubr.bf16.gmra.mrb[8].mxu0 %v374_v61  ;;  %v1670_v61 = vld [vmem:[%s2399_s22 + $0xe8] sm:$0xff]  ;;  %s1749_s22 = sshll.u32 %s2375_s21, 5  ;;  %s228_s21 = sand.u32 1, %s2230_s16  }
  0x41   : > { %1831 = vmatpush3.bf16.msra.mxu0 %v2134_v62  ;;  %1959 = vmatpush3.bf16.msra.mxu1 %v2133_v60  ;;  %v2166_v60 = vld [vmem:[%s2789_s1 + $0x238] sm:$0xff]   ;;  %v1018_v62 = vpack.c.bf16 %v1670_v61, %v2552_v11  ;;  %s2695_s9 = scalar_lea.vmem %s2791_s3, %s1749_s22  ;;  %s1523_s12 = sshll.u32 %s228_s21, 6 }
  0x42   : > { %1832 = vmatprep.subr.bf16.mxu0 %v2135_v1  ;;  %1960 = vmatprep.subr.bf16.mxu1 %v2136_v2  ;;  %v1017_v1 = vpack.c.bf16 %v1669_v63, %v2526_v0  ;;  %s2709_s13 = scalar_lea.vmem [#allocation2], %s1523_s12  ;;  %s2742_s5 = scalar_lea.sflag [#allocation3], %s228_s21 }
  0x43   : > { %629 = vmatprep.mubr.bf16.mxu0 %v378_v6  ;;  %s1421_s24 = sshll.u32 %s2709_s13, 4  ;;  %s2172_s22 = sshll.u32 %s2248_s6, 4  ;;  %s2736_s24 = int_to_ptr.vmem [resolvable:$true] %s1421_s24  ;;  %s2173_s22 = int_to_ptr.vmem [resolvable:$false] %s2172_s22 }
  0x44   : > { %s2168_s18 = scalar_lea.vmem %s2736_s24, 1024  ;;  %s2174_s7 = scalar_lea.vmem %s2173_s22, 2048 }
  0x45   : > { %1833 = vmatpush3.bf16.msra.mxu0 %v2137_v5  ;;  %1961 = vmatpush3.bf16.msra.mxu1 %v2136_v2  ;;  %p2169_p12 = scmp.ne.s32.totalorder %s2736_s24, %s2168_s18  ;;  %p2175_p1 = scmp.lt.s32.totalorder %s2736_s24, %s2173_s22 }
  0x46   : > { %1834 = vmatprep.subr.bf16.mxu0 %v2138_v12  ;;  %1962 = vmatprep.subr.bf16.mxu1 %v2139_v14  ;;  %p2176_p2 = scmp.lt.s32.totalorder %s2174_s7, %s2168_s18 }
  0x47   : > { %p2170_p13 = pnand %p2169_p12, %p2316_p4 }
  0x48   : > { %630 = vmatmul.mubr.bf16.gmra.mrb[12].mxu0 %v377_v15  ;;  %p2177_p3 = por %p2176_p2, %p2175_p1 }
  0x49   : > { %1835 = vmatpush3.bf16.msra.mxu0 %v2140_v16  ;;  %1963 = vmatpush3.bf16.msra.mxu1 %v2139_v14  ;;  %p2171_p0 = pneg %p2170_p13 }
  0x4a   : > { %1836 = vmatprep.subr.bf16.mxu0 %v2141_v17  ;;  %1964 = vmatprep.subr.bf16.mxu1 %v2142_v20 }
  0x4b   : > { %879 = vmatprep.mubr.bf16.mxu0 %v279_v25  ;;  %p2178_p5 = pnand %p2177_p3, %p2171_p0 }
  0x4d   : > { %1837 = vmatpush3.bf16.msra.mxu0 %v2143_v24  ;;  %1965 = vmatpush3.bf16.msra.mxu1 %v2142_v20 }
  0x4e   : > { %1874 = vmatprep.subr.bf16.mxu0 %v2144_v31  ;;  %1974 = vmatprep.subr.bf16.mxu1 %v2145_v26 }
  0x50   : > { %880 = vmatmul.mubr.bf16.vlgmr.msra.gmra.mrb[16].mxu0 %v278_v32  ;;  %1967 = vmatmul.mubr.bf16.vlgmr.msra.gmra.mrb[0].mxu1 %v283_v22 }
  0x51   : > { %1875 = vmatpush3.bf16.msra.mxu0 %v2146_v35  ;;  %1975 = vmatpush3.bf16.msra.mxu1 %v2145_v26 }
  0x52   : > { %1876 = vmatprep.subr.bf16.mxu0 %v2147_v36  ;;  %1976 = vmatprep.subr.bf16.mxu1 %v2148_v37 }
  0x53   : > { %887 = vmatprep.mubr.bf16.mxu0 %v2600_v29  ;;  %1970 = vmatprep.mubr.bf16.mxu1 %v2603_v27 }
  0x55   : > { %1877 = vmatpush3.bf16.msra.mxu0 %v2149_v33  ;;  %1977 = vmatpush3.bf16.msra.mxu1 %v2148_v37 }
  0x56   : > { %1878 = vmatprep.subr.bf16.mxu0 %v2150_v38  ;;  %1978 = vmatprep.subr.bf16.mxu1 %v2151_v23 }
  0x58   : > { %888 = vmatmul.mubr.bf16.gmra.mrb[20].mxu0 %v281_v34  ;;  %1971 = vmatmul.mubr.bf16.gmra.mrb[4].mxu1 %v289_v40 }
  0x59   : > { %1879 = vmatpush3.bf16.msra.mxu0 %v2152_v39  ;;  %1979 = vmatpush3.bf16.msra.mxu1 %v2151_v23 }
  0x5a   : > { %1880 = vmatprep.subr.bf16.mxu0 %v2153_v41  ;;  %1980 = vmatprep.subr.bf16.mxu1 %v2154_v43 }
  0x5b   : > { %895 = vmatprep.mubr.bf16.mxu0 %v285_v30  ;;  %1990 = vmatprep.mubr.bf16.mxu1 %v283_v22 }
  0x5d   : > { %1881 = vmatpush3.bf16.msra.mxu0 %v2155_v44  ;;  %1981 = vmatpush3.bf16.msra.mxu1 %v2154_v43 }
  0x5e   : > { %1882 = vmatprep.subr.bf16.mxu0 %v2156_v45  ;;  %1982 = vmatprep.subr.bf16.mxu1 %v2157_v47 }
  0x60   : > { %896 = vmatmul.mubr.bf16.gmra.mrb[24].mxu0 %v284_v42 }
  0x61   : > { %1883 = vmatpush3.bf16.msra.mxu0 %v2158_v48  ;;  %1983 = vmatpush3.bf16.msra.mxu1 %v2157_v47 }
  0x62   : > { %1884 = vmatprep.subr.bf16.mxu0 %v2159_v49  ;;  %1984 = vmatprep.subr.bf16.mxu1 %v2160_v50 }
  0x63   : > { %903 = vmatprep.mubr.bf16.mxu0 %v288_v46 }
  0x65   : > { %1885 = vmatpush3.bf16.msra.mxu0 %v2161_v54  ;;  %1985 = vmatpush3.bf16.msra.mxu1 %v2160_v50 }
  0x66   : > { %1886 = vmatprep.subr.bf16.mxu0 %v2162_v55  ;;  %1986 = vmatprep.subr.bf16.mxu1 %v2163_v56 }
  0x68   : > { %904 = vmatmul.mubr.bf16.gmra.mrb[28].mxu0 %v287_v53 }
  0x69   : > { %1887 = vmatpush3.bf16.msra.mxu0 %v2164_v57  ;;  %1987 = vmatpush3.bf16.msra.mxu1 %v2163_v56 }
  0x6a   : > { %1888 = vmatprep.subr.bf16.mxu0 %v2165_v59  ;;  %1988 = vmatprep.subr.bf16.mxu1 %v2166_v60 }
  0x6b   : > { %1244 = vmatprep.mubr.bf16.mxu0 %v2600_v29 }
  0x6d   : > { %1889 = vmatpush3.bf16.msra.mxu0 %v2167_v58  ;;  %1989 = vmatpush3.bf16.msra.mxu1 %v2166_v60 }
  0x70   : > { %1245 = vmatmul.mubr.bf16.vlgmr.msra.gmra.mrb[32].mxu0 %v281_v34  ;;  %1991 = vmatmul.mubr.bf16.vlgmr.msra.gmra.mrb[0].mxu1 %v2603_v27 }
  0x71   : > { %1252 = vmatprep.mubr.bf16.mxu0 %v285_v30  ;;  %1994 = vmatprep.mubr.bf16.mxu1 %v289_v40 }
  0x78   : > { %1253 = vmatmul.mubr.bf16.gmra.mrb[36].mxu0 %v284_v42  ;;  %1995 = vmatmul.mubr.bf16.gmra.mrb[4].mxu1 %v1018_v62 }
  0x79   : > { %1260 = vmatprep.mubr.bf16.mxu0 %v288_v46 }
  0x80   : > { %1261 = vmatmul.mubr.bf16.gmra.mrb[40].mxu0 %v287_v53 }
  0x81   : > { %1268 = vmatprep.mubr.bf16.mxu0 %v1017_v1  ;;  %v1752_v1 = vld [vmem:[%s2695_s9] sm:$0xff]  }
  0x88   : > { %1269 = vmatmul.mubr.bf16.gmra.mrb[44].mxu0 %v1016_v52 }
 0x103   : > { %v1786_v2 = vpop.f32.mrb[0].mxu0 }
 0x104   : > { %v1787_v3 = vpop.f32.mrb[1].mxu0 }
 0x105   : > { %v1788_v4 = vadd.f32 %v1787_v3, %v1786_v2  ;;  %v1789_v5 = vpop.f32.mrb[2].mxu0 }
 0x106   : > { %v1790_v6 = vpop.f32.mrb[3].mxu0 }
 0x107   : > { %v1791_v7 = vadd.f32 %v1790_v6, %v1789_v5  ;;  %v2702_v6 = vld [vmem:[%s2790_s2] ss:$0 sm:$0xff] }
 0x10b   : > { %v1792_v8 = vpop.f32.mrb[4].mxu0 }
 0x10c   : > { %v1793_v9 = vpop.f32.mrb[5].mxu0 }
 0x10d   : > { %v1794_v10 = vadd.f32 %v1793_v9, %v1792_v8  ;;  %v1795_v12 = vpop.f32.mrb[6].mxu0  ;;  %v1753_v8 = vunpack.c.l.bf16 %v1752_v1 }
 0x10e   : > { %v1796_v11 = vpop.f32.mrb[7].mxu0 }
 0x10f   : > { %v1797_v13 = vadd.f32 %v1796_v11, %v1795_v12  ;;  %v1754_v11 = vunpack.c.h.bf16 %v1752_v1 }
 0x113   : > { %v1798_v14 = vpop.f32.mrb[8].mxu0 }
 0x114   : > { %v1799_v15 = vpop.f32.mrb[9].mxu0 }
 0x115   : > { %v1800_v16 = vadd.f32 %v1799_v15, %v1798_v14  ;;  %v1801_v17 = vpop.f32.mrb[10].mxu0 }
 0x116   : > { %v1802_v0 = vpop.f32.mrb[11].mxu0 }
 0x117   : > { %v1803_v18 = vadd.f32 %v1802_v0, %v1801_v17 }
 0x11b   : > { %v1804_v19 = vpop.f32.mrb[12].mxu0 }
 0x11c   : > { %v1805_v20 = vpop.f32.mrb[13].mxu0 }
 0x11d   : > { %v1806_v21 = vadd.f32 %v1805_v20, %v1804_v19  ;;  %v1807_v24 = vpop.f32.mrb[14].mxu0 }
 0x11e   : > { %v1808_v25 = vpop.f32.mrb[15].mxu0 }
 0x11f   : > { %v1809_v28 = vadd.f32 %v1808_v25, %v1807_v24 }
 0x123   : > { %v1838_v31 = vpop.f32.mrb[16].mxu0 }
 0x124   : > { %v1839_v26 = vpop.f32.mrb[17].mxu0 }
 0x125   : > { %v1840_v32 = vadd.f32 %v1839_v26, %v1838_v31  ;;  %v1841_v22 = vpop.f32.mrb[18].mxu0 }
 0x126   : > { %v1842_v35 = vpop.f32.mrb[19].mxu0 }
 0x127   : > { %v2001_v36 = vadd.f32 %v1840_v32, %v1788_v4  ;;  %v1843_v37 = vadd.f32 %v1842_v35, %v1841_v22 }
 0x129   : > { %v2007_v29 = vadd.f32 %v1843_v37, %v1791_v7 }
 0x12b   : > { %v1844_v27 = vpop.f32.mrb[20].mxu0 }
 0x12c   : > { %v1845_v33 = vpop.f32.mrb[21].mxu0 }
 0x12d   : > { %v1846_v38 = vadd.f32 %v1845_v33, %v1844_v27  ;;  %v1847_v23 = vpop.f32.mrb[22].mxu0 }
 0x12e   : > { %v1848_v34 = vpop.f32.mrb[23].mxu0 }
 0x12f   : > { %v1998_v39 = vadd.f32 %v1846_v38, %v1794_v10  ;;  %v1849_v40 = vadd.f32 %v1848_v34, %v1847_v23 }
 0x131   : > { %v2004_v41 = vadd.f32 %v1849_v40, %v1797_v13 }
 0x133   : > { %v1850_v43 = vpop.f32.mrb[24].mxu0 }
 0x134   : > { %v1851_v30 = vpop.f32.mrb[25].mxu0 }
 0x135   : > { %v1852_v44 = vadd.f32 %v1851_v30, %v1850_v43  ;;  %v1853_v45 = vpop.f32.mrb[26].mxu0  ;;  %v1768_v30 = vld [vmem:[%s2695_s9 + $0x10] sm:$0xff]  }
 0x136   : > { %v1854_v47 = vpop.f32.mrb[27].mxu0 }
 0x137   : > { %v2683_v42 = vadd.f32 %v1852_v44, %v1800_v16  ;;  %v1855_v48 = vadd.f32 %v1854_v47, %v1853_v45 }
 0x139   : > { %v2685_v49 = vadd.f32 %v1855_v48, %v1803_v18 }
 0x13b   : > { %v1856_v50 = vpop.f32.mrb[28].mxu0 }
 0x13c   : > { %v1857_v51 = vpop.f32.mrb[29].mxu0 }
 0x13d   : > { %v1858_v46 = vadd.f32 %v1857_v51, %v1856_v50  ;;  %v1859_v52 = vpop.f32.mrb[30].mxu0 }
 0x13e   : > { %v1860_v54 = vpop.f32.mrb[31].mxu0 }
 0x13f   : > { %v2687_v55 = vadd.f32 %v1858_v46, %v1806_v21  ;;  %v1861_v56 = vadd.f32 %v1860_v54, %v1859_v52  ;;  %v1767_v21 = vld [vmem:[%s2695_s9 + $0x8] sm:$0xff]   ;;  %v1761_v46 = vunpack.c.l.bf16 %v1768_v30 }
 0x140   : > { %v1758_v33 = vunpack.c.h.bf16 %v1767_v21 }
 0x141   : > { %v2690_v53 = vadd.f32 %v1861_v56, %v1809_v28 }
 0x143   : > { %v1890_v57 = vpop.f32.mrb[32].mxu0  ;;  %v1992_v59 = vpop.f32.mrb[0].mxu1 }
 0x144   : > { %v1891_v60 = vpop.f32.mrb[33].mxu0  ;;  %v1311_v58 = vpop.f32.mrb[1].mxu1 }
 0x145   : > { %v1892_v61 = vadd.f32 %v1891_v60, %v1890_v57  ;;  %v1893_v62 = vpop.f32.mrb[34].mxu0  ;;  %v1993_v63 = vpop.f32.mrb[2].mxu1  ;;  %v1762_v57 = vunpack.c.h.bf16 %v1768_v30 }
 0x146   : > { %v1894_v2 = vpop.f32.mrb[35].mxu0  ;;  %v1314_v3 = vpop.f32.mrb[3].mxu1 }
 0x147   : > { %v2002_v4 = vadd.f32 %v2001_v36, %v1892_v61  ;;  %v1895_v5 = vadd.f32 %v1894_v2, %v1893_v62  ;;  %v1757_v36 = vunpack.c.l.bf16 %v1767_v21 }
 0x149   : > { %v2003_v7 = vadd.f32 %v2002_v4, %v1311_v58  ;;  %v2008_v9 = vadd.f32 %v2007_v29, %v1895_v5 }
 0x14b   : > { %v1357_v10 = vadd.f32 %v2003_v7, %v2702_v6  ;;  %v2009_v12 = vadd.f32 %v2008_v9, %v1314_v3  ;;  %v1896_v13 = vpop.f32.mrb[36].mxu0  ;;  %v1996_v14 = vpop.f32.mrb[4].mxu1 }
 0x14c   : > { %v1897_v15 = vpop.f32.mrb[37].mxu0  ;;  %v1327_v16 = vpop.f32.mrb[5].mxu1 }
 0x14d   : > { %v1381_v17 = vadd.f32 %v1753_v8, %v1357_v10  ;;  %v1358_v0 = vadd.f32 %v2009_v12, %v2702_v6  ;;  %v1898_v18 = vadd.f32 %v1897_v15, %v1896_v13  ;;  %v1899_v19 = vpop.f32.mrb[38].mxu0  ;;  %v1997_v20 = vpop.f32.mrb[6].mxu1 }
 0x14e   : > { %v1900_v24 = vpop.f32.mrb[39].mxu0  ;;  %v1330_v25 = vpop.f32.mrb[7].mxu1 }
 0x14f   : > { %v1389_v28 = vmax.f32 %v1381_v17, 0.0  ;;  %v1382_v31 = vadd.f32 %v1754_v11, %v1358_v0  ;;  %v1999_v26 = vadd.f32 %v1998_v39, %v1898_v18  ;;  %v1901_v32 = vadd.f32 %v1900_v24, %v1899_v19 }
 0x151   : > { %1397 = vst [vmem:[%s2709_s13] sm:$0xff] %v1389_v28  ;;  %v1390_v22 = vmax.f32 %v1382_v31, 0.0  ;;  %v2000_v35 = vadd.f32 %v1999_v26, %v1992_v59  ;;  %v2005_v37 = vadd.f32 %v2004_v41, %v1901_v32 }
 0x153   : > { %1398 = vst [vmem:[%s2709_s13 + $0x8] sm:$0xff] %v1390_v22  ;;  %v1359_v29 = vadd.f32 %v2000_v35, %v2702_v6  ;;  %v2006_v27 = vadd.f32 %v2005_v37, %v1993_v63  ;;  %v1902_v38 = vpop.f32.mrb[40].mxu0  ;;  %v1769_v63 = vld [vmem:[%s2695_s9 + $0x18] sm:$0xff]  }
 0x154   : > { %v1903_v23 = vpop.f32.mrb[41].mxu0  ;;  %v1765_v8 = vunpack.c.l.bf16 %v1769_v63  ;;  %v1766_v11 = vunpack.c.h.bf16 %v1769_v63 }
 0x155   : > { %v1383_v34 = vadd.f32 %v1757_v36, %v1359_v29  ;;  %v1360_v39 = vadd.f32 %v2006_v27, %v2702_v6  ;;  %v1904_v40 = vadd.f32 %v1903_v23, %v1902_v38  ;;  %v1905_v43 = vpop.f32.mrb[42].mxu0 }
 0x156   : > { %v1906_v44 = vpop.f32.mrb[43].mxu0 }
 0x157   : > { %v1391_v45 = vmax.f32 %v1383_v34, 0.0  ;;  %v1384_v47 = vadd.f32 %v1758_v33, %v1360_v39  ;;  %v2014_v41 = vadd.f32 %v2683_v42, %v1904_v40  ;;  %v1907_v48 = vadd.f32 %v1906_v44, %v1905_v43 }
 0x159   : > { %1399 = vst [vmem:[%s2709_s13 + $0x10] sm:$0xff] %v1391_v45  ;;  %v1392_v50 = vmax.f32 %v1384_v47, 0.0  ;;  %v2015_v51 = vadd.f32 %v2014_v41, %v1327_v16  ;;  %v2020_v52 = vadd.f32 %v2685_v49, %v1907_v48 }
 0x15b   : > { %1400 = vst [vmem:[%s2709_s13 + $0x18] sm:$0xff] %v1392_v50  ;;  %v1361_v54 = vadd.f32 %v2015_v51, %v2702_v6  ;;  %v2021_v56 = vadd.f32 %v2020_v52, %v1330_v25  ;;  %v1908_v59 = vpop.f32.mrb[44].mxu0 }
 0x15c   : > { %v1909_v60 = vpop.f32.mrb[45].mxu0 }
 0x15d   : > { %v1385_v58 = vadd.f32 %v1761_v46, %v1361_v54  ;;  %v1362_v42 = vadd.f32 %v2021_v56, %v2702_v6  ;;  %v1910_v61 = vadd.f32 %v1909_v60, %v1908_v59  ;;  %v1911_v62 = vpop.f32.mrb[46].mxu0 }
 0x15e   : > { %v1912_v1 = vpop.f32.mrb[47].mxu0 }
 0x15f   : > { %v1393_v2 = vmax.f32 %v1385_v58, 0.0  ;;  %v1386_v49 = vadd.f32 %v1762_v57, %v1362_v42  ;;  %v2011_v3 = vadd.f32 %v2687_v55, %v1910_v61  ;;  %v1913_v4 = vadd.f32 %v1912_v1, %v1911_v62 }
 0x161   : > { %1401 = vst [vmem:[%s2709_s13 + $0x20] sm:$0xff] %v1393_v2  ;;  %v1394_v5 = vmax.f32 %v1386_v49, 0.0  ;;  %v2012_v7 = vadd.f32 %v2011_v3, %v1996_v14  ;;  %v2017_v9 = vadd.f32 %v2690_v53, %v1913_v4 }
 0x163   : > { %1402 = vst [vmem:[%s2709_s13 + $0x28] sm:$0xff] %v1394_v5  ;;  %v1363_v10 = vadd.f32 %v2012_v7, %v2702_v6  ;;  %v2018_v12 = vadd.f32 %v2017_v9, %v1997_v20 }
 0x165   : > { %v1387_v13 = vadd.f32 %v1765_v8, %v1363_v10  ;;  %v1364_v15 = vadd.f32 %v2018_v12, %v2702_v6 }
 0x167   : > { %v1395_v55 = vmax.f32 %v1387_v13, 0.0  ;;  %v1388_v16 = vadd.f32 %v1766_v11, %v1364_v15 }
 0x169   : > { %1403 = vst [vmem:[%s2709_s13 + $0x30] sm:$0xff] %v1395_v55  ;;  %v1396_v53 = vmax.f32 %v1388_v16, 0.0 }
 0x16b   : > { %1404 = vst [vmem:[%s2709_s13 + $0x38] sm:$0xff] %v1396_v53 }
 0x16c   : > { %2181 = shalt.err (!%p2178_p5)
}
 0x16d   : > { %s2182_s8 = scalar_lea.hbm %s2734_s30, 1024  ;;  %s2186_s10 = scalar_lea.hbm %s2792_s4, 2048 }
 0x16e   : > { %p2183_p6 = scmp.ne.s32.totalorder %s2734_s30, %s2182_s8  ;;  %p2187_p10 = scmp.lt.u32.totalorder %s2734_s30, %s2792_s4 }
 0x16f   : > { %p2188_p11 = scmp.lt.u32.totalorder %s2186_s10, %s2182_s8  ;;  %p2190_p13 = scmp.lt.u32.totalorder %s2182_s8, %s2734_s30 }
 0x170   : > { %p2184_p7 = pnand %p2183_p6, %p2316_p4 }
 0x171   : > { %p2189_p12 = por %p2188_p11, %p2187_p10 }
 0x172   : > { %p2185_p9 = pneg %p2184_p7 }
 0x173   : > { %p2191_p0 = por %p2190_p13, %p2189_p12 }
 0x175   : > { %p2192_p1 = pnand %p2191_p0, %p2185_p9 }
 0x177   : > { %2195 = shalt.err (!%p2192_p1)
}
 0x178   : > { %s2249_s13 = smov 128   ;;  %s2250_s14 = smov 8  }
 0x179   : > { %2039 = dma.vmem_to_hbm [thread:$0]  (%p2316_p4), %s2736_s24, 1024, %s2734_s30, %s2742_s5, %s2249_s13, %s2249_s13, %s2250_s14  }
 0x17a PF: > { %p2045_p2 = scmp.ge.s32.totalorder %s2246_s20, 2  ;;  %s1436_s26 = sand.u32 1, %s2226_s15  }
 0x17b   : > { %s1437_s29 = scalar_lea.sflag [#allocation3], %s1436_s26 }
 0x17c   : > { %p2042_p3 = pnand %p2045_p2, %p2323_p8 }
 0x17e   : > { %2221 = dma.done.wait (!%p2042_p3), %s1437_s29, 1024  }
 0x17f   : > { %2223 = vsyncadd (!%p2042_p3), %s1437_s29, 4294966272  ;;  %s17_s20 = sadd.s32 1, %s2246_s20   ;;  %s2795_s15 = smov %s2230_s16 }
 0x180   : > { %p14_p5 = scmp.ge.s32.totalorder %s17_s20, 4   ;;  %s2796_s16 = smov %s2234_s17 }
 0x181   : > { %s2797_s17 = smov %s2329_s28  ;;  %s2798_s18 = smov %s2242_s19 }
 0x182   : > { %s2799_s19 = smov %s2801_s23  ;;  %16 = sbr.rel (!%p14_p5) target bundleno = 4 (0x4), region = 79 }
 0x189   :  { %1442 = vsyncpa [#allocation3], 1 }
 0x18a   :  { %1444 = vsyncpa [#allocation3 + $0x1], 1 }

</bundles_post_ra>
